<compile_context>
chip_gen: v7x
topology: tpu7x:2x2x1
jax: 0.10.0
libtpu: 0.0.40
codegen_flags: <defaults>
</compile_context>

<pallas_src>
import jax
import jax.numpy as jnp
from jax.experimental import pallas as pl
from jax.experimental.pallas import tpu as pltpu

EPS = 1e-5
LANE = 128


def _round_up(x, m):
    return (x + m - 1) // m * m


# --------------------------------------------------------------------------------------------
# In-kernel helpers
# --------------------------------------------------------------------------------------------
def _conv3x3_via_scratch(act_bf16, pad_ref, w_ref, h, w, cp):
    """3x3 stride-1 'same' conv of an (h, w, cp) bf16 activation.

    pad_ref: (h+2, w+2, cp) bf16 VMEM scratch used to hold the zero-ring-padded activation.
    w_ref:   Ref to (3, 3*cp, cp) bf16 weights (for each dy, the 3 dx taps stacked along K in
             (dx, cin) order).
    Returns  (h*w, cp) float32 conv output (interior only).
    """
    # Build the padded activation in scratch (zero ring + interior).  Re-zeroed every grid step
    # so it is correct regardless of how the parallel grid is sharded across cores.
    pad_ref[...] = jnp.zeros_like(pad_ref)
    pad_ref[pl.ds(1, h), pl.ds(1, w), :] = act_bf16
    padded = pad_ref[...]                                     # (h+2, w+2, cp) bf16

    acc = jnp.zeros((h * w, cp), jnp.float32)
    for dy in range(3):                                       # 3 matmuls, K = 3*cp each
        taps = jnp.concatenate(
            [padded[dy:dy + h, dx:dx + w, :] for dx in range(3)], axis=-1)  # (h, w, 3*cp)
        acc = acc + jnp.dot(taps.reshape(h * w, 3 * cp), w_ref[dy],
                            preferred_element_type=jnp.float32)
    return acc


# --------------------------------------------------------------------------------------------
# Kernels
# --------------------------------------------------------------------------------------------
def _stage1_kernel(x_ref, w_ref, y1_ref, sum_ref, sq_ref, pad_ref):
    """conv1 (interior only) + per-image partial BN1 statistics."""
    _, h, w, cp = x_ref.shape
    acc = _conv3x3_via_scratch(x_ref[0], pad_ref, w_ref, h, w, cp)        # (h*w, cp) f32
    y1_ref[...] = acc.reshape(1, h, w, cp).astype(jnp.bfloat16)
    sum_ref[...] = jnp.sum(acc, axis=0, keepdims=True).reshape(1, 1, cp)
    sq_ref[...] = jnp.sum(acc * acc, axis=0, keepdims=True).reshape(1, 1, cp)


def _stage2_kernel(y1_ref, bn1_ref, w_ref, y2_ref, sum_ref, sq_ref, pad_ref):
    """BN1 affine + ReLU (fused, f32 math), conv2, per-image partial BN2 statistics."""
    _, h, w, cp = y1_ref.shape
    bn1 = bn1_ref[...]                                        # (2, cp): [scale, shift]
    scale = bn1[0].reshape(1, 1, cp)
    shift = bn1[1].reshape(1, 1, cp)
    act = jnp.maximum(y1_ref[0].astype(jnp.float32) * scale + shift, 0.0)  # f32 (v5e-safe)

    acc = _conv3x3_via_scratch(act.astype(jnp.bfloat16), pad_ref, w_ref, h, w, cp)
    y2_ref[...] = acc.reshape(1, h, w, cp).astype(jnp.bfloat16)
    sum_ref[...] = jnp.sum(acc, axis=0, keepdims=True).reshape(1, 1, cp)
    sq_ref[...] = jnp.sum(acc * acc, axis=0, keepdims=True).reshape(1, 1, cp)


# --------------------------------------------------------------------------------------------
# Wrapper-side parameter preprocessing
# --------------------------------------------------------------------------------------------
def _fold_conv_weight(wt, cp):
    """(3, 3, cin, cout) f32 -> (3, 3*cp, cp) bf16: channels zero-padded, per-dy dx taps folded
    into K in (dx, cin) order (matches the in-kernel concat order)."""
    kh, kw, cin, cout = wt.shape
    wpad = jnp.zeros((kh, kw, cp, cp), jnp.float32).at[:, :, :cin, :cout].set(wt)
    return wpad.reshape(kh, kw * cp, cp).astype(jnp.bfloat16)


def _pad_vec(v, cp):
    v = jnp.asarray(v, jnp.float32).reshape(-1)
    return jnp.zeros((cp,), jnp.float32).at[:v.shape[0]].set(v)


def _bn_affine(s_part, ss_part, count, gamma, beta):
    """Fold batch statistics + (gamma, beta) into per-channel (scale, shift)."""
    s = jnp.sum(s_part, axis=(0, 1))              # (cp,)
    ss = jnp.sum(ss_part, axis=(0, 1))
    mean = s / count
    # NOTE: E[x^2] - E[x]^2 in f32; clamped at 0.  Fine at these scales (see review).
    var = jnp.maximum(ss / count - mean * mean, 0.0)
    scale = gamma * jax.lax.rsqrt(var + EPS)
    shift = beta - mean * scale
    return jnp.stack([scale, shift], axis=0)      # (2, cp) f32


# --------------------------------------------------------------------------------------------
# Forward pass
# --------------------------------------------------------------------------------------------
@jax.jit
def resnet_block_forward(x_nchw, params):
    """x_nchw: (N, C, H, W) float32, C == input_dim == output_dim."""
    n, c, h, w = x_nchw.shape
    cout = params["w1"].shape[3]
    assert cout == c, "residual add requires input_dim == output_dim"
    cp = _round_up(max(c, cout), LANE)

    x_nhwc = jnp.transpose(x_nchw, (0, 2, 3, 1)).astype(jnp.float32)      # NHWC, kept for residual
    # Only relayout pass in the wrapper: channel lane-pad + bf16 cast (no spatial jnp.pad;
    # the zero ring is built inside the kernels' VMEM scratch).
    x_cp = jnp.pad(x_nhwc, ((0, 0), (0, 0), (0, 0), (0, cp - c))).astype(jnp.bfloat16)

    w1f = _fold_conv_weight(params["w1"], cp)
    w2f = _fold_conv_weight(params["w2"], cp)
    g1, be1 = _pad_vec(params["g1"], cp), _pad_vec(params["beta1"], cp)
    g2, be2 = _pad_vec(params["g2"], cp), _pad_vec(params["beta2"], cp)
    # NOTE: conv biases b1/b2 are intentionally not used in the kernels — a per-channel bias
    # right before training-mode BatchNorm is exactly cancelled by the batch-mean subtraction.

    cparams = pltpu.CompilerParams(
        dimension_semantics=("parallel",),
        # <=~56 MiB keeps v7x (64 MiB physical) safe; v6e/v5e can raise this for larger blocks.
        vmem_limit_bytes=48 * 1024 * 1024,
    )
    count = n * h * w

    stat_shape = jax.ShapeDtypeStruct((n, 1, cp), jnp.float32)
    stat_spec = pl.BlockSpec((1, 1, cp), lambda i: (i, 0, 0))
    img_spec = pl.BlockSpec((1, h, w, cp), lambda i: (i, 0, 0, 0))
    w_spec = pl.BlockSpec((3, 3 * cp, cp), lambda i: (0, 0, 0))
    pad_scratch = pltpu.VMEM((h + 2, w + 2, cp), jnp.bfloat16)

    # -------- stage 1: conv1 + partial BN1 stats --------
    y1, s1, ss1 = pl.pallas_call(
        _stage1_kernel,
        grid=(n,),
        in_specs=[img_spec, w_spec],
        out_specs=(img_spec, stat_spec, stat_spec),
        out_shape=(
            jax.ShapeDtypeStruct((n, h, w, cp), jnp.bfloat16),
            stat_shape, stat_shape,
        ),
        scratch_shapes=[pad_scratch],
        compiler_params=cparams,
    )(x_cp, w1f)

    bn1 = _bn_affine(s1, ss1, count, g1, be1)

    # -------- stage 2: fused BN1+ReLU -> conv2 + partial BN2 stats --------
    y2, s2, ss2 = pl.pallas_call(
        _stage2_kernel,
        grid=(n,),
        in_specs=[img_spec, pl.BlockSpec((2, cp), lambda i: (0, 0)), w_spec],
        out_specs=(img_spec, stat_spec, stat_spec),
        out_shape=(
            jax.ShapeDtypeStruct((n, h, w, cp), jnp.bfloat16),
            stat_shape, stat_shape,
        ),
        scratch_shapes=[pad_scratch],
        compiler_params=cparams,
    )(y1, bn1, w2f)

    bn2 = _bn_affine(s2, ss2, count, g2, be2)

    # -------- stage 3: BN2 + ReLU + residual, in plain jnp so XLA fuses it with the channel
    # slice and the NHWC->NCHW transpose (one HBM pass instead of kernel + relayout) --------
    scale2 = bn2[0, :c].reshape(1, 1, 1, c)
    shift2 = bn2[1, :c].reshape(1, 1, 1, c)
    h2 = jnp.maximum(y2[:, :, :, :c].astype(jnp.float32) * scale2 + shift2, 0.0)
    return jnp.transpose(x_nhwc + h2, (0, 3, 1, 2))                        # back to NCHW


# --------------------------------------------------------------------------------------------
# Pure-JAX reference (PyTorch semantics, matmul precision matched: bf16 operands, f32 accum)
# --------------------------------------------------------------------------------------------
def _reference_forward(x_nchw, params):
    x = jnp.transpose(x_nchw, (0, 2, 3, 1)).astype(jnp.float32)

    def conv(z, wt, b):
        y = jax.lax.conv_general_dilated(
            z.astype(jnp.bfloat16), wt.astype(jnp.bfloat16),
            window_strides=(1, 1), padding=((1, 1), (1, 1)),
            dimension_numbers=("NHWC", "HWIO", "NHWC"),
            preferred_element_type=jnp.float32)
        return y + b.reshape(1, 1, 1, -1)

    def bn(y, g, be):
        mean = jnp.mean(y, axis=(0, 1, 2), keepdims=True)
        var = jnp.mean(jnp.square(y - mean), axis=(0, 1, 2), keepdims=True)
        return ((y - mean) * jax.lax.rsqrt(var + EPS) * g.reshape(1, 1, 1, -1)
                + be.reshape(1, 1, 1, -1))

    h1 = jax.nn.relu(bn(conv(x, params["w1"], params["b1"]), params["g1"], params["beta1"]))
    h2 = jax.nn.relu(bn(conv(h1, params["w2"], params["b2"]), params["g2"], params["beta2"]))
    return jnp.transpose(x + h2, (0, 3, 1, 2))


def make_params(key, cin, cout):
    ks = jax.random.split(key, 8)
    # PyTorch weight layout is (Cout, Cin, 3, 3); stored here directly as (3, 3, Cin, Cout).
    w1 = jax.random.normal(ks[0], (3, 3, cin, cout), jnp.float32) * 0.1
    b1 = jax.random.normal(ks[1], (1, cout), jnp.float32) * 0.1
    g1 = 1.0 + 0.1 * jax.random.normal(ks[2], (1, cout), jnp.float32)
    beta1 = 0.1 * jax.random.normal(ks[3], (1, cout), jnp.float32)
    w2 = jax.random.normal(ks[4], (3, 3, cout, cout), jnp.float32) * 0.1
    b2 = jax.random.normal(ks[5], (1, cout), jnp.float32) * 0.1
    g2 = 1.0 + 0.1 * jax.random.normal(ks[6], (1, cout), jnp.float32)
    beta2 = 0.1 * jax.random.normal(ks[7], (1, cout), jnp.float32)
    return dict(w1=w1, b1=b1, g1=g1, beta1=beta1, w2=w2, b2=b2, g2=g2, beta2=beta2)


if __name__ == "__main__":
    key = jax.random.PRNGKey(0)
    k_x, k_p = jax.random.split(key)

    N, C, H, W = 2, 8, 16, 16     # residual requires input_dim == output_dim
    x = jax.random.normal(k_x, (N, C, H, W), jnp.float32)
    params = make_params(k_p, C, C)

    out = jax.block_until_ready(resnet_block_forward(x, params))
    assert out.shape == (N, C, H, W)
    assert bool(jnp.all(jnp.isfinite(out)))

    ref = jax.block_until_ready(_reference_forward(x, params))
    err = float(jnp.max(jnp.abs(out - ref)))
    # bf16 inter-stage storage (vs. the reference's f32 conv outputs) adds ~1e-2 of rounding.
    assert err < 3e-2, f"mismatch vs reference: {err}"

    print("KERNEL_OK")
</pallas_src>

<mosaic_0001>
module attributes {stable_mosaic.version = 11 : i64} {
  func.func @_stage1_kernel(%arg0: i32, %arg1: memref<1x16x16x128xbf16, #tpu.memory_space<vmem>>, %arg2: memref<3x384x128xbf16, #tpu.memory_space<vmem>>, %arg3: memref<1x16x16x128xbf16, #tpu.memory_space<vmem>>, %arg4: memref<1x1x128xf32, #tpu.memory_space<vmem>>, %arg5: memref<1x1x128xf32, #tpu.memory_space<vmem>>, %arg6: memref<18x18x128xbf16, #tpu.memory_space<vmem>>) attributes {dimension_semantics = [#tpu.dimension_semantics<parallel>], iteration_bounds = array<i64: 2>, scalar_prefetch = 0 : i64, scratch_operands = 1 : i64, tpu.core_type = #tpu.core_type<tc>, window_params = [{transform_indices = @transform_0, window_bounds = array<i64: 1, 16, 16, 128>}, {pipeline_mode = #tpu.pipeline_mode<synchronous>, transform_indices = @transform_1, window_bounds = array<i64: 3, 384, 128>}, {transform_indices = @transform_2, window_bounds = array<i64: 1, 16, 16, 128>}, {transform_indices = @transform_3, window_bounds = array<i64: 1, 1, 128>}, {transform_indices = @transform_4, window_bounds = array<i64: 1, 1, 128>}]} {
    %c0 = arith.constant 0 : index
    %c0_0 = arith.constant 0 : index
    %c0_1 = arith.constant 0 : index
    %c0_2 = arith.constant 0 : index
    %0 = vector.load %arg1[%c0, %c0_0, %c0_1, %c0_2] : memref<1x16x16x128xbf16, #tpu.memory_space<vmem>>, vector<1x16x16x128xbf16>
    %1 = vector.shape_cast %0 : vector<1x16x16x128xbf16> to vector<16x16x128xbf16>
    %cst = arith.constant 0.000000e+00 : bf16
    %2 = vector.broadcast %cst : bf16 to vector<18x18x128xbf16>
    %c0_3 = arith.constant 0 : index
    %c0_4 = arith.constant 0 : index
    %c0_5 = arith.constant 0 : index
    %3 = vector.load %arg6[%c0_3, %c0_4, %c0_5] : memref<18x18x128xbf16, #tpu.memory_space<vmem>>, vector<18x18x128xbf16>
    tpu.vector_store %arg6[%c0_3, %c0_4, %c0_5], %2 {strides = array<i32>} : memref<18x18x128xbf16, #tpu.memory_space<vmem>>, vector<18x18x128xbf16>,
    %c1 = arith.constant 1 : index
    %c1_6 = arith.constant 1 : index
    %c0_7 = arith.constant 0 : index
    %4 = vector.load %arg6[%c1, %c1_6, %c0_7] : memref<18x18x128xbf16, #tpu.memory_space<vmem>>, vector<16x16x128xbf16>
    tpu.vector_store %arg6[%c1, %c1_6, %c0_7], %1 {strides = array<i32>} : memref<18x18x128xbf16, #tpu.memory_space<vmem>>, vector<16x16x128xbf16>,
    %c0_8 = arith.constant 0 : index
    %c0_9 = arith.constant 0 : index
    %c0_10 = arith.constant 0 : index
    %5 = vector.load %arg6[%c0_8, %c0_9, %c0_10] : memref<18x18x128xbf16, #tpu.memory_space<vmem>>, vector<18x18x128xbf16>
    %cst_11 = arith.constant 0.000000e+00 : f32
    %6 = vector.broadcast %cst_11 : f32 to vector<256x128xf32>
    %7 = vector.extract_strided_slice %5 {offsets = [0, 0, 0], sizes = [16, 16, 128], strides = [1, 1, 1]} : vector<18x18x128xbf16> to vector<16x16x128xbf16>
    %8 = vector.extract_strided_slice %5 {offsets = [0, 1, 0], sizes = [16, 16, 128], strides = [1, 1, 1]} : vector<18x18x128xbf16> to vector<16x16x128xbf16>
    %9 = vector.extract_strided_slice %5 {offsets = [0, 2, 0], sizes = [16, 16, 128], strides = [1, 1, 1]} : vector<18x18x128xbf16> to vector<16x16x128xbf16>
    %10 = tpu.concatenate %7, %8, %9 in 2 : vector<16x16x128xbf16>, vector<16x16x128xbf16>, vector<16x16x128xbf16> -> vector<16x16x384xbf16>
    %11 = vector.shape_cast %10 : vector<16x16x384xbf16> to vector<256x384xbf16>
    %c0_12 = arith.constant 0 : index
    %c0_13 = arith.constant 0 : index
    %c0_14 = arith.constant 0 : index
    %12 = vector.load %arg2[%c0_12, %c0_13, %c0_14] : memref<3x384x128xbf16, #tpu.memory_space<vmem>>, vector<1x384x128xbf16>
    %13 = vector.shape_cast %12 : vector<1x384x128xbf16> to vector<384x128xbf16>
    %cst_15 = arith.constant dense<0.000000e+00> : vector<256x128xf32>
    %14 = tpu.matmul %11, %13, %cst_15 {dimension_numbers = #tpu.dot_dimension_numbers<[1], [0], [0], [1], [0, 0, 1, 1], [], []>} : vector<256x384xbf16>, vector<384x128xbf16>, vector<256x128xf32> -> vector<256x128xf32>
    %15 = arith.addf %6, %14 : vector<256x128xf32>
    %16 = vector.extract_strided_slice %5 {offsets = [1, 0, 0], sizes = [16, 16, 128], strides = [1, 1, 1]} : vector<18x18x128xbf16> to vector<16x16x128xbf16>
    %17 = vector.extract_strided_slice %5 {offsets = [1, 1, 0], sizes = [16, 16, 128], strides = [1, 1, 1]} : vector<18x18x128xbf16> to vector<16x16x128xbf16>
    %18 = vector.extract_strided_slice %5 {offsets = [1, 2, 0], sizes = [16, 16, 128], strides = [1, 1, 1]} : vector<18x18x128xbf16> to vector<16x16x128xbf16>
    %19 = tpu.concatenate %16, %17, %18 in 2 : vector<16x16x128xbf16>, vector<16x16x128xbf16>, vector<16x16x128xbf16> -> vector<16x16x384xbf16>
    %20 = vector.shape_cast %19 : vector<16x16x384xbf16> to vector<256x384xbf16>
    %c1_16 = arith.constant 1 : index
    %c0_17 = arith.constant 0 : index
    %c0_18 = arith.constant 0 : index
    %21 = vector.load %arg2[%c1_16, %c0_17, %c0_18] : memref<3x384x128xbf16, #tpu.memory_space<vmem>>, vector<1x384x128xbf16>
    %22 = vector.shape_cast %21 : vector<1x384x128xbf16> to vector<384x128xbf16>
    %cst_19 = arith.constant dense<0.000000e+00> : vector<256x128xf32>
    %23 = tpu.matmul %20, %22, %cst_19 {dimension_numbers = #tpu.dot_dimension_numbers<[1], [0], [0], [1], [0, 0, 1, 1], [], []>} : vector<256x384xbf16>, vector<384x128xbf16>, vector<256x128xf32> -> vector<256x128xf32>
    %24 = arith.addf %15, %23 : vector<256x128xf32>
    %25 = vector.extract_strided_slice %5 {offsets = [2, 0, 0], sizes = [16, 16, 128], strides = [1, 1, 1]} : vector<18x18x128xbf16> to vector<16x16x128xbf16>
    %26 = vector.extract_strided_slice %5 {offsets = [2, 1, 0], sizes = [16, 16, 128], strides = [1, 1, 1]} : vector<18x18x128xbf16> to vector<16x16x128xbf16>
    %27 = vector.extract_strided_slice %5 {offsets = [2, 2, 0], sizes = [16, 16, 128], strides = [1, 1, 1]} : vector<18x18x128xbf16> to vector<16x16x128xbf16>
    %28 = tpu.concatenate %25, %26, %27 in 2 : vector<16x16x128xbf16>, vector<16x16x128xbf16>, vector<16x16x128xbf16> -> vector<16x16x384xbf16>
    %29 = vector.shape_cast %28 : vector<16x16x384xbf16> to vector<256x384xbf16>
    %c2 = arith.constant 2 : index
    %c0_20 = arith.constant 0 : index
    %c0_21 = arith.constant 0 : index
    %30 = vector.load %arg2[%c2, %c0_20, %c0_21] : memref<3x384x128xbf16, #tpu.memory_space<vmem>>, vector<1x384x128xbf16>
    %31 = vector.shape_cast %30 : vector<1x384x128xbf16> to vector<384x128xbf16>
    %cst_22 = arith.constant dense<0.000000e+00> : vector<256x128xf32>
    %32 = tpu.matmul %29, %31, %cst_22 {dimension_numbers = #tpu.dot_dimension_numbers<[1], [0], [0], [1], [0, 0, 1, 1], [], []>} : vector<256x384xbf16>, vector<384x128xbf16>, vector<256x128xf32> -> vector<256x128xf32>
    %33 = arith.addf %24, %32 : vector<256x128xf32>
    %34 = vector.shape_cast %33 : vector<256x128xf32> to vector<1x16x16x128xf32>
    %35 = arith.truncf %34 : vector<1x16x16x128xf32> to vector<1x16x16x128xbf16>
    %c0_23 = arith.constant 0 : index
    %c0_24 = arith.constant 0 : index
    %c0_25 = arith.constant 0 : index
    %c0_26 = arith.constant 0 : index
    %36 = vector.load %arg3[%c0_23, %c0_24, %c0_25, %c0_26] : memref<1x16x16x128xbf16, #tpu.memory_space<vmem>>, vector<1x16x16x128xbf16>
    tpu.vector_store %arg3[%c0_23, %c0_24, %c0_25, %c0_26], %35 {strides = array<i32>} : memref<1x16x16x128xbf16, #tpu.memory_space<vmem>>, vector<1x16x16x128xbf16>,
    %cst_27 = arith.constant dense<0.000000e+00> : vector<128xf32>
    %37 = vector.multi_reduction <add>, %33, %cst_27 [0] : vector<256x128xf32> to vector<128xf32>
    %38 = vector.shape_cast %37 : vector<128xf32> to vector<1x128xf32>
    %39 = vector.shape_cast %38 : vector<1x128xf32> to vector<1x1x128xf32>
    %c0_28 = arith.constant 0 : index
    %c0_29 = arith.constant 0 : index
    %c0_30 = arith.constant 0 : index
    %40 = vector.load %arg4[%c0_28, %c0_29, %c0_30] : memref<1x1x128xf32, #tpu.memory_space<vmem>>, vector<1x1x128xf32>
    tpu.vector_store %arg4[%c0_28, %c0_29, %c0_30], %39 {strides = array<i32>} : memref<1x1x128xf32, #tpu.memory_space<vmem>>, vector<1x1x128xf32>,
    %41 = arith.mulf %33, %33 : vector<256x128xf32>
    %cst_31 = arith.constant dense<0.000000e+00> : vector<128xf32>
    %42 = vector.multi_reduction <add>, %41, %cst_31 [0] : vector<256x128xf32> to vector<128xf32>
    %43 = vector.shape_cast %42 : vector<128xf32> to vector<1x128xf32>
    %44 = vector.shape_cast %43 : vector<1x128xf32> to vector<1x1x128xf32>
    %c0_32 = arith.constant 0 : index
    %c0_33 = arith.constant 0 : index
    %c0_34 = arith.constant 0 : index
    %45 = vector.load %arg5[%c0_32, %c0_33, %c0_34] : memref<1x1x128xf32, #tpu.memory_space<vmem>>, vector<1x1x128xf32>
    tpu.vector_store %arg5[%c0_32, %c0_33, %c0_34], %44 {strides = array<i32>} : memref<1x1x128xf32, #tpu.memory_space<vmem>>, vector<1x1x128xf32>,
    return
  }
  func.func @transform_0(%arg0: i32) -> (i32, i32, i32, i32) {
    %c0_i32 = arith.constant 0 : i32
    %c0_i32_0 = arith.constant 0 : i32
    %c0_i32_1 = arith.constant 0 : i32
    %c0_i32_2 = arith.constant 0 : i32
    return %arg0, %c0_i32, %c0_i32_0, %c0_i32_1 : i32, i32, i32, i32
  }
  func.func @transform_1(%arg0: i32) -> (i32, i32, i32) {
    %c0_i32 = arith.constant 0 : i32
    %c0_i32_0 = arith.constant 0 : i32
    %c0_i32_1 = arith.constant 0 : i32
    %c0_i32_2 = arith.constant 0 : i32
    return %c0_i32, %c0_i32_0, %c0_i32_1 : i32, i32, i32
  }
  func.func @transform_2(%arg0: i32) -> (i32, i32, i32, i32) {
    %c0_i32 = arith.constant 0 : i32
    %c0_i32_0 = arith.constant 0 : i32
    %c0_i32_1 = arith.constant 0 : i32
    %c0_i32_2 = arith.constant 0 : i32
    return %arg0, %c0_i32, %c0_i32_0, %c0_i32_1 : i32, i32, i32, i32
  }
  func.func @transform_3(%arg0: i32) -> (i32, i32, i32) {
    %c0_i32 = arith.constant 0 : i32
    %c0_i32_0 = arith.constant 0 : i32
    %c0_i32_1 = arith.constant 0 : i32
    return %arg0, %c0_i32, %c0_i32_0 : i32, i32, i32
  }
  func.func @transform_4(%arg0: i32) -> (i32, i32, i32) {
    %c0_i32 = arith.constant 0 : i32
    %c0_i32_0 = arith.constant 0 : i32
    %c0_i32_1 = arith.constant 0 : i32
    return %arg0, %c0_i32, %c0_i32_0 : i32, i32, i32
  }
}

module attributes {stable_mosaic.version = 11 : i64} {
  func.func @_stage2_kernel(%arg0: i32, %arg1: memref<1x16x16x128xbf16, #tpu.memory_space<vmem>>, %arg2: memref<2x128xf32, #tpu.memory_space<vmem>>, %arg3: memref<3x384x128xbf16, #tpu.memory_space<vmem>>, %arg4: memref<1x16x16x128xbf16, #tpu.memory_space<vmem>>, %arg5: memref<1x1x128xf32, #tpu.memory_space<vmem>>, %arg6: memref<1x1x128xf32, #tpu.memory_space<vmem>>, %arg7: memref<18x18x128xbf16, #tpu.memory_space<vmem>>) attributes {dimension_semantics = [#tpu.dimension_semantics<parallel>], iteration_bounds = array<i64: 2>, scalar_prefetch = 0 : i64, scratch_operands = 1 : i64, tpu.core_type = #tpu.core_type<tc>, window_params = [{transform_indices = @transform_0, window_bounds = array<i64: 1, 16, 16, 128>}, {pipeline_mode = #tpu.pipeline_mode<synchronous>, transform_indices = @transform_1, window_bounds = array<i64: 2, 128>}, {pipeline_mode = #tpu.pipeline_mode<synchronous>, transform_indices = @transform_2, window_bounds = array<i64: 3, 384, 128>}, {transform_indices = @transform_3, window_bounds = array<i64: 1, 16, 16, 128>}, {transform_indices = @transform_4, window_bounds = array<i64: 1, 1, 128>}, {transform_indices = @transform_5, window_bounds = array<i64: 1, 1, 128>}]} {
    %c0 = arith.constant 0 : index
    %c0_0 = arith.constant 0 : index
    %0 = vector.load %arg2[%c0, %c0_0] : memref<2x128xf32, #tpu.memory_space<vmem>>, vector<2x128xf32>
    %1 = vector.extract_strided_slice %0 {offsets = [0, 0], sizes = [1, 128], strides = [1, 1]} : vector<2x128xf32> to vector<1x128xf32>
    %2 = vector.shape_cast %1 : vector<1x128xf32> to vector<128xf32>
    %3 = vector.shape_cast %2 : vector<128xf32> to vector<1x1x128xf32>
    %4 = vector.extract_strided_slice %0 {offsets = [1, 0], sizes = [1, 128], strides = [1, 1]} : vector<2x128xf32> to vector<1x128xf32>
    %5 = vector.shape_cast %4 : vector<1x128xf32> to vector<128xf32>
    %6 = vector.shape_cast %5 : vector<128xf32> to vector<1x1x128xf32>
    %c0_1 = arith.constant 0 : index
    %c0_2 = arith.constant 0 : index
    %c0_3 = arith.constant 0 : index
    %c0_4 = arith.constant 0 : index
    %7 = vector.load %arg1[%c0_1, %c0_2, %c0_3, %c0_4] : memref<1x16x16x128xbf16, #tpu.memory_space<vmem>>, vector<1x16x16x128xbf16>
    %8 = vector.shape_cast %7 : vector<1x16x16x128xbf16> to vector<16x16x128xbf16>
    %9 = arith.extf %8 : vector<16x16x128xbf16> to vector<16x16x128xf32>
    %10 = vector.broadcast %3 : vector<1x1x128xf32> to vector<16x16x128xf32>
    %11 = arith.mulf %9, %10 : vector<16x16x128xf32>
    %12 = vector.broadcast %6 : vector<1x1x128xf32> to vector<16x16x128xf32>
    %13 = arith.addf %11, %12 : vector<16x16x128xf32>
    %cst = arith.constant 0.000000e+00 : f32
    %14 = vector.broadcast %cst : f32 to vector<16x16x128xf32>
    %15 = arith.maximumf %13, %14 : vector<16x16x128xf32>
    %16 = arith.truncf %15 : vector<16x16x128xf32> to vector<16x16x128xbf16>
    %cst_5 = arith.constant 0.000000e+00 : bf16
    %17 = vector.broadcast %cst_5 : bf16 to vector<18x18x128xbf16>
    %c0_6 = arith.constant 0 : index
    %c0_7 = arith.constant 0 : index
    %c0_8 = arith.constant 0 : index
    %18 = vector.load %arg7[%c0_6, %c0_7, %c0_8] : memref<18x18x128xbf16, #tpu.memory_space<vmem>>, vector<18x18x128xbf16>
    tpu.vector_store %arg7[%c0_6, %c0_7, %c0_8], %17 {strides = array<i32>} : memref<18x18x128xbf16, #tpu.memory_space<vmem>>, vector<18x18x128xbf16>,
    %c1 = arith.constant 1 : index
    %c1_9 = arith.constant 1 : index
    %c0_10 = arith.constant 0 : index
    %19 = vector.load %arg7[%c1, %c1_9, %c0_10] : memref<18x18x128xbf16, #tpu.memory_space<vmem>>, vector<16x16x128xbf16>
    tpu.vector_store %arg7[%c1, %c1_9, %c0_10], %16 {strides = array<i32>} : memref<18x18x128xbf16, #tpu.memory_space<vmem>>, vector<16x16x128xbf16>,
    %c0_11 = arith.constant 0 : index
    %c0_12 = arith.constant 0 : index
    %c0_13 = arith.constant 0 : index
    %20 = vector.load %arg7[%c0_11, %c0_12, %c0_13] : memref<18x18x128xbf16, #tpu.memory_space<vmem>>, vector<18x18x128xbf16>
    %cst_14 = arith.constant 0.000000e+00 : f32
    %21 = vector.broadcast %cst_14 : f32 to vector<256x128xf32>
    %22 = vector.extract_strided_slice %20 {offsets = [0, 0, 0], sizes = [16, 16, 128], strides = [1, 1, 1]} : vector<18x18x128xbf16> to vector<16x16x128xbf16>
    %23 = vector.extract_strided_slice %20 {offsets = [0, 1, 0], sizes = [16, 16, 128], strides = [1, 1, 1]} : vector<18x18x128xbf16> to vector<16x16x128xbf16>
    %24 = vector.extract_strided_slice %20 {offsets = [0, 2, 0], sizes = [16, 16, 128], strides = [1, 1, 1]} : vector<18x18x128xbf16> to vector<16x16x128xbf16>
    %25 = tpu.concatenate %22, %23, %24 in 2 : vector<16x16x128xbf16>, vector<16x16x128xbf16>, vector<16x16x128xbf16> -> vector<16x16x384xbf16>
    %26 = vector.shape_cast %25 : vector<16x16x384xbf16> to vector<256x384xbf16>
    %c0_15 = arith.constant 0 : index
    %c0_16 = arith.constant 0 : index
    %c0_17 = arith.constant 0 : index
    %27 = vector.load %arg3[%c0_15, %c0_16, %c0_17] : memref<3x384x128xbf16, #tpu.memory_space<vmem>>, vector<1x384x128xbf16>
    %28 = vector.shape_cast %27 : vector<1x384x128xbf16> to vector<384x128xbf16>
    %cst_18 = arith.constant dense<0.000000e+00> : vector<256x128xf32>
    %29 = tpu.matmul %26, %28, %cst_18 {dimension_numbers = #tpu.dot_dimension_numbers<[1], [0], [0], [1], [0, 0, 1, 1], [], []>} : vector<256x384xbf16>, vector<384x128xbf16>, vector<256x128xf32> -> vector<256x128xf32>
    %30 = arith.addf %21, %29 : vector<256x128xf32>
    %31 = vector.extract_strided_slice %20 {offsets = [1, 0, 0], sizes = [16, 16, 128], strides = [1, 1, 1]} : vector<18x18x128xbf16> to vector<16x16x128xbf16>
    %32 = vector.extract_strided_slice %20 {offsets = [1, 1, 0], sizes = [16, 16, 128], strides = [1, 1, 1]} : vector<18x18x128xbf16> to vector<16x16x128xbf16>
    %33 = vector.extract_strided_slice %20 {offsets = [1, 2, 0], sizes = [16, 16, 128], strides = [1, 1, 1]} : vector<18x18x128xbf16> to vector<16x16x128xbf16>
    %34 = tpu.concatenate %31, %32, %33 in 2 : vector<16x16x128xbf16>, vector<16x16x128xbf16>, vector<16x16x128xbf16> -> vector<16x16x384xbf16>
    %35 = vector.shape_cast %34 : vector<16x16x384xbf16> to vector<256x384xbf16>
    %c1_19 = arith.constant 1 : index
    %c0_20 = arith.constant 0 : index
    %c0_21 = arith.constant 0 : index
    %36 = vector.load %arg3[%c1_19, %c0_20, %c0_21] : memref<3x384x128xbf16, #tpu.memory_space<vmem>>, vector<1x384x128xbf16>
    %37 = vector.shape_cast %36 : vector<1x384x128xbf16> to vector<384x128xbf16>
    %cst_22 = arith.constant dense<0.000000e+00> : vector<256x128xf32>
    %38 = tpu.matmul %35, %37, %cst_22 {dimension_numbers = #tpu.dot_dimension_numbers<[1], [0], [0], [1], [0, 0, 1, 1], [], []>} : vector<256x384xbf16>, vector<384x128xbf16>, vector<256x128xf32> -> vector<256x128xf32>
    %39 = arith.addf %30, %38 : vector<256x128xf32>
    %40 = vector.extract_strided_slice %20 {offsets = [2, 0, 0], sizes = [16, 16, 128], strides = [1, 1, 1]} : vector<18x18x128xbf16> to vector<16x16x128xbf16>
    %41 = vector.extract_strided_slice %20 {offsets = [2, 1, 0], sizes = [16, 16, 128], strides = [1, 1, 1]} : vector<18x18x128xbf16> to vector<16x16x128xbf16>
    %42 = vector.extract_strided_slice %20 {offsets = [2, 2, 0], sizes = [16, 16, 128], strides = [1, 1, 1]} : vector<18x18x128xbf16> to vector<16x16x128xbf16>
    %43 = tpu.concatenate %40, %41, %42 in 2 : vector<16x16x128xbf16>, vector<16x16x128xbf16>, vector<16x16x128xbf16> -> vector<16x16x384xbf16>
    %44 = vector.shape_cast %43 : vector<16x16x384xbf16> to vector<256x384xbf16>
    %c2 = arith.constant 2 : index
    %c0_23 = arith.constant 0 : index
    %c0_24 = arith.constant 0 : index
    %45 = vector.load %arg3[%c2, %c0_23, %c0_24] : memref<3x384x128xbf16, #tpu.memory_space<vmem>>, vector<1x384x128xbf16>
    %46 = vector.shape_cast %45 : vector<1x384x128xbf16> to vector<384x128xbf16>
    %cst_25 = arith.constant dense<0.000000e+00> : vector<256x128xf32>
    %47 = tpu.matmul %44, %46, %cst_25 {dimension_numbers = #tpu.dot_dimension_numbers<[1], [0], [0], [1], [0, 0, 1, 1], [], []>} : vector<256x384xbf16>, vector<384x128xbf16>, vector<256x128xf32> -> vector<256x128xf32>
    %48 = arith.addf %39, %47 : vector<256x128xf32>
    %49 = vector.shape_cast %48 : vector<256x128xf32> to vector<1x16x16x128xf32>
    %50 = arith.truncf %49 : vector<1x16x16x128xf32> to vector<1x16x16x128xbf16>
    %c0_26 = arith.constant 0 : index
    %c0_27 = arith.constant 0 : index
    %c0_28 = arith.constant 0 : index
    %c0_29 = arith.constant 0 : index
    %51 = vector.load %arg4[%c0_26, %c0_27, %c0_28, %c0_29] : memref<1x16x16x128xbf16, #tpu.memory_space<vmem>>, vector<1x16x16x128xbf16>
    tpu.vector_store %arg4[%c0_26, %c0_27, %c0_28, %c0_29], %50 {strides = array<i32>} : memref<1x16x16x128xbf16, #tpu.memory_space<vmem>>, vector<1x16x16x128xbf16>,
    %cst_30 = arith.constant dense<0.000000e+00> : vector<128xf32>
    %52 = vector.multi_reduction <add>, %48, %cst_30 [0] : vector<256x128xf32> to vector<128xf32>
    %53 = vector.shape_cast %52 : vector<128xf32> to vector<1x128xf32>
    %54 = vector.shape_cast %53 : vector<1x128xf32> to vector<1x1x128xf32>
    %c0_31 = arith.constant 0 : index
    %c0_32 = arith.constant 0 : index
    %c0_33 = arith.constant 0 : index
    %55 = vector.load %arg5[%c0_31, %c0_32, %c0_33] : memref<1x1x128xf32, #tpu.memory_space<vmem>>, vector<1x1x128xf32>
    tpu.vector_store %arg5[%c0_31, %c0_32, %c0_33], %54 {strides = array<i32>} : memref<1x1x128xf32, #tpu.memory_space<vmem>>, vector<1x1x128xf32>,
    %56 = arith.mulf %48, %48 : vector<256x128xf32>
    %cst_34 = arith.constant dense<0.000000e+00> : vector<128xf32>
    %57 = vector.multi_reduction <add>, %56, %cst_34 [0] : vector<256x128xf32> to vector<128xf32>
    %58 = vector.shape_cast %57 : vector<128xf32> to vector<1x128xf32>
    %59 = vector.shape_cast %58 : vector<1x128xf32> to vector<1x1x128xf32>
    %c0_35 = arith.constant 0 : index
    %c0_36 = arith.constant 0 : index
    %c0_37 = arith.constant 0 : index
    %60 = vector.load %arg6[%c0_35, %c0_36, %c0_37] : memref<1x1x128xf32, #tpu.memory_space<vmem>>, vector<1x1x128xf32>
    tpu.vector_store %arg6[%c0_35, %c0_36, %c0_37], %59 {strides = array<i32>} : memref<1x1x128xf32, #tpu.memory_space<vmem>>, vector<1x1x128xf32>,
    return
  }
  func.func @transform_0(%arg0: i32) -> (i32, i32, i32, i32) {
    %c0_i32 = arith.constant 0 : i32
    %c0_i32_0 = arith.constant 0 : i32
    %c0_i32_1 = arith.constant 0 : i32
    %c0_i32_2 = arith.constant 0 : i32
    return %arg0, %c0_i32, %c0_i32_0, %c0_i32_1 : i32, i32, i32, i32
  }
  func.func @transform_1(%arg0: i32) -> (i32, i32) {
    %c0_i32 = arith.constant 0 : i32
    %c0_i32_0 = arith.constant 0 : i32
    %c0_i32_1 = arith.constant 0 : i32
    return %c0_i32, %c0_i32_0 : i32, i32
  }
  func.func @transform_2(%arg0: i32) -> (i32, i32, i32) {
    %c0_i32 = arith.constant 0 : i32
    %c0_i32_0 = arith.constant 0 : i32
    %c0_i32_1 = arith.constant 0 : i32
    %c0_i32_2 = arith.constant 0 : i32
    return %c0_i32, %c0_i32_0, %c0_i32_1 : i32, i32, i32
  }
  func.func @transform_3(%arg0: i32) -> (i32, i32, i32, i32) {
    %c0_i32 = arith.constant 0 : i32
    %c0_i32_0 = arith.constant 0 : i32
    %c0_i32_1 = arith.constant 0 : i32
    %c0_i32_2 = arith.constant 0 : i32
    return %arg0, %c0_i32, %c0_i32_0, %c0_i32_1 : i32, i32, i32, i32
  }
  func.func @transform_4(%arg0: i32) -> (i32, i32, i32) {
    %c0_i32 = arith.constant 0 : i32
    %c0_i32_0 = arith.constant 0 : i32
    %c0_i32_1 = arith.constant 0 : i32
    return %arg0, %c0_i32, %c0_i32_0 : i32, i32, i32
  }
  func.func @transform_5(%arg0: i32) -> (i32, i32, i32) {
    %c0_i32 = arith.constant 0 : i32
    %c0_i32_0 = arith.constant 0 : i32
    %c0_i32_1 = arith.constant 0 : i32
    return %arg0, %c0_i32, %c0_i32_0 : i32, i32, i32
  }
}

</mosaic_0001>

<bundles_post_ra>
// kernel: resnet_block_forward.2
= control target key start
LH: loop header
LB: loop body
LE: loop exit
PB: predicated region body
PF: predicated region fallthrough
CT: control target
= control target key end

     0   :  { %s4486_s15 = smov 0   ;;  %s5561_s0 = inlined_call_operand.vmem [shape: bf16[2,16,16,128], index: 0, kind: input, shape index: {}]   ;;  %s5562_s1 = inlined_call_operand.vmem [shape: bf16[3,384,128], index: 1, kind: input, shape index: {}]   ;;  %s5563_s2 = inlined_call_operand.vmem [shape: bf16[2,16,16,128], index: 2, kind: output, shape index: {0}]   ;;  %s5564_s3 = inlined_call_operand.vmem [shape: f32[2,1,128], index: 3, kind: output, shape index: {1}]   ;;  %s5565_s4 = inlined_call_operand.vmem [shape: f32[2,1,128], index: 4, kind: output, shape index: {2}]  }
   0x1 LB: > { %s3216_s16 = sadd.s32 4294967295, %s4458_s15   ;;  %p3220_p0 = scmp.ge.s32.totalorder %s4458_s15, 1  ;;  %s4458_s15 = sphi %s4486_s15, %s15_s15  }
   0x2   : > { %p167_p1 = scmp.lt.s32.totalorder %s4458_s15, 3 }
   0x4   : > { %p168_p2 = pnand %p3220_p0, %p167_p1 }
   0x6   : > { %171 = sbr.rel (%p168_p2) target bundleno = 608 (0x260), region = 28 }
   0xd   : > { %v4329_v0 = vld [vmem:[%s5562_s1 + $0x100] sm:$0xff]   ;;  %v4460_v3 = vmov 0   ;;  %v4332_v4 = vld [vmem:[%s5562_s1 + $0x108] sm:$0xff]   ;;  %v4335_v7 = vld [vmem:[%s5562_s1 + $0x110] sm:$0xff]   ;;  %p199_p3 = scmp.lt.s32.totalorder %s3216_s16, 1  ;;  %vm633_vm0 = vcmask 1040384  }
   0xe   : > { %v4500_v1 = vld [vmem:[%s5562_s1 + $0x140] sm:$0xff]   ;;  %3592 = vmatprep.subr.bf16.mxu0 %v4329_v0  ;;  %251 = vst [vmem:[#allocation2 + $0xc] sm:$0xf] %v4460_v3  ;;  %252 = vst [vmem:[#allocation2 + $0x10] sm:$0xf] %v4460_v3  ;;  %v4513_v5 = vld [vmem:[%s5562_s1 + $0x148] sm:$0xff]  }
   0xf   : > { %v4331_v2 = vld [vmem:[%s5562_s1 + $0xc0] sm:$0xff]   ;;  %253 = vst [vmem:[#allocation2 + $0x14] sm:$0x1] %v4460_v3  ;;  %248 = vst [vmem:[#allocation2] sm:$0xf] %v4460_v3  ;;  %4144 = vmatprep.subr.bf16.mxu1 %v4500_v1  ;;  %v4334_v6 = vld [vmem:[%s5562_s1 + $0xc8] sm:$0xff]  }
  0x10   : > { %249 = vst [vmem:[#allocation2 + $0x4] sm:$0xf] %v4460_v3  ;;  %250 = vst [vmem:[#allocation2 + $0x8] sm:$0x1] %v4460_v3  ;;  %3593 = vmatpush3.bf16.msra.mxu0 %v4331_v2  ;;  %4152 = vmatpush3.bf16.msra.mxu1 %v4500_v1  ;;  %v4525_v8 = vld [vmem:[%s5562_s1 + $0x150] sm:$0xff]   ;;  %v4338_v10 = vld [vmem:[%s5562_s1 + $0x118] sm:$0xff]  }
  0x11   : > { %254 = vst [vmem:[#allocation2 + $0x18] sm:$0xf] %v4460_v3  ;;  %255 = vst [vmem:[#allocation2 + $0x1c] sm:$0xf] %v4460_v3  ;;  %3594 = vmatprep.subr.bf16.mxu0 %v4332_v4  ;;  %4145 = vmatprep.subr.bf16.mxu1 %v4513_v5  ;;  %v4337_v9 = vld [vmem:[%s5562_s1 + $0xd0] sm:$0xff]   ;;  %v4538_v11 = vld [vmem:[%s5562_s1 + $0x158] sm:$0xff]  }
  0x12   : > { %256 = vst [vmem:[#allocation2 + $0x20] sm:$0x1] %v4460_v3  ;;  %257 = vst [vmem:[#allocation2 + $0x24] sm:$0xf] %v4460_v3  ;;  %v4340_v12 = vld [vmem:[%s5562_s1 + $0xd8] sm:$0xff]   ;;  %v4341_v13 = vld [vmem:[%s5562_s1 + $0x120] sm:$0xff]  }
  0x13   : > { %258 = vst [vmem:[#allocation2 + $0x28] sm:$0xf] %v4460_v3  ;;  %259 = vst [vmem:[#allocation2 + $0x2c] sm:$0x1] %v4460_v3  ;;  %v4553_v14 = vld [vmem:[%s5562_s1 + $0x160] sm:$0xff]   ;;  %s5577_s16 = smov (!%p199_p3, %s3216_s16), 1 }
  0x14   : > { %260 = vst [vmem:[#allocation2 + $0x30] sm:$0xf] %v4460_v3  ;;  %261 = vst [vmem:[#allocation2 + $0x34] sm:$0xf] %v4460_v3  ;;  %3595 = vmatpush3.bf16.msra.mxu0 %v4334_v6  ;;  %4153 = vmatpush3.bf16.msra.mxu1 %v4513_v5  ;;  %v4343_v15 = vld [vmem:[%s5562_s1 + $0xe0] sm:$0xff]   ;;  %v4344_v16 = vld [vmem:[%s5562_s1 + $0x128] sm:$0xff]   ;;  %s211_s5 = scalar_lea.vmem %s5564_s3, %s5577_s16  ;;  %s214_s8 = scalar_lea.vmem %s5565_s4, %s5577_s16 }
  0x15   : > { %262 = vst [vmem:[#allocation2 + $0x38] sm:$0x1] %v4460_v3  ;;  %263 = vst [vmem:[#allocation2 + $0x3c] sm:$0xf] %v4460_v3  ;;  %3596 = vmatprep.subr.bf16.mxu0 %v4335_v7  ;;  %4146 = vmatprep.subr.bf16.mxu1 %v4525_v8  ;;  %v4570_v17 = vld [vmem:[%s5562_s1 + $0x168] sm:$0xff]   ;;  %s3463_s27 = sshll.u32 %s5577_s16, 7 }
  0x16   : > { %264 = vst [vmem:[#allocation2 + $0x40] sm:$0xf] %v4460_v3  ;;  %265 = vst [vmem:[#allocation2 + $0x44] sm:$0x1] %v4460_v3  ;;  %v4346_v18 = vld [vmem:[%s5562_s1 + $0xe8] sm:$0xff]   ;;  %v4347_v19 = vld [vmem:[%s5562_s1 + $0x130] sm:$0xff]   ;;  %s4591_s10 = scalar_lea.vmem %s5561_s0, %s3463_s27  ;;  %s5495_s29 = scalar_lea.vmem %s5563_s2, %s3463_s27 }
  0x17   : > { %266 = vst [vmem:[#allocation2 + $0x48] sm:$0xf] %v4460_v3  ;;  %267 = vst [vmem:[#allocation2 + $0x4c] sm:$0xf] %v4460_v3  ;;  %v4584_v20 = vld [vmem:[%s5562_s1 + $0x170] sm:$0xff]   ;;  %v4350_v22 = vld [vmem:[%s5562_s1 + $0x138] sm:$0xff]  }
  0x18   : > { %268 = vst [vmem:[#allocation2 + $0x50] sm:$0x1] %v4460_v3  ;;  %269 = vst [vmem:[#allocation2 + $0x54] sm:$0xf] %v4460_v3  ;;  %3597 = vmatpush3.bf16.msra.mxu0 %v4337_v9  ;;  %4154 = vmatpush3.bf16.msra.mxu1 %v4525_v8  ;;  %v4349_v21 = vld [vmem:[%s5562_s1 + $0xf0] sm:$0xff]   ;;  %vm626_vm1 = vcmask 1043456  }
  0x19   : > { %270 = vst [vmem:[#allocation2 + $0x58] sm:$0xf] %v4460_v3  ;;  %271 = vst [vmem:[#allocation2 + $0x5c] sm:$0x1] %v4460_v3  ;;  %3598 = vmatprep.subr.bf16.mxu0 %v4338_v10  ;;  %4147 = vmatprep.subr.bf16.mxu1 %v4538_v11  ;;  %v216_v23 = vld [vmem:[%s4591_s10] sm:$0xf] }
  0x1a   : > { %272 = vst [vmem:[#allocation2 + $0x60] sm:$0xf] %v4460_v3  ;;  %273 = vst [vmem:[#allocation2 + $0x64] sm:$0xf] %v4460_v3  ;;  %v217_v24 = vld [vmem:[%s4591_s10 + $0x4] sm:$0xf] }
  0x1b   : > { %274 = vst [vmem:[#allocation2 + $0x68] sm:$0x1] %v4460_v3  ;;  %275 = vst [vmem:[#allocation2 + $0x6c] sm:$0xf] %v4460_v3  ;;  %vm302_vm2 = vsmask.f32 256 }
  0x1c   : > { %276 = vst [vmem:[#allocation2 + $0x70] sm:$0xf] %v4460_v3  ;;  %277 = vst [vmem:[#allocation2 + $0x74] sm:$0x1] %v4460_v3  ;;  %3599 = vmatpush3.bf16.msra.mxu0 %v4340_v12  ;;  %4155 = vmatpush3.bf16.msra.mxu1 %v4538_v11  ;;  %v4606_v25 = vld [vmem:[%s5562_s1 + $0x178] sm:$0xff]   ;;  %v306_v26 = vshrl.u32 %v216_v23, 16 }
  0x1d   : > { %278 = vst [vmem:[#allocation2 + $0x78] sm:$0xf] %v4460_v3  ;;  %279 = vst [vmem:[#allocation2 + $0x7c] sm:$0xf] %v4460_v3  ;;  %3600 = vmatprep.subr.bf16.mxu0 %v4341_v13  ;;  %4148 = vmatprep.subr.bf16.mxu1 %v4553_v14  ;;  %vm303_vm3 = vsmask.f32 4368 }
  0x1e   : > { %280 = vst [vmem:[#allocation2 + $0x80] sm:$0x1] %v4460_v3  ;;  %281 = vst [vmem:[#allocation2 + $0x84] sm:$0xf] %v4460_v3  ;;  %v309_v27 = vshll.u32 %v216_v23, 16  ;;  %v314_v28 = vshrl.u32 %v217_v24, 16 }
  0x1f   : > { %282 = vst [vmem:[#allocation2 + $0x88] sm:$0xf] %v4460_v3  ;;  %283 = vst [vmem:[#allocation2 + $0x8c] sm:$0x1] %v4460_v3  ;;  %v317_v31 = vshll.u32 %v217_v24, 16  ;;  %v4352_v32 = vld [vmem:[%s5562_s1 + $0xf8] sm:$0xff]  }
  0x20   : > { %284 = vst [vmem:[#allocation2 + $0x90] sm:$0xf] %v4460_v3  ;;  %285 = vst [vmem:[#allocation2 + $0x94] sm:$0xf] %v4460_v3  ;;  %3601 = vmatpush3.bf16.msra.mxu0 %v4343_v15  ;;  %4156 = vmatpush3.bf16.msra.mxu1 %v4553_v14  ;;  %vm627_vm6 = vsmask.f32 7938 }
  0x21   : > { %286 = vst [vmem:[#allocation2 + $0x98] sm:$0x1] %v4460_v3  ;;  %287 = vst [vmem:[#allocation2 + $0x9c] sm:$0xf] %v4460_v3  ;;  %3602 = vmatprep.subr.bf16.mxu0 %v4344_v16  ;;  %4149 = vmatprep.subr.bf16.mxu1 %v4570_v17  ;;  %v308_v33 = vrot.slane %v306_v26, 7  ;;  %v316_v34 = vrot.slane %v314_v28, 7 }
  0x22   : > { %288 = vst [vmem:[#allocation2 + $0xa0] sm:$0xf] %v4460_v3  ;;  %289 = vst [vmem:[#allocation2 + $0xa4] sm:$0x1] %v4460_v3  ;;  %v629_v36 = vld [vmem:[#allocation2 + $0xc] sm:$0xf] }
  0x23   : > { %290 = vst [vmem:[#allocation2 + $0xa8] sm:$0xf] %v4460_v3  ;;  %291 = vst [vmem:[#allocation2 + $0xac] sm:$0xf] %v4460_v3  ;;  %v635_v37 = vld [vmem:[#allocation2 + $0x14] sm:$0x1]  ;;  %v311_v40 = vor.u32 %v309_v27, %v308_v33  ;;  %v319_v42 = vor.u32 %v317_v31, %v316_v34 }
  0x24   : > { %292 = vst [vmem:[#allocation2 + $0xb0] sm:$0x1] %v4460_v3  ;;  %293 = vst [vmem:[#allocation2 + $0xb4] sm:$0xf] %v4460_v3  ;;  %3603 = vmatpush3.bf16.msra.mxu0 %v4346_v18  ;;  %4157 = vmatpush3.bf16.msra.mxu1 %v4570_v17  ;;  %v232_v38 = vld [vmem:[%s4591_s10 + $0x40] sm:$0xf] }
  0x25   : > { %294 = vst [vmem:[#allocation2 + $0xb8] sm:$0xf] %v4460_v3  ;;  %295 = vst [vmem:[#allocation2 + $0xbc] sm:$0x1] %v4460_v3  ;;  %3604 = vmatprep.subr.bf16.mxu0 %v4347_v19  ;;  %4150 = vmatprep.subr.bf16.mxu1 %v4584_v20  ;;  %v233_v39 = vld [vmem:[%s4591_s10 + $0x44] sm:$0xf] }
  0x26   : > { %296 = vst [vmem:[#allocation2 + $0xc0] sm:$0xf] %v4460_v3  ;;  %297 = vst [vmem:[#allocation2 + $0xc4] sm:$0xf] %v4460_v3  ;;  %v312_v41 = vrot.slane %v308_v33, 4  ;;  %v321_v43 = vrot.slane %v316_v34, 4 }
  0x27   : > { %298 = vst [vmem:[#allocation2 + $0xc8] sm:$0x1] %v4460_v3  ;;  %299 = vst [vmem:[#allocation2 + $0xcc] sm:$0xf] %v4460_v3  ;;  %v234_v44 = vld [vmem:[%s4591_s10 + $0x48] sm:$0xf] }
  0x28   : > { %300 = vst [vmem:[#allocation2 + $0xd0] sm:$0xf] %v4460_v3  ;;  %301 = vst [vmem:[#allocation2 + $0xd4] sm:$0x1] %v4460_v3  ;;  %3605 = vmatpush3.bf16.msra.mxu0 %v4349_v21  ;;  %4158 = vmatpush3.bf16.msra.mxu1 %v4584_v20  ;;  %v4359_v45 = vld [vmem:[%s5562_s1 + $0x40] sm:$0xff]   ;;  %v442_v46 = vshrl.u32 %v232_v38, 16 }
  0x29   : > { %vm4609_vm4 = vmand %vm633_vm0, %vm302_vm2  ;;  %3606 = vmatprep.subr.bf16.mxu0 %v4350_v22  ;;  %4151 = vmatprep.subr.bf16.mxu1 %v4606_v25  ;;  %v445_v47 = vshll.u32 %v232_v38, 16  ;;  %v450_v48 = vshrl.u32 %v233_v39, 16  ;;  %v453_v49 = vshll.u32 %v233_v39, 16  ;;  %v235_v50 = vld [vmem:[%s4591_s10 + $0x4c] sm:$0xf]  ;;  %v459_v56 = vshrl.u32 %v234_v44, 16 }
  0x2a   : > { %vm4613_vm5 = vmor %vm302_vm2, %vm303_vm3  ;;  %v636_v53 = vsel %vm4609_vm4, %v321_v43, %v635_v37  ;;  %v687_v54 = vld [vmem:[#allocation2 + $0x6c] sm:$0xf]  ;;  %v691_v55 = vld [vmem:[#allocation2 + $0x74] sm:$0x1]  ;;  %v444_v57 = vrot.slane %v442_v46, 7  ;;  %v462_v59 = vshll.u32 %v234_v44, 16 }
  0x2b   : > { %vm4621_vm7 = vmand %vm626_vm1, %vm627_vm6  ;;  %v320_v51 = vsel %vm4613_vm5, %v312_v41, %v319_v42  ;;  %637 = vst [vmem:[#allocation2 + $0x14] sm:$0x1] %v636_v53  ;;  %v452_v58 = vrot.slane %v450_v48, 7  ;;  %v467_v60 = vshrl.u32 %v235_v50, 16  ;;  %v694_v61 = vld [vmem:[#allocation2 + $0x78] sm:$0xf] }
  0x2c   : > { %v630_v52 = vsel %vm4621_vm7, %v311_v40, %v629_v36  ;;  %3607 = vmatpush3.bf16.msra.mxu0 %v4352_v32  ;;  %4159 = vmatpush3.bf16.msra.mxu1 %v4606_v25  ;;  %632 = vst [vmem:[#allocation2 + $0x10] sm:$0xf] %v320_v51  ;;  %v461_v62 = vrot.slane %v459_v56, 7  ;;  %v470_v63 = vshll.u32 %v235_v50, 16  ;;  %v447_v0 = vor.u32 %v445_v47, %v444_v57  ;;  %v698_v15 = vld [vmem:[#allocation2 + $0x80] sm:$0x1] }
  0x2d   : > { %631 = vst [vmem:[#allocation2 + $0xc] sm:$0xf] %v630_v52  ;;  %4000 = vmatprep.subr.bf16.mxu0 %v4500_v1  ;;  %3728 = vmatprep.subr.bf16.mxu1 %v4359_v45  ;;  %v448_v2 = vrot.slane %v444_v57, 4  ;;  %v455_v3 = vor.u32 %v453_v49, %v452_v58  ;;  %v457_v4 = vrot.slane %v452_v58, 4  ;;  %v469_v9 = vrot.slane %v467_v60, 7  ;;  %v4406_v35 = vld [vmem:[%s5562_s1 + $0x98] sm:$0xff]  }
  0x2e   : > { %v464_v6 = vor.u32 %v462_v59, %v461_v62  ;;  %v465_v7 = vrot.slane %v461_v62, 4  ;;  %v688_v12 = vsel %vm4621_vm7, %v447_v0, %v687_v54  ;;  %v218_v16 = vld [vmem:[%s4591_s10 + $0x8] sm:$0xf]  ;;  %v219_v22 = vld [vmem:[%s4591_s10 + $0xc] sm:$0xf]  ;;  %vm1150_vm8 = vcmask 1046528  }
  0x2f   : > { %v456_v10 = vsel %vm4613_vm5, %v448_v2, %v455_v3  ;;  %v692_v13 = vsel %vm4609_vm4, %v457_v4, %v691_v55  ;;  %689 = vst [vmem:[#allocation2 + $0x6c] sm:$0xf] %v688_v12  ;;  %v472_v18 = vor.u32 %v470_v63, %v469_v9  ;;  %v474_v19 = vrot.slane %v469_v9, 4  ;;  %v638_v37 = vld [vmem:[#allocation2 + $0x18] sm:$0xf] }
  0x30   : > { %690 = vst [vmem:[#allocation2 + $0x70] sm:$0xf] %v456_v10  ;;  %693 = vst [vmem:[#allocation2 + $0x74] sm:$0x1] %v692_v13  ;;  %v695_v21 = vsel %vm4621_vm7, %v464_v6, %v694_v61  ;;  %v323_v23 = vshrl.u32 %v218_v16, 16  ;;  %v326_v24 = vshll.u32 %v218_v16, 16 }
  0x31   : > { %696 = vst [vmem:[#allocation2 + $0x78] sm:$0xf] %v695_v21  ;;  %v331_v26 = vshrl.u32 %v219_v22, 16  ;;  %v334_v27 = vshll.u32 %v219_v22, 16  ;;  %v473_v28 = vsel %vm4613_vm5, %v465_v7, %v472_v18  ;;  %v699_v31 = vsel %vm4609_vm4, %v474_v19, %v698_v15  ;;  %v236_v38 = vld [vmem:[%s4591_s10 + $0x50] sm:$0xf] }
  0x32   : > { %v4354_v33 = vld [vmem:[#allocation2 + $0x14] ss:$0 sps:$4 sm:$0x11]   ;;  %697 = vst [vmem:[#allocation2 + $0x7c] sm:$0xf] %v473_v28  ;;  %v325_v34 = vrot.slane %v323_v23, 7 }
  0x33   : > { %700 = vst [vmem:[#allocation2 + $0x80] sm:$0x1] %v699_v31  ;;  %v333_v36 = vrot.slane %v331_v26, 7  ;;  %vm941_vm9 = vsmask.f32 7424  ;;  %v962_v41 = vshll.u32 %v4354_v33, 16 }
  0x34   : > { %v4656_v32 = vld [vmem:[#allocation2 + $0xc] sm:$0xff]   ;;  %v328_v42 = vor.u32 %v326_v24, %v325_v34  ;;  %v642_v43 = vld [vmem:[#allocation2 + $0x20] sm:$0x1]  ;;  %v329_v44 = vrot.slane %v325_v34, 4  ;;  %v237_v47 = vld [vmem:[%s4591_s10 + $0x54] sm:$0xf] }
  0x35   : > { %v955_v39 = vshrl.u32 %v4656_v32, 16  ;;  %v957_v40 = vshll.u32 %v4656_v32, 16  ;;  %v336_v45 = vor.u32 %v334_v27, %v333_v36  ;;  %v338_v46 = vrot.slane %v333_v36, 4  ;;  %v238_v52 = vld [vmem:[%s4591_s10 + $0x58] sm:$0xf]  ;;  %v4360_v21 = vld [vmem:[%s5562_s1] sm:$0xff]  }
  0x36   : > { %v476_v48 = vshrl.u32 %v236_v38, 16  ;;  %v964_v50 = vrot.slane %v962_v41, 1  ;;  %v639_v51 = vsel %vm4621_vm7, %v328_v42, %v638_v37  ;;  %v701_v57 = vld [vmem:[#allocation2 + $0x84] sm:$0xf]  ;;  %v479_v60 = vshll.u32 %v236_v38, 16  ;;  %v4361_v24 = vld [vmem:[%s5562_s1 + $0x48] sm:$0xff]  }
  0x37   : > { %v959_v49 = vrot.slane %v957_v40, 1  ;;  %v4355_v53 = vld [vmem:[#allocation2 + $0x6c] sm:$0xff]   ;;  %v4356_v54 = vld [vmem:[#allocation2 + $0x74] ss:$0 sps:$4 sm:$0x11]   ;;  %v337_v55 = vsel %vm4613_vm5, %v329_v44, %v336_v45  ;;  %v643_v56 = vsel %vm4609_vm4, %v338_v46, %v642_v43  ;;  %v484_v61 = vshrl.u32 %v237_v47, 16 }
  0x38   : > { %640 = vst [vmem:[#allocation2 + $0x18] sm:$0xf] %v639_v51  ;;  %641 = vst [vmem:[#allocation2 + $0x1c] sm:$0xf] %v337_v55  ;;  %v478_v59 = vrot.slane %v476_v48, 7  ;;  %v1178_v62 = vrot.slane %v4355_v53, 1 }
  0x39   : > { %v960_v58 = vor.u32 %v959_v49, %v955_v39  ;;  %644 = vst [vmem:[#allocation2 + $0x20] sm:$0x1] %v643_v56  ;;  %v1179_v63 = vrot.slane %v4356_v54, 1  ;;  %v705_v0 = vld [vmem:[#allocation2 + $0x8c] sm:$0x1]  ;;  %v4357_v3 = vld [vmem:[#allocation2 + $0x78] sm:$0xff]  }
  0x3a   : > { %v4358_v4 = vld [vmem:[#allocation2 + $0x80] ss:$0 sps:$4 sm:$0x11]   ;;  %v481_v6 = vor.u32 %v479_v60, %v478_v59  ;;  %v482_v7 = vrot.slane %v478_v59, 4  ;;  %v486_v9 = vrot.slane %v484_v61, 7  ;;  %v487_v12 = vshll.u32 %v237_v47, 16 }
  0x3b   : > { %v4670_v2 = vsel %vm941_vm9, %v960_v58, %v964_v50  ;;  %v4674_v10 = vsel %vm1150_vm8, %v1178_v62, %v1179_v63  ;;  %v239_v13 = vld [vmem:[%s4591_s10 + $0x5c] sm:$0xf]  ;;  %v493_v15 = vshrl.u32 %v238_v52, 16  ;;  %v496_v16 = vshll.u32 %v238_v52, 16  ;;  %v708_v33 = vld [vmem:[#allocation2 + $0x90] sm:$0xf] }
  0x3c   : > { %1514 = vmatprep.mubr.bf16.mxu0 %v4670_v2  ;;  %4032 = vmatprep.mubr.bf16.mxu1 %v4674_v10  ;;  %v1181_v18 = vrot.slane %v4357_v3, 1  ;;  %v1182_v19 = vrot.slane %v4358_v4, 1  ;;  %v491_v22 = vrot.slane %v486_v9, 4  ;;  %v702_v23 = vsel %vm4621_vm7, %v481_v6, %v701_v57  ;;  %v4362_v36 = vld [vmem:[%s5562_s1 + $0x8] sm:$0xff]   ;;  %v712_v41 = vld [vmem:[#allocation2 + $0x98] sm:$0x1] }
  0x3d   : > { %1515 = vmatmul.mubr.bf16.vlgmr.msra.gmra.mrb[0].mxu0 %v4656_v32  ;;  %v489_v26 = vor.u32 %v487_v12, %v486_v9  ;;  %703 = vst [vmem:[#allocation2 + $0x84] sm:$0xf] %v702_v23  ;;  %v495_v27 = vrot.slane %v493_v15, 7  ;;  %v501_v28 = vshrl.u32 %v239_v13, 16  ;;  %v504_v31 = vshll.u32 %v239_v13, 16  ;;  %v4369_v42 = vld [vmem:[%s5562_s1 + $0x50] sm:$0xff]  }
  0x3e   : > { %4001 = vmatpush3.bf16.msra.mxu0 %v4500_v1  ;;  %v4689_v34 = vsel %vm1150_vm8, %v1181_v18, %v1182_v19  ;;  %v706_v1 = vsel %vm4609_vm4, %v491_v22, %v705_v0  ;;  %v4370_v52 = vld [vmem:[%s5562_s1 + $0x10] sm:$0xff]   ;;  %v4371_v59 = vld [vmem:[%s5562_s1 + $0x58] sm:$0xff]   ;;  %v645_v63 = vld [vmem:[#allocation2 + $0x24] sm:$0xf] }
  0x3f   : > { %4002 = vmatprep.subr.bf16.mxu0 %v4513_v5  ;;  %4033 = vmatmul.mubr.bf16.vlgmr.msra.gmra.mrb[0].mxu1 %v4689_v34  ;;  %v4698_v37 = vld [vmem:[#allocation2 + $0x18] sm:$0xff]   ;;  %v490_v38 = vsel %vm4613_vm5, %v482_v7, %v489_v26  ;;  %707 = vst [vmem:[#allocation2 + $0x8c] sm:$0x1] %v706_v1  ;;  %v498_v39 = vor.u32 %v496_v16, %v495_v27  ;;  %v499_v40 = vrot.slane %v495_v27, 4  ;;  %v503_v44 = vrot.slane %v501_v28, 7 }
  0x40   : > { %3729 = vmatpush3.bf16.msra.mxu1 %v4360_v21  ;;  %v4364_v43 = vld [vmem:[#allocation2 + $0x20] ss:$0 sps:$4 sm:$0x11]   ;;  %704 = vst [vmem:[#allocation2 + $0x88] sm:$0xf] %v490_v38  ;;  %v967_v45 = vshrl.u32 %v4698_v37, 16 }
  0x41   : > { %3730 = vmatprep.subr.bf16.mxu1 %v4361_v24  ;;  %v969_v46 = vshll.u32 %v4698_v37, 16  ;;  %v709_v47 = vsel %vm4621_vm7, %v498_v39, %v708_v33  ;;  %v974_v48 = vshll.u32 %v4364_v43, 16  ;;  %v506_v49 = vor.u32 %v504_v31, %v503_v44  ;;  %v220_v53 = vld [vmem:[%s4591_s10 + $0x10] sm:$0xf]  ;;  %v221_v56 = vld [vmem:[%s4591_s10 + $0x14] sm:$0xf] }
  0x42   : > { %4003 = vmatpush3.bf16.msra.mxu0 %v4513_v5  ;;  %v508_v50 = vrot.slane %v503_v44, 4  ;;  %710 = vst [vmem:[#allocation2 + $0x90] sm:$0xf] %v709_v47  ;;  %v340_v57 = vshrl.u32 %v220_v53, 16  ;;  %v343_v60 = vshll.u32 %v220_v53, 16  ;;  %v348_v61 = vshrl.u32 %v221_v56, 16 }
  0x43   : > { %4004 = vmatprep.subr.bf16.mxu0 %v4525_v8  ;;  %v971_v51 = vrot.slane %v969_v46, 1  ;;  %v976_v54 = vrot.slane %v974_v48, 1  ;;  %v507_v55 = vsel %vm4613_vm5, %v499_v40, %v506_v49  ;;  %v351_v62 = vshll.u32 %v221_v56, 16  ;;  %v4372_v3 = vld [vmem:[%s5562_s1 + $0x18] sm:$0xff]   ;;  %v649_v12 = vld [vmem:[#allocation2 + $0x2c] sm:$0x1] }
  0x44   : > { %3731 = vmatpush3.bf16.msra.mxu1 %v4362_v36  ;;  %v713_v5 = vsel %vm4609_vm4, %v508_v50, %v712_v41  ;;  %711 = vst [vmem:[#allocation2 + $0x94] sm:$0xf] %v507_v55  ;;  %v342_v4 = vrot.slane %v340_v57, 7  ;;  %v350_v9 = vrot.slane %v348_v61, 7  ;;  %v240_v16 = vld [vmem:[%s4591_s10 + $0x60] sm:$0xf] }
  0x45   : > { %v972_v58 = vor.u32 %v971_v51, %v967_v45  ;;  %714 = vst [vmem:[#allocation2 + $0x98] sm:$0x1] %v713_v5  ;;  %3732 = vmatprep.subr.bf16.mxu1 %v4369_v42  ;;  %v241_v18 = vld [vmem:[%s4591_s10 + $0x64] sm:$0xf]  ;;  %v510_v23 = vshrl.u32 %v240_v16, 16  ;;  %v513_v27 = vshll.u32 %v240_v16, 16 }
  0x46   : > { %4005 = vmatpush3.bf16.msra.mxu0 %v4525_v8  ;;  %v4724_v0 = vld [vmem:[#allocation2 + $0x8c] ss:$0 sps:$4 sm:$0x11]   ;;  %v345_v13 = vor.u32 %v343_v60, %v342_v4  ;;  %v346_v15 = vrot.slane %v342_v4, 4  ;;  %v353_v21 = vor.u32 %v351_v62, %v350_v9  ;;  %v355_v22 = vrot.slane %v350_v9, 4  ;;  %v4379_v24 = vld [vmem:[%s5562_s1 + $0x60] sm:$0xff]  }
  0x47   : > { %4006 = vmatprep.subr.bf16.mxu0 %v4538_v11  ;;  %v4731_v6 = vsel %vm941_vm9, %v972_v58, %v976_v54  ;;  %v4733_v7 = vld [vmem:[#allocation2 + $0x84] sm:$0xff]   ;;  %v1185_v8 = vrot.slane %v4724_v0, 1  ;;  %v518_v28 = vshrl.u32 %v241_v18, 16  ;;  %v521_v31 = vshll.u32 %v241_v18, 16  ;;  %v715_v33 = vld [vmem:[#allocation2 + $0x9c] sm:$0xf] }
  0x48   : > { %1522 = vmatprep.mubr.bf16.mxu0 %v4731_v6  ;;  %3733 = vmatpush3.bf16.msra.mxu1 %v4370_v52  ;;  %v1184_v19 = vrot.slane %v4733_v7, 1  ;;  %v646_v26 = vsel %vm4621_vm7, %v345_v13, %v645_v63  ;;  %v4380_v36 = vld [vmem:[%s5562_s1 + $0x20] sm:$0xff]   ;;  %v354_v38 = vsel %vm4613_vm5, %v346_v15, %v353_v21  ;;  %v650_v39 = vsel %vm4609_vm4, %v355_v22, %v649_v12  ;;  %v242_v42 = vld [vmem:[%s4591_s10 + $0x68] sm:$0xf]  ;;  %v243_v48 = vld [vmem:[%s4591_s10 + $0x6c] sm:$0xf] }
  0x49   : > { %1523 = vmatmul.mubr.bf16.gmra.mrb[4].mxu0 %v4698_v37  ;;  %3734 = vmatprep.subr.bf16.mxu1 %v4371_v59  ;;  %647 = vst [vmem:[#allocation2 + $0x24] sm:$0xf] %v646_v26  ;;  %v512_v40 = vrot.slane %v510_v23, 7  ;;  %v719_v41 = vld [vmem:[#allocation2 + $0xa4] sm:$0x1]  ;;  %v4381_v43 = vld [vmem:[%s5562_s1 + $0x68] sm:$0xff]  }
  0x4a   : > { %4007 = vmatpush3.bf16.msra.mxu0 %v4538_v11  ;;  %v4751_v1 = vsel %vm1150_vm8, %v1184_v19, %v1185_v8  ;;  %648 = vst [vmem:[#allocation2 + $0x28] sm:$0xf] %v354_v38  ;;  %651 = vst [vmem:[#allocation2 + $0x2c] sm:$0x1] %v650_v39  ;;  %v520_v44 = vrot.slane %v518_v28, 7  ;;  %v527_v52 = vshrl.u32 %v242_v42, 16 }
  0x4b   : > { %4008 = vmatprep.subr.bf16.mxu0 %v4553_v14  ;;  %4036 = vmatprep.mubr.bf16.mxu1 %v4751_v1  ;;  %v4763_v11 = vld [vmem:[#allocation2 + $0x90] sm:$0xff]   ;;  %v515_v46 = vor.u32 %v513_v27, %v512_v40  ;;  %v516_v47 = vrot.slane %v512_v40, 4  ;;  %v530_v55 = vshll.u32 %v242_v42, 16  ;;  %v535_v5 = vshrl.u32 %v243_v48, 16  ;;  %v722_v56 = vld [vmem:[#allocation2 + $0xa8] sm:$0xf] }
  0x4c   : > { %3735 = vmatpush3.bf16.msra.mxu1 %v4372_v3  ;;  %v4765_v45 = vld [vmem:[#allocation2 + $0x98] ss:$0 sps:$4 sm:$0x11]   ;;  %v1187_v49 = vrot.slane %v4763_v11, 1  ;;  %v523_v50 = vor.u32 %v521_v31, %v520_v44  ;;  %v525_v51 = vrot.slane %v520_v44, 4  ;;  %v4382_v57 = vld [vmem:[%s5562_s1 + $0x28] sm:$0xff]  }
  0x4d   : > { %3736 = vmatprep.subr.bf16.mxu1 %v4379_v24  ;;  %v1188_v53 = vrot.slane %v4765_v45, 1  ;;  %v716_v54 = vsel %vm4621_vm7, %v515_v46, %v715_v33  ;;  %v529_v59 = vrot.slane %v527_v52, 7  ;;  %v538_v60 = vshll.u32 %v243_v48, 16  ;;  %v726_v61 = vld [vmem:[#allocation2 + $0xb0] sm:$0x1]  ;;  %v4391_v19 = vld [vmem:[%s5562_s1 + $0x78] sm:$0xff]  }
  0x4e   : > { %4009 = vmatpush3.bf16.msra.mxu0 %v4553_v14  ;;  %v524_v58 = vsel %vm4613_vm5, %v516_v47, %v523_v50  ;;  %717 = vst [vmem:[#allocation2 + $0x9c] sm:$0xf] %v716_v54  ;;  %v720_v14 = vsel %vm4609_vm4, %v525_v51, %v719_v41  ;;  %v537_v63 = vrot.slane %v535_v5, 7  ;;  %v4389_v3 = vld [vmem:[%s5562_s1 + $0x70] sm:$0xff]   ;;  %v222_v26 = vld [vmem:[%s4591_s10 + $0x18] sm:$0xf] }
  0x4f   : > { %4010 = vmatprep.subr.bf16.mxu0 %v4570_v17  ;;  %v4782_v62 = vsel %vm1150_vm8, %v1187_v49, %v1188_v53  ;;  %718 = vst [vmem:[#allocation2 + $0xa0] sm:$0xf] %v524_v58  ;;  %721 = vst [vmem:[#allocation2 + $0xa4] sm:$0x1] %v720_v14  ;;  %v532_v4 = vor.u32 %v530_v55, %v529_v59  ;;  %v533_v9 = vrot.slane %v529_v59, 4  ;;  %v4390_v12 = vld [vmem:[%s5562_s1 + $0x30] sm:$0xff]  }
  0x50   : > { %3737 = vmatpush3.bf16.msra.mxu1 %v4380_v36  ;;  %v540_v13 = vor.u32 %v538_v60, %v537_v63  ;;  %v542_v15 = vrot.slane %v537_v63, 4  ;;  %v223_v27 = vld [vmem:[%s4591_s10 + $0x1c] sm:$0xf]  ;;  %v357_v33 = vshrl.u32 %v222_v26, 16  ;;  %v360_v36 = vshll.u32 %v222_v26, 16  ;;  %v4818_v39 = vld [vmem:[%s5562_s1 + $0x80] sm:$0xff]  }
  0x51   : > { %3738 = vmatprep.subr.bf16.mxu1 %v4381_v43  ;;  %4037 = vmatmul.mubr.bf16.gmra.mrb[4].mxu1 %v4782_v62  ;;  %v4792_v8 = vld [vmem:[#allocation2 + $0x24] sm:$0xff]   ;;  %v4795_v16 = vld [vmem:[#allocation2 + $0x2c] ss:$0 sps:$4 sm:$0x11]   ;;  %v723_v18 = vsel %vm4621_vm7, %v532_v4, %v722_v56  ;;  %v4392_v28 = vld [vmem:[%s5562_s1 + $0x38] sm:$0xff]   ;;  %v365_v38 = vshrl.u32 %v223_v27, 16 }
  0x52   : > { %4011 = vmatpush3.bf16.msra.mxu0 %v4570_v17  ;;  %v979_v17 = vshrl.u32 %v4792_v8, 16  ;;  %v981_v21 = vshll.u32 %v4792_v8, 16  ;;  %v541_v22 = vsel %vm4613_vm5, %v533_v9, %v540_v13  ;;  %724 = vst [vmem:[#allocation2 + $0xa8] sm:$0xf] %v723_v18  ;;  %v727_v23 = vsel %vm4609_vm4, %v542_v15, %v726_v61  ;;  %v652_v48 = vld [vmem:[#allocation2 + $0x30] sm:$0xf] }
  0x53   : > { %4012 = vmatprep.subr.bf16.mxu0 %v4584_v20  ;;  %v986_v24 = vshll.u32 %v4795_v16, 16  ;;  %725 = vst [vmem:[#allocation2 + $0xac] sm:$0xf] %v541_v22  ;;  %728 = vst [vmem:[#allocation2 + $0xb0] sm:$0x1] %v727_v23  ;;  %v367_v44 = vrot.slane %v365_v38, 7 }
  0x54   : > { %3739 = vmatpush3.bf16.msra.mxu1 %v4382_v57  ;;  %v983_v31 = vrot.slane %v981_v21, 1  ;;  %v368_v46 = vshll.u32 %v223_v27, 16  ;;  %v656_v49 = vld [vmem:[#allocation2 + $0x38] sm:$0x1]  ;;  %v244_v54 = vld [vmem:[%s4591_s10 + $0x70] sm:$0xf] }
  0x55   : > { %3740 = vmatprep.subr.bf16.mxu1 %v4389_v3  ;;  %v988_v40 = vrot.slane %v986_v24, 1  ;;  %v245_v55 = vld [vmem:[%s4591_s10 + $0x74] sm:$0xf]  ;;  %v372_v56 = vrot.slane %v367_v44, 4  ;;  %v544_v57 = vshrl.u32 %v244_v54, 16  ;;  %v547_v58 = vshll.u32 %v244_v54, 16 }
  0x56   : > { %4013 = vmatpush3.bf16.msra.mxu0 %v4584_v20  ;;  %v4821_v41 = vld [vmem:[#allocation2 + $0x9c] sm:$0xff]   ;;  %v984_v42 = vor.u32 %v983_v31, %v979_v17  ;;  %v4823_v43 = vld [vmem:[#allocation2 + $0xa4] ss:$0 sps:$4 sm:$0x11]   ;;  %v359_v20 = vrot.slane %v357_v33, 7  ;;  %v370_v5 = vor.u32 %v368_v46, %v367_v44  ;;  %v552_v60 = vshrl.u32 %v245_v55, 16 }
  0x57   : > { %4014 = vmatprep.subr.bf16.mxu0 %v4606_v25  ;;  %v1190_v47 = vrot.slane %v4821_v41, 1  ;;  %v1191_v51 = vrot.slane %v4823_v43, 1  ;;  %v657_v3 = vsel %vm4609_vm4, %v372_v56, %v656_v49  ;;  %v546_v4 = vrot.slane %v544_v57, 7  ;;  %v729_v15 = vld [vmem:[#allocation2 + $0xb4] sm:$0xf] }
  0x58   : > { %3741 = vmatpush3.bf16.msra.mxu1 %v4390_v12  ;;  %v4828_v50 = vsel %vm941_vm9, %v984_v42, %v988_v40  ;;  %v362_v52 = vor.u32 %v360_v36, %v359_v20  ;;  %v363_v53 = vrot.slane %v359_v20, 4  ;;  %v555_v9 = vshll.u32 %v245_v55, 16  ;;  %658 = vst [vmem:[#allocation2 + $0x38] sm:$0x1] %v657_v3  ;;  %v733_v18 = vld [vmem:[#allocation2 + $0xbc] sm:$0x1] }
  0x59   : > { %3742 = vmatprep.subr.bf16.mxu1 %v4391_v19  ;;  %1530 = vmatprep.mubr.bf16.mxu0 %v4828_v50  ;;  %v4835_v14 = vsel %vm1150_vm8, %v1190_v47, %v1191_v51  ;;  %v554_v13 = vrot.slane %v552_v60, 7  ;;  %v549_v17 = vor.u32 %v547_v58, %v546_v4  ;;  %v550_v21 = vrot.slane %v546_v4, 4  ;;  %v246_v22 = vld [vmem:[%s4591_s10 + $0x78] sm:$0xf]  ;;  %v247_v23 = vld [vmem:[%s4591_s10 + $0x7c] sm:$0xf] }
  0x5a   : > { %4015 = vmatpush3.bf16.msra.mxu0 %v4606_v25  ;;  %v4838_v25 = vld [vmem:[#allocation2 + $0xa8] sm:$0xff]   ;;  %v653_v59 = vsel %vm4621_vm7, %v362_v52, %v652_v48  ;;  %4040 = vmatprep.mubr.bf16.mxu1 %v4835_v14  ;;  %v4844_v61 = vld [vmem:[#allocation2 + $0xb0] ss:$0 sps:$4 sm:$0x11]   ;;  %v371_v63 = vsel %vm4613_vm5, %v363_v53, %v370_v5  ;;  %v561_v27 = vshrl.u32 %v246_v22, 16  ;;  %v569_v36 = vshrl.u32 %v247_v23, 16 }
  0x5b   : > { %1531 = vmatmul.mubr.bf16.gmra.mrb[8].mxu0 %v4792_v8  ;;  %654 = vst [vmem:[#allocation2 + $0x30] sm:$0xf] %v653_v59  ;;  %v1193_v12 = vrot.slane %v4838_v25, 1  ;;  %655 = vst [vmem:[#allocation2 + $0x34] sm:$0xf] %v371_v63  ;;  %v1194_v19 = vrot.slane %v4844_v61, 1  ;;  %v557_v24 = vor.u32 %v555_v9, %v554_v13  ;;  %v730_v33 = vsel %vm4621_vm7, %v549_v17, %v729_v15 }
  0x5c   : > { %3743 = vmatpush3.bf16.msra.mxu1 %v4392_v28  ;;  %v559_v26 = vrot.slane %v554_v13, 4  ;;  %v564_v28 = vshll.u32 %v246_v22, 16  ;;  %v572_v38 = vshll.u32 %v247_v23, 16  ;;  %v736_v40 = vld [vmem:[#allocation2 + $0xc0] sm:$0xf]  ;;  %v563_v44 = vrot.slane %v561_v27, 7 }
  0x5d   : > { %4048 = vmatprep.subr.bf16.mxu1 %v4818_v39  ;;  %v4855_v31 = vsel %vm1150_vm8, %v1193_v12, %v1194_v19  ;;  %v558_v42 = vsel %vm4613_vm5, %v550_v21, %v557_v24  ;;  %731 = vst [vmem:[#allocation2 + $0xb4] sm:$0xf] %v730_v33  ;;  %v740_v46 = vld [vmem:[#allocation2 + $0xc8] sm:$0x1]  ;;  %v571_v47 = vrot.slane %v569_v36, 7  ;;  %v4864_v51 = vld [vmem:[#allocation2] sm:$0xff]  }
  0x5e   : > { %4041 = vmatmul.mubr.bf16.gmra.mrb[8].mxu1 %v4855_v31  ;;  %v734_v20 = vsel %vm4609_vm4, %v559_v26, %v733_v18  ;;  %732 = vst [vmem:[#allocation2 + $0xb8] sm:$0xf] %v558_v42  ;;  %v566_v48 = vor.u32 %v564_v28, %v563_v44  ;;  %v567_v49 = vrot.slane %v563_v44, 4  ;;  %v224_v60 = vld [vmem:[%s4591_s10 + $0x20] sm:$0xf]  ;;  %v945_v9 = vshll.u32 %v4864_v51, 16 }
  0x5f   : > { %735 = vst [vmem:[#allocation2 + $0xbc] sm:$0x1] %v734_v20  ;;  %v574_v53 = vor.u32 %v572_v38, %v571_v47  ;;  %v576_v54 = vrot.slane %v571_v47, 4  ;;  %v4868_v55 = vld [vmem:[#allocation2 + $0x38] ss:$0 sps:$4 sm:$0x11]  }
  0x60   : > { %v737_v5 = vsel %vm4621_vm7, %v566_v48, %v736_v40  ;;  %v998_v63 = vshll.u32 %v4868_v55, 16  ;;  %v225_v3 = vld [vmem:[%s4591_s10 + $0x24] sm:$0xf]  ;;  %v374_v4 = vshrl.u32 %v224_v60, 16  ;;  %v377_v13 = vshll.u32 %v224_v60, 16 }
  0x61   : > { %v575_v58 = vsel %vm4613_vm5, %v567_v49, %v574_v53  ;;  %738 = vst [vmem:[#allocation2 + $0xc0] sm:$0xf] %v737_v5  ;;  %v741_v59 = vsel %vm4609_vm4, %v576_v54, %v740_v46  ;;  %v382_v15 = vshrl.u32 %v225_v3, 16  ;;  %v385_v18 = vshll.u32 %v225_v3, 16  ;;  %v659_v27 = vld [vmem:[#allocation2 + $0x3c] sm:$0xf] }
  0x62   : > { %v4866_v52 = vld [vmem:[#allocation2 + $0x30] sm:$0xff]   ;;  %739 = vst [vmem:[#allocation2 + $0xc4] sm:$0xf] %v575_v58  ;;  %742 = vst [vmem:[#allocation2 + $0xc8] sm:$0x1] %v741_v59  ;;  %v1000_v19 = vrot.slane %v998_v63, 1 }
  0x63   : > { %v991_v56 = vshrl.u32 %v4866_v52, 16  ;;  %v993_v57 = vshll.u32 %v4866_v52, 16  ;;  %v376_v23 = vrot.slane %v374_v4, 7  ;;  %v384_v24 = vrot.slane %v382_v15, 7  ;;  %v663_v28 = vld [vmem:[#allocation2 + $0x44] sm:$0x1] }
  0x64   : > { %v943_v33 = vshrl.u32 %v4864_v51, 16  ;;  %v947_v46 = vrot.slane %v945_v9, 1  ;;  %v226_v63 = vld [vmem:[%s4591_s10 + $0x28] sm:$0xf]  ;;  %v227_v3 = vld [vmem:[%s4591_s10 + $0x2c] sm:$0xf] }
  0x65   : > { %v995_v12 = vrot.slane %v993_v57, 1  ;;  %v4882_v17 = vld [vmem:[#allocation2 + $0xb4] sm:$0xff]   ;;  %v379_v40 = vor.u32 %v377_v13, %v376_v23  ;;  %v380_v42 = vrot.slane %v376_v23, 4  ;;  %v387_v20 = vor.u32 %v385_v18, %v384_v24 }
  0x66   : > { %v4884_v22 = vld [vmem:[#allocation2 + $0xbc] ss:$0 sps:$4 sm:$0x11]   ;;  %v1196_v26 = vrot.slane %v4882_v17, 1  ;;  %v389_v44 = vrot.slane %v384_v24, 4  ;;  %v948_v59 = vor.u32 %v947_v46, %v943_v33  ;;  %v391_v4 = vshrl.u32 %v226_v63, 16 }
  0x67   : > { %v996_v21 = vor.u32 %v995_v12, %v991_v56  ;;  %v1197_v38 = vrot.slane %v4884_v22, 1  ;;  %v660_v49 = vsel %vm4621_vm7, %v379_v40, %v659_v27  ;;  %v388_v54 = vsel %vm4613_vm5, %v380_v42, %v387_v20  ;;  %v4908_v56 = vld [vmem:[#allocation2 + $0x8] ss:$0 sps:$4 sm:$0x11]   ;;  %v670_v33 = vld [vmem:[#allocation2 + $0x50] sm:$0x1] }
  0x68   : > { %661 = vst [vmem:[#allocation2 + $0x3c] sm:$0xf] %v660_v49  ;;  %v664_v5 = vsel %vm4609_vm4, %v389_v44, %v663_v28  ;;  %662 = vst [vmem:[#allocation2 + $0x40] sm:$0xf] %v388_v54  ;;  %v950_v60 = vshll.u32 %v4908_v56, 16  ;;  %v394_v9 = vshll.u32 %v226_v63, 16 }
  0x69   : > { %v4889_v36 = vsel %vm941_vm9, %v996_v21, %v1000_v19  ;;  %v4894_v47 = vsel %vm1150_vm8, %v1196_v26, %v1197_v38  ;;  %v4897_v48 = vld [vmem:[#allocation2 + $0xc0] sm:$0xff]   ;;  %v4902_v53 = vld [vmem:[#allocation2 + $0xc8] ss:$0 sps:$4 sm:$0x11]   ;;  %665 = vst [vmem:[#allocation2 + $0x44] sm:$0x1] %v664_v5 }
  0x6a   : > { %1538 = vmatprep.mubr.bf16.mxu0 %v4889_v36  ;;  %4044 = vmatprep.mubr.bf16.mxu1 %v4894_v47  ;;  %v1285_v57 = vrot.slane %v4897_v48, 1  ;;  %v1286_v58 = vrot.slane %v4902_v53, 1  ;;  %v399_v12 = vshrl.u32 %v227_v3, 16  ;;  %v402_v13 = vshll.u32 %v227_v3, 16  ;;  %v666_v19 = vld [vmem:[#allocation2 + $0x48] sm:$0xf] }
  0x6b   : > { %1539 = vmatmul.mubr.bf16.gmra.mrb[12].mxu0 %v4866_v52  ;;  %v952_v18 = vrot.slane %v950_v60, 1  ;;  %v228_v21 = vld [vmem:[%s4591_s10 + $0x30] sm:$0xf]  ;;  %v393_v23 = vrot.slane %v391_v4, 7  ;;  %v229_v26 = vld [vmem:[%s4591_s10 + $0x34] sm:$0xf] }
  0x6c   : > { %v4916_v15 = vsel %vm1150_vm8, %v1285_v57, %v1286_v58  ;;  %v401_v24 = vrot.slane %v399_v12, 7  ;;  %v408_v27 = vshrl.u32 %v228_v21, 16  ;;  %v411_v38 = vshll.u32 %v228_v21, 16  ;;  %v673_v54 = vld [vmem:[#allocation2 + $0x54] sm:$0xf]  ;;  %v4402_v21 = vld [vmem:[%s5562_s1 + $0x88] sm:$0xff]  }
  0x6d   : > { %4045 = vmatmul.mubr.bf16.gmra.mrb[12].mxu1 %v4916_v15  ;;  %v953_v28 = vsel %vm941_vm9, %v948_v59, %v952_v18  ;;  %v416_v40 = vshrl.u32 %v229_v26, 16  ;;  %v419_v42 = vshll.u32 %v229_v26, 16  ;;  %v396_v20 = vor.u32 %v394_v9, %v393_v23  ;;  %v677_v58 = vld [vmem:[#allocation2 + $0x5c] sm:$0x1] }
  0x6e   : > { %1980 = vmatprep.mubr.bf16.mxu1 %v953_v28  ;;  %v397_v44 = vrot.slane %v393_v23, 4  ;;  %v404_v46 = vor.u32 %v402_v13, %v401_v24  ;;  %v406_v49 = vrot.slane %v401_v24, 4  ;;  %v410_v57 = vrot.slane %v408_v27, 7  ;;  %v230_v23 = vld [vmem:[%s4591_s10 + $0x38] sm:$0xf] }
  0x6f   : > { %v4922_v5 = vld [vmem:[#allocation2 + $0x3c] sm:$0xff]   ;;  %v667_v63 = vsel %vm4621_vm7, %v396_v20, %v666_v19  ;;  %v418_v4 = vrot.slane %v416_v40, 7  ;;  %v425_v28 = vshrl.u32 %v230_v23, 16  ;;  %v428_v20 = vshll.u32 %v230_v23, 16 }
  0x70   : > { %v4924_v60 = vld [vmem:[#allocation2 + $0x44] ss:$0 sps:$4 sm:$0x11]   ;;  %v405_v59 = vsel %vm4613_vm5, %v397_v44, %v404_v46  ;;  %v671_v3 = vsel %vm4609_vm4, %v406_v49, %v670_v33  ;;  %v1003_v9 = vshrl.u32 %v4922_v5, 16  ;;  %v1005_v12 = vshll.u32 %v4922_v5, 16 }
  0x71   : > { %668 = vst [vmem:[#allocation2 + $0x48] sm:$0xf] %v667_v63  ;;  %669 = vst [vmem:[#allocation2 + $0x4c] sm:$0xf] %v405_v59  ;;  %v413_v13 = vor.u32 %v411_v38, %v410_v57  ;;  %v414_v18 = vrot.slane %v410_v57, 4  ;;  %v1010_v19 = vshll.u32 %v4924_v60, 16  ;;  %v421_v24 = vor.u32 %v419_v42, %v418_v4 }
  0x72   : > { %672 = vst [vmem:[#allocation2 + $0x50] sm:$0x1] %v671_v3  ;;  %v423_v26 = vrot.slane %v418_v4, 4  ;;  %v231_v27 = vld [vmem:[%s4591_s10 + $0x3c] sm:$0xf]  ;;  %v4410_v33 = vld [vmem:[%s5562_s1 + $0x1c0] sm:$0xff]  }
  0x73   : > { %v1007_v40 = vrot.slane %v1005_v12, 1  ;;  %v674_v38 = vsel %vm4621_vm7, %v413_v13, %v673_v54  ;;  %v433_v44 = vshrl.u32 %v231_v27, 16  ;;  %v1012_v46 = vrot.slane %v1010_v19, 1  ;;  %v680_v59 = vld [vmem:[#allocation2 + $0x60] sm:$0xf]  ;;  %3864 = vmatprep.subr.bf16.mxu0 %v4410_v33 }
  0x74   : > { %v422_v49 = vsel %vm4613_vm5, %v414_v18, %v421_v24  ;;  %675 = vst [vmem:[#allocation2 + $0x54] sm:$0xf] %v674_v38  ;;  %v678_v42 = vsel %vm4609_vm4, %v423_v26, %v677_v58  ;;  %v427_v57 = vrot.slane %v425_v28, 7  ;;  %v436_v3 = vshll.u32 %v231_v27, 16  ;;  %v684_v4 = vld [vmem:[#allocation2 + $0x68] sm:$0x1] }
  0x75   : > { %1981 = vmatmul.mubr.bf16.vlgmr.msra.gmra.mrb[16].mxu1 %v4864_v51  ;;  %v1008_v63 = vor.u32 %v1007_v40, %v1003_v9  ;;  %676 = vst [vmem:[#allocation2 + $0x58] sm:$0xf] %v422_v49  ;;  %679 = vst [vmem:[#allocation2 + $0x5c] sm:$0x1] %v678_v42  ;;  %v435_v54 = vrot.slane %v433_v44, 7  ;;  %v4405_v58 = vld [vmem:[%s5562_s1 + $0x90] sm:$0xff]  }
  0x76   : > { %4049 = vmatpush3.bf16.msra.mxu1 %v4818_v39  ;;  %1988 = vmatprep.mubr.bf16.mxu1 %v4670_v2  ;;  %v430_v12 = vor.u32 %v428_v20, %v427_v57  ;;  %v431_v13 = vrot.slane %v427_v57, 4  ;;  %v4407_v44 = vld [vmem:[%s5562_s1 + $0xa0] sm:$0xff]  }
  0x77   : > { %4050 = vmatprep.subr.bf16.mxu1 %v4402_v21  ;;  %v4956_v18 = vsel %vm941_vm9, %v1008_v63, %v1012_v46  ;;  %v438_v9 = vor.u32 %v436_v3, %v435_v54  ;;  %v440_v23 = vrot.slane %v435_v54, 4 }
  0x78   : > { %1546 = vmatprep.mubr.bf16.mxu0 %v4956_v18  ;;  %v681_v2 = vsel %vm4621_vm7, %v430_v12, %v680_v59  ;;  %v4962_v39 = vld [vmem:[#allocation2 + $0x48] sm:$0xff]  }
  0x79   : > { %1547 = vmatmul.mubr.bf16.gmra.mrb[16].mxu0 %v4922_v5  ;;  %v4964_v19 = vld [vmem:[#allocation2 + $0x50] ss:$0 sps:$4 sm:$0x11]   ;;  %v439_v24 = vsel %vm4613_vm5, %v431_v13, %v438_v9  ;;  %682 = vst [vmem:[#allocation2 + $0x60] sm:$0xf] %v681_v2  ;;  %v685_v26 = vsel %vm4609_vm4, %v440_v23, %v684_v4  ;;  %v1015_v27 = vshrl.u32 %v4962_v39, 16 }
  0x7a   : > { %4051 = vmatpush3.bf16.msra.mxu1 %v4402_v21  ;;  %683 = vst [vmem:[#allocation2 + $0x64] sm:$0xf] %v439_v24  ;;  %686 = vst [vmem:[#allocation2 + $0x68] sm:$0x1] %v685_v26  ;;  %v1017_v28 = vshll.u32 %v4962_v39, 16  ;;  %v1022_v21 = vshll.u32 %v4964_v19, 16 }
  0x7b   : > { %4052 = vmatprep.subr.bf16.mxu1 %v4405_v58  ;;  %v4408_v12 = vld [vmem:[%s5562_s1 + $0xa8] sm:$0xff]  }
  0x7c   : > { %v4977_v30 = vld [vmem:[#allocation2 + $0x54] sm:$0xff]   ;;  %v1019_v33 = vrot.slane %v1017_v28, 1  ;;  %v1024_v29 = vrot.slane %v1022_v21, 1  ;;  %v4979_v40 = vld [vmem:[#allocation2 + $0x5c] ss:$0 sps:$4 sm:$0x11]  }
  0x7d   : > { %1989 = vmatmul.mubr.bf16.gmra.mrb[20].mxu1 %v4656_v32  ;;  %v1027_v38 = vshrl.u32 %v4977_v30, 16  ;;  %v1029_v20 = vshll.u32 %v4977_v30, 16  ;;  %v1034_v32 = vshll.u32 %v4979_v40, 16  ;;  %v5009_v23 = vld [vmem:[#allocation2 + $0x6c] sm:$0xff]  }
  0x7e   : > { %1996 = vmatprep.mubr.bf16.mxu1 %v4731_v6  ;;  %4053 = vmatpush3.bf16.msra.mxu1 %v4405_v58  ;;  %v1020_v46 = vor.u32 %v1019_v33, %v1015_v27  ;;  %v1053_v2 = vshll.u32 %v5009_v23, 16  ;;  %v4438_v21 = vld [vmem:[#allocation2 + $0x74] ss:$0 sps:$4 sm:$0x11]  }
  0x7f   : > { %4054 = vmatprep.subr.bf16.mxu1 %v4406_v35  ;;  %v1031_v49 = vrot.slane %v1029_v20, 1  ;;  %v1036_v57 = vrot.slane %v1034_v32, 1  ;;  %v1058_v33 = vshll.u32 %v4438_v21, 16 }
  0x80   : > { %v4989_v42 = vsel %vm941_vm9, %v1020_v46, %v1024_v29  ;;  %v1055_v28 = vrot.slane %v1053_v2, 1  ;;  %v4418_v29 = vld [vmem:[%s5562_s1 + $0xb8] sm:$0xff]   ;;  %v1082_v2 = vshll.u32 %v4724_v0, 16 }
  0x81   : > { %v4991_v59 = vld [vmem:[#allocation2 + $0x60] sm:$0xff]   ;;  %1554 = vmatprep.mubr.bf16.mxu0 %v4989_v42  ;;  %v1032_v63 = vor.u32 %v1031_v49, %v1027_v38  ;;  %v4994_v54 = vld [vmem:[#allocation2 + $0x68] ss:$0 sps:$4 sm:$0x11]   ;;  %v1060_v20 = vrot.slane %v1058_v33, 1  ;;  %v1087_v33 = vshrl.u32 %v4763_v11, 16 }
  0x82   : > { %4055 = vmatpush3.bf16.msra.mxu1 %v4406_v35  ;;  %1555 = vmatmul.mubr.bf16.gmra.mrb[20].mxu0 %v4962_v39  ;;  %v1039_v3 = vshrl.u32 %v4991_v59, 16  ;;  %v1041_v4 = vshll.u32 %v4991_v59, 16  ;;  %v1046_v58 = vshll.u32 %v4994_v54, 16  ;;  %v4409_v35 = vld [vmem:[%s5562_s1 + $0xb0] sm:$0xff]  }
  0x83   : > { %4056 = vmatprep.subr.bf16.mxu1 %v4407_v44  ;;  %v5003_v13 = vsel %vm941_vm9, %v1032_v63, %v1036_v57  ;;  %v4440_v63 = vld [vmem:[#allocation2 + $0x80] ss:$0 sps:$4 sm:$0x11]  }
  0x84   : > { %1562 = vmatprep.mubr.bf16.mxu0 %v5003_v13  ;;  %v1043_v9 = vrot.slane %v1041_v4, 1  ;;  %v1048_v24 = vrot.slane %v1046_v58, 1  ;;  %v1077_v58 = vshll.u32 %v4733_v7, 16 }
  0x85   : > { %1997 = vmatmul.mubr.bf16.gmra.mrb[24].mxu1 %v4698_v37  ;;  %v1051_v37 = vshrl.u32 %v5009_v23, 16 }
  0x86   : > { %2004 = vmatprep.mubr.bf16.mxu1 %v4828_v50  ;;  %4057 = vmatpush3.bf16.msra.mxu1 %v4407_v44  ;;  %v1044_v26 = vor.u32 %v1043_v9, %v1039_v3  ;;  %v5026_v44 = vld [vmem:[#allocation2 + $0x78] sm:$0xff]   ;;  %v1070_v3 = vshll.u32 %v4440_v63, 16  ;;  %v5041_v9 = vld [vmem:[%s5562_s1 + $0x200] sm:$0xff]  }
  0x87   : > { %4058 = vmatprep.subr.bf16.mxu1 %v4408_v12  ;;  %v1056_v38 = vor.u32 %v1055_v28, %v1051_v37  ;;  %v1065_v46 = vshll.u32 %v5026_v44, 16  ;;  %v1063_v32 = vshrl.u32 %v5026_v44, 16  ;;  %v1084_v37 = vrot.slane %v1082_v2, 1 }
  0x88   : > { %v5017_v27 = vsel %vm941_vm9, %v1044_v26, %v1048_v24  ;;  %v1075_v26 = vshrl.u32 %v4733_v7, 16  ;;  %v1089_v28 = vshll.u32 %v4763_v11, 16  ;;  %v1094_v7 = vshll.u32 %v4765_v45, 16 }
  0x89   : > { %v5031_v49 = vsel %vm941_vm9, %v1056_v38, %v1060_v20  ;;  %v1067_v57 = vrot.slane %v1065_v46, 1  ;;  %v1101_v46 = vshll.u32 %v4821_v41, 16  ;;  %v1106_v45 = vshll.u32 %v4823_v43, 16 }
  0x8a   : > { %4059 = vmatpush3.bf16.msra.mxu1 %v4408_v12  ;;  %1563 = vmatmul.mubr.bf16.gmra.mrb[24].mxu0 %v4977_v30  ;;  %v1072_v12 = vrot.slane %v1070_v3, 1  ;;  %v1096_v20 = vrot.slane %v1094_v7, 1  ;;  %v5069_v3 = vld [vmem:[#allocation2 + $0x84] sm:$0xff]  }
  0x8b   : > { %4060 = vmatprep.subr.bf16.mxu1 %v4409_v35  ;;  %1570 = vmatprep.mubr.bf16.mxu0 %v5017_v27  ;;  %v1068_v4 = vor.u32 %v1067_v57, %v1063_v32  ;;  %v1099_v57 = vshrl.u32 %v4821_v41, 16  ;;  %v1103_v63 = vrot.slane %v1101_v46, 1 }
  0x8d   : > { %2005 = vmatmul.mubr.bf16.gmra.mrb[28].mxu1 %v4792_v8  ;;  %v5046_v24 = vsel %vm941_vm9, %v1068_v4, %v1072_v12  ;;  %v1104_v4 = vor.u32 %v1103_v63, %v1099_v57  ;;  %v1108_v12 = vrot.slane %v1106_v45, 1  ;;  %v1273_v57 = vshrl.u32 %v4897_v48, 16 }
  0x8e   : > { %2012 = vmatprep.mubr.bf16.mxu1 %v4889_v36  ;;  %4061 = vmatpush3.bf16.msra.mxu1 %v4409_v35  ;;  %v1079_v35 = vrot.slane %v1077_v58, 1  ;;  %v1113_v58 = vshll.u32 %v4838_v25, 16 }
  0x8f   : > { %4062 = vmatprep.subr.bf16.mxu1 %v4418_v29  ;;  %v5077_v2 = vsel %vm941_vm9, %v1104_v4, %v1108_v12 }
  0x90   : > { %v1080_v21 = vor.u32 %v1079_v35, %v1075_v26  ;;  %v1111_v26 = vshrl.u32 %v4838_v25, 16  ;;  %v1115_v43 = vrot.slane %v1113_v58, 1  ;;  %v1118_v35 = vshll.u32 %v4844_v61, 16 }
  0x91   : > { %v1130_v61 = vshll.u32 %v4884_v22, 16  ;;  %v1280_v22 = vshll.u32 %v4902_v53, 16  ;;  %v4442_v53 = vld [vmem:[#allocation2 + $0xc] sm:$0xff]  }
  0x92   : > { %4063 = vmatpush3.bf16.msra.mxu1 %v4418_v29  ;;  %1571 = vmatmul.mubr.bf16.gmra.mrb[28].mxu0 %v4991_v59  ;;  %v5055_v0 = vsel %vm941_vm9, %v1080_v21, %v1084_v37  ;;  %v1091_v29 = vrot.slane %v1089_v28, 1  ;;  %v1116_v37 = vor.u32 %v1115_v43, %v1111_v26  ;;  %v1120_v28 = vrot.slane %v1118_v35, 1  ;;  %v4443_v26 = vld [vmem:[#allocation2 + $0x14] ss:$0 sps:$4 sm:$0x11]  }
  0x93   : > { %1578 = vmatprep.mubr.bf16.mxu0 %v5031_v49  ;;  %4096 = vmatprep.subr.bf16.mxu1 %v5041_v9  ;;  %v1125_v21 = vshll.u32 %v4882_v17, 16  ;;  %v1282_v4 = vrot.slane %v1280_v22, 1  ;;  %v1154_v58 = vrot.slane %v4442_v53, 1  ;;  %v1155_v43 = vrot.slane %v4443_v26, 1  ;;  %v4414_v22 = vld [vmem:[%s5562_s1 + $0x1d0] sm:$0xff]  }
  0x94   : > { %v1092_v38 = vor.u32 %v1091_v29, %v1087_v33  ;;  %v5087_v33 = vsel %vm941_vm9, %v1116_v37, %v1120_v28  ;;  %v1123_v29 = vshrl.u32 %v4882_v17, 16  ;;  %v5117_v37 = vld [vmem:[#allocation2 + $0x18] sm:$0xff]   ;;  %v1169_v26 = vrot.slane %v4962_v39, 1 }
  0x95   : > { %2013 = vmatmul.mubr.bf16.gmra.mrb[32].mxu1 %v4866_v52  ;;  %v1127_v7 = vrot.slane %v1125_v21, 1  ;;  %v5113_v35 = vsel %vm1150_vm8, %v1154_v58, %v1155_v43  ;;  %v1157_v28 = vrot.slane %v5117_v37, 1  ;;  %v4445_v21 = vld [vmem:[#allocation2 + $0x20] ss:$0 sps:$4 sm:$0x11]   ;;  %v1170_v43 = vrot.slane %v4964_v19, 1 }
  0x96   : > { %2020 = vmatprep.mubr.bf16.mxu1 %v4956_v18  ;;  %v5065_v32 = vsel %vm941_vm9, %v1092_v38, %v1096_v20  ;;  %v1132_v38 = vrot.slane %v1130_v61, 1  ;;  %v1275_v20 = vshll.u32 %v4897_v48, 16  ;;  %v1160_v61 = vrot.slane %v4792_v8, 1  ;;  %v4413_v8 = vld [vmem:[%s5562_s1 + $0x188] sm:$0xff]  }
  0x97   : > { %v5181_v19 = vsel %vm1150_vm8, %v1169_v26, %v1170_v43 }
  0x98   : > { %v1277_v63 = vrot.slane %v1275_v20, 1  ;;  %v4412_v20 = vld [vmem:[%s5562_s1 + $0x1c8] sm:$0xff]  }
  0x9a   : > { %1579 = vmatmul.mubr.bf16.gmra.mrb[32].mxu0 %v5009_v23  ;;  %v1278_v45 = vor.u32 %v1277_v63, %v1273_v57  ;;  %v1164_v63 = vrot.slane %v4868_v55, 1  ;;  %v4415_v55 = vld [vmem:[%s5562_s1 + $0x190] sm:$0xff]  }
  0x9b   : > { %1586 = vmatprep.mubr.bf16.mxu0 %v5046_v24 }
  0x9c   : > { %v5106_v12 = vsel %vm941_vm9, %v1278_v45, %v1282_v4  ;;  %v1166_v45 = vrot.slane %v4922_v5, 1  ;;  %v1167_v4 = vrot.slane %v4924_v60, 1  ;;  %v4417_v60 = vld [vmem:[%s5562_s1 + $0x198] sm:$0xff]  }
  0x9d   : > { %2021 = vmatmul.mubr.bf16.gmra.mrb[36].mxu1 %v4922_v5 }
  0x9e   : > { %2028 = vmatprep.mubr.bf16.mxu1 %v4989_v42  ;;  %v5162_v58 = vsel %vm1150_vm8, %v1166_v45, %v1167_v4  ;;  %v4426_v45 = vld [vmem:[%s5562_s1 + $0x1b8] sm:$0xff]   ;;  %v4429_v4 = vld [vmem:[%s5562_s1 + $0x210] sm:$0xff]  }
  0xa2   : > { %1587 = vmatmul.mubr.bf16.gmra.mrb[36].mxu0 %v5026_v44 }
  0xa3   : > { %1594 = vmatprep.mubr.bf16.mxu0 %v5055_v0 }
  0xa5   : > { %2029 = vmatmul.mubr.bf16.gmra.mrb[40].mxu1 %v4962_v39 }
  0xa6   : > { %2036 = vmatprep.mubr.bf16.mxu1 %v5003_v13 }
  0xaa   : > { %1595 = vmatmul.mubr.bf16.gmra.mrb[40].mxu0 %v5069_v3 }
  0xab   : > { %1602 = vmatprep.mubr.bf16.mxu0 %v5065_v32 }
  0xad   : > { %2037 = vmatmul.mubr.bf16.gmra.mrb[44].mxu1 %v4977_v30 }
  0xae   : > { %2044 = vmatprep.mubr.bf16.mxu1 %v5017_v27 }
  0xb2   : > { %1603 = vmatmul.mubr.bf16.gmra.mrb[44].mxu0 %v4763_v11  ;;  %v1128_v11 = vor.u32 %v1127_v7, %v1123_v29  ;;  %v1158_v29 = vrot.slane %v4445_v21, 1  ;;  %v5120_v7 = vld [vmem:[#allocation2 + $0x90] sm:$0xff]   ;;  %v1172_v21 = vrot.slane %v4977_v30, 1 }
  0xb3   : > { %1610 = vmatprep.mubr.bf16.mxu0 %v5077_v2 }
  0xb4   : > { %v5097_v46 = vsel %vm941_vm9, %v1128_v11, %v1132_v38  ;;  %v1161_v11 = vrot.slane %v4795_v16, 1  ;;  %v4411_v38 = vld [vmem:[%s5562_s1 + $0x180] sm:$0xff]   ;;  %v1163_v16 = vrot.slane %v4866_v52, 1 }
  0xb5   : > { %2045 = vmatmul.mubr.bf16.gmra.mrb[48].mxu1 %v4991_v59 }
  0xb6   : > { %2052 = vmatprep.mubr.bf16.mxu1 %v5031_v49  ;;  %v5136_v57 = vsel %vm1150_vm8, %v1160_v61, %v1161_v11  ;;  %v5153_v53 = vsel %vm1150_vm8, %v1163_v16, %v1164_v63  ;;  %v1151_v61 = vrot.slane %v4864_v51, 1  ;;  %v1152_v11 = vrot.slane %v4908_v56, 1  ;;  %v4422_v56 = vld [vmem:[%s5562_s1 + $0x1a8] sm:$0xff]   ;;  %v4423_v16 = vld [vmem:[%s5562_s1 + $0x1f0] sm:$0xff]  }
  0xb8   : > { %v1153_v51 = vsel %vm1150_vm8, %v1151_v61, %v1152_v11 }
  0xba   : > { %1611 = vmatmul.mubr.bf16.gmra.mrb[48].mxu0 %v4821_v41 }
  0xbb   : > { %1618 = vmatprep.mubr.bf16.mxu0 %v5087_v33 }
  0xbd   : > { %2053 = vmatmul.mubr.bf16.gmra.mrb[52].mxu1 %v5009_v23 }
  0xbe   : > { %2060 = vmatprep.mubr.bf16.mxu1 %v5046_v24 }
  0xc2   : > { %1619 = vmatmul.mubr.bf16.gmra.mrb[52].mxu0 %v4838_v25 }
  0xc3   : > { %1626 = vmatprep.mubr.bf16.mxu0 %v5097_v46 }
  0xc5   : > { %2061 = vmatmul.mubr.bf16.gmra.mrb[56].mxu1 %v5026_v44 }
  0xc6   : > { %2068 = vmatprep.mubr.bf16.mxu1 %v5055_v0 }
  0xca   : > { %1627 = vmatmul.mubr.bf16.gmra.mrb[56].mxu0 %v4882_v17 }
  0xcb   : > { %1634 = vmatprep.mubr.bf16.mxu0 %v5106_v12 }
  0xcd   : > { %2069 = vmatmul.mubr.bf16.gmra.mrb[60].mxu1 %v5069_v3 }
  0xce   : > { %2076 = vmatprep.mubr.bf16.mxu1 %v5065_v32 }
  0xd2   : > { %1635 = vmatmul.mubr.bf16.gmra.mrb[60].mxu0 %v4897_v48  ;;  %v5127_v48 = vsel %vm1150_vm8, %v1157_v28, %v1158_v29  ;;  %v4419_v28 = vld [vmem:[%s5562_s1 + $0x1e0] sm:$0xff]   ;;  %v1173_v29 = vrot.slane %v4979_v40, 1 }
  0xd3   : > { %4016 = vmatprep.mubr.bf16.mxu0 %v5113_v35 }
  0xd4   : > { %v5190_v40 = vsel %vm1150_vm8, %v1172_v21, %v1173_v29 }
  0xd5   : > { %2077 = vmatmul.mubr.bf16.gmra.mrb[64].mxu1 %v5120_v7 }
  0xd6   : > { %2084 = vmatprep.mubr.bf16.mxu1 %v5077_v2 }
  0xda   : > { %4017 = vmatmul.mubr.bf16.vlgmr.msra.gmra.mrb[64].mxu0 %v5127_v48 }
  0xdb   : > { %3865 = vmatpush3.bf16.msra.mxu0 %v4411_v38  ;;  %4020 = vmatprep.mubr.bf16.mxu0 %v5136_v57  ;;  %v4421_v38 = vld [vmem:[%s5562_s1 + $0x1e8] sm:$0xff]  }
  0xdc   : > { %3866 = vmatprep.subr.bf16.mxu0 %v4412_v20  ;;  %v1175_v20 = vrot.slane %v4991_v59, 1 }
  0xdd   : > { %2085 = vmatmul.mubr.bf16.gmra.mrb[68].mxu1 %v4821_v41  ;;  %v4416_v41 = vld [vmem:[%s5562_s1 + $0x1d8] sm:$0xff]  }
  0xde   : > { %2092 = vmatprep.mubr.bf16.mxu1 %v5087_v33 }
  0xdf   : > { %3867 = vmatpush3.bf16.msra.mxu0 %v4413_v8  ;;  %v1176_v8 = vrot.slane %v4994_v54, 1  ;;  %v4425_v54 = vld [vmem:[%s5562_s1 + $0x1f8] sm:$0xff]  }
  0xe0   : > { %3868 = vmatprep.subr.bf16.mxu0 %v4414_v22  ;;  %v4424_v22 = vld [vmem:[%s5562_s1 + $0x1b0] sm:$0xff]  }
  0xe1   : > { %v5205_v63 = vsel %vm1150_vm8, %v1175_v20, %v1176_v8 }
  0xe2   : > { %4021 = vmatmul.mubr.bf16.gmra.mrb[68].mxu0 %v5153_v53 }
  0xe3   : > { %3869 = vmatpush3.bf16.msra.mxu0 %v4415_v55  ;;  %4024 = vmatprep.mubr.bf16.mxu0 %v5162_v58 }
  0xe4   : > { %3870 = vmatprep.subr.bf16.mxu0 %v4416_v41  ;;  %v4433_v41 = vld [vmem:[%s5562_s1 + $0x230] sm:$0xff]  }
  0xe5   : > { %2093 = vmatmul.mubr.bf16.gmra.mrb[72].mxu1 %v4838_v25  ;;  %v4420_v25 = vld [vmem:[%s5562_s1 + $0x1a0] sm:$0xff]  }
  0xe6   : > { %2100 = vmatprep.mubr.bf16.mxu1 %v5097_v46 }
  0xe7   : > { %3871 = vmatpush3.bf16.msra.mxu0 %v4417_v60 }
  0xe8   : > { %3872 = vmatprep.subr.bf16.mxu0 %v4419_v28 }
  0xea   : > { %4025 = vmatmul.mubr.bf16.gmra.mrb[72].mxu0 %v5181_v19 }
  0xeb   : > { %3873 = vmatpush3.bf16.msra.mxu0 %v4420_v25  ;;  %4028 = vmatprep.mubr.bf16.mxu0 %v5190_v40 }
  0xec   : > { %3874 = vmatprep.subr.bf16.mxu0 %v4421_v38 }
  0xed   : > { %2101 = vmatmul.mubr.bf16.gmra.mrb[76].mxu1 %v4882_v17  ;;  %v4428_v17 = vld [vmem:[%s5562_s1 + $0x208] sm:$0xff]  }
  0xee   : > { %4064 = vmatprep.mubr.bf16.mxu1 %v1153_v51 }
  0xef   : > { %3875 = vmatpush3.bf16.msra.mxu0 %v4422_v56 }
  0xf0   : > { %3876 = vmatprep.subr.bf16.mxu0 %v4423_v16 }
  0xf2   : > { %4029 = vmatmul.mubr.bf16.gmra.mrb[76].mxu0 %v5205_v63 }
  0xf3   : > { %3877 = vmatpush3.bf16.msra.mxu0 %v4424_v22  ;;  %2521 = vmatprep.mubr.bf16.mxu0 %v4731_v6  ;;  %v4430_v6 = vld [vmem:[%s5562_s1 + $0x218] sm:$0xff]  }
  0xf4   : > { %3878 = vmatprep.subr.bf16.mxu0 %v4425_v54  ;;  %v4448_v22 = vld [vmem:[#allocation2 + $0x9c] sm:$0xff]  }
  0xf5   : > { %4065 = vmatmul.mubr.bf16.vlgmr.msra.gmra.mrb[80].mxu1 %v5113_v35  ;;  %v4447_v35 = vld [vmem:[#allocation2 + $0x24] sm:$0xff]  }
  0xf6   : > { %4097 = vmatpush3.bf16.msra.mxu1 %v5041_v9  ;;  %4068 = vmatprep.mubr.bf16.mxu1 %v5127_v48  ;;  %v4431_v9 = vld [vmem:[%s5562_s1 + $0x220] sm:$0xff]  }
  0xf7   : > { %4098 = vmatprep.subr.bf16.mxu1 %v4428_v17  ;;  %3879 = vmatpush3.bf16.msra.mxu0 %v4426_v45 }
  0xfa   : > { %4099 = vmatpush3.bf16.msra.mxu1 %v4428_v17  ;;  %2522 = vmatmul.mubr.bf16.vlgmr.msra.gmra.mrb[80].mxu0 %v5117_v37  ;;  %v4432_v37 = vld [vmem:[%s5562_s1 + $0x228] sm:$0xff]  }
  0xfb   : > { %4100 = vmatprep.subr.bf16.mxu1 %v4429_v4  ;;  %2529 = vmatprep.mubr.bf16.mxu0 %v4828_v50 }
  0xfd   : > { %4069 = vmatmul.mubr.bf16.gmra.mrb[84].mxu1 %v5136_v57 }
  0xfe   : > { %4072 = vmatprep.mubr.bf16.mxu1 %v5153_v53  ;;  %4101 = vmatpush3.bf16.msra.mxu1 %v4429_v4 }
  0xff   : > { %4102 = vmatprep.subr.bf16.mxu1 %v4430_v6 }
 0x102   : > { %4103 = vmatpush3.bf16.msra.mxu1 %v4430_v6  ;;  %2530 = vmatmul.mubr.bf16.gmra.mrb[84].mxu0 %v4447_v35 }
 0x103   : > { %4104 = vmatprep.subr.bf16.mxu1 %v4431_v9  ;;  %2537 = vmatprep.mubr.bf16.mxu0 %v4889_v36  ;;  %v4434_v36 = vld [vmem:[%s5562_s1 + $0x238] sm:$0xff]  }
 0x105   : > { %4073 = vmatmul.mubr.bf16.gmra.mrb[88].mxu1 %v5162_v58 }
 0x106   : > { %4076 = vmatprep.mubr.bf16.mxu1 %v5181_v19  ;;  %4105 = vmatpush3.bf16.msra.mxu1 %v4431_v9 }
 0x107   : > { %4106 = vmatprep.subr.bf16.mxu1 %v4432_v37 }
 0x10a   : > { %4107 = vmatpush3.bf16.msra.mxu1 %v4432_v37  ;;  %2538 = vmatmul.mubr.bf16.gmra.mrb[88].mxu0 %v4866_v52  ;;  %v5320_v37 = vld [vmem:[#allocation2 + $0xcc] sm:$0xff]  }
 0x10b   : > { %4108 = vmatprep.subr.bf16.mxu1 %v4433_v41  ;;  %2545 = vmatprep.mubr.bf16.mxu0 %v4956_v18 }
 0x10d   : > { %4077 = vmatmul.mubr.bf16.gmra.mrb[92].mxu1 %v5190_v40 }
 0x10e   : > { %4080 = vmatprep.mubr.bf16.mxu1 %v5205_v63  ;;  %4109 = vmatpush3.bf16.msra.mxu1 %v4433_v41  ;;  %v2282_v41 = vshll.u32 %v5320_v37, 16 }
 0x10f   : > { %4110 = vmatprep.subr.bf16.mxu1 %v4434_v36 }
 0x110   : > { %v3608_v50 = vpop.f32.mrb[0].mxu0 }
 0x111   : > { %v3609_v55 = vpop.f32.mrb[1].mxu0 }
 0x112   : > { %v5246_v60 = vadd.f32 %v3609_v55, %v3608_v50  ;;  %v3611_v26 = vpop.f32.mrb[2].mxu0  ;;  %4111 = vmatpush3.bf16.msra.mxu1 %v4434_v36  ;;  %2546 = vmatmul.mubr.bf16.gmra.mrb[92].mxu0 %v4922_v5  ;;  %v4449_v55 = vld [vmem:[#allocation2 + $0xa8] sm:$0xff]  }
 0x113   : > { %v3612_v43 = vpop.f32.mrb[3].mxu0  ;;  %2553 = vmatprep.mubr.bf16.mxu0 %v4989_v42 }
 0x114   : > { %v5248_v28 = vadd.f32 %v3612_v43, %v3611_v26 }
 0x115   : > { %4081 = vmatmul.mubr.bf16.gmra.mrb[0].mxu1 %v4674_v10 }
 0x116   : > { %4084 = vmatprep.mubr.bf16.mxu1 %v4689_v34 }
 0x11a   : > { %2554 = vmatmul.mubr.bf16.gmra.mrb[96].mxu0 %v4962_v39 }
 0x11b   : > { %2561 = vmatprep.mubr.bf16.mxu0 %v5003_v13 }
 0x11c   : > { %v3614_v21 = vpop.f32.mrb[4].mxu0 }
 0x11d   : > { %v3615_v29 = vpop.f32.mrb[5].mxu0  ;;  %4085 = vmatmul.mubr.bf16.gmra.mrb[4].mxu1 %v4751_v1 }
 0x11e   : > { %v5259_v52 = vadd.f32 %v3615_v29, %v3614_v21  ;;  %v3617_v61 = vpop.f32.mrb[6].mxu0  ;;  %4088 = vmatprep.mubr.bf16.mxu1 %v4782_v62 }
 0x11f   : > { %v3618_v11 = vpop.f32.mrb[7].mxu0 }
 0x120   : > { %v5263_v18 = vadd.f32 %v3618_v11, %v3617_v61 }
 0x122   : > { %2562 = vmatmul.mubr.bf16.gmra.mrb[100].mxu0 %v4977_v30 }
 0x123   : > { %2569 = vmatprep.mubr.bf16.mxu0 %v5017_v27 }
 0x125   : > { %4089 = vmatmul.mubr.bf16.gmra.mrb[8].mxu1 %v4835_v14 }
 0x126   : > { %4092 = vmatprep.mubr.bf16.mxu1 %v4855_v31 }
 0x12a   : > { %2570 = vmatmul.mubr.bf16.gmra.mrb[104].mxu0 %v4991_v59 }
 0x12b   : > { %2577 = vmatprep.mubr.bf16.mxu0 %v5031_v49 }
 0x12d   : > { %4093 = vmatmul.mubr.bf16.gmra.mrb[12].mxu1 %v4894_v47 }
 0x12e   : > { %v3620_v5 = vpop.f32.mrb[8].mxu0  ;;  %4112 = vmatprep.mubr.bf16.mxu1 %v5127_v48 }
 0x12f   : > { %v3621_v42 = vpop.f32.mrb[9].mxu0 }
 0x130   : > { %v5273_v25 = vadd.f32 %v3621_v42, %v3620_v5  ;;  %v3623_v38 = vpop.f32.mrb[10].mxu0 }
 0x131   : > { %v3624_v39 = vpop.f32.mrb[11].mxu0 }
 0x132   : > { %v5275_v51 = vadd.f32 %v3624_v39, %v3623_v38  ;;  %2578 = vmatmul.mubr.bf16.gmra.mrb[108].mxu0 %v5009_v23  ;;  %v2284_v38 = vrot.slane %v2282_v41, 1 }
 0x133   : > { %2585 = vmatprep.mubr.bf16.mxu0 %v5046_v24 }
 0x135   : > { %4113 = vmatmul.mubr.bf16.vlgmr.msra.gmra.mrb[80].mxu1 %v5136_v57 }
 0x136   : > { %4116 = vmatprep.mubr.bf16.mxu1 %v5153_v53 }
 0x13a   : > { %2586 = vmatmul.mubr.bf16.gmra.mrb[112].mxu0 %v5026_v44 }
 0x13b   : > { %2593 = vmatprep.mubr.bf16.mxu0 %v5055_v0 }
 0x13d   : > { %4117 = vmatmul.mubr.bf16.gmra.mrb[84].mxu1 %v5162_v58 }
 0x13e   : > { %v3626_v30 = vpop.f32.mrb[12].mxu0  ;;  %4120 = vmatprep.mubr.bf16.mxu1 %v5181_v19 }
 0x13f   : > { %v3627_v13 = vpop.f32.mrb[13].mxu0 }
 0x140   : > { %v5286_v27 = vadd.f32 %v3627_v13, %v3626_v30  ;;  %v3629_v59 = vpop.f32.mrb[14].mxu0  ;;  %v4450_v13 = vld [vmem:[#allocation2 + $0xb4] sm:$0xff]  }
 0x141   : > { %v3630_v49 = vpop.f32.mrb[15].mxu0 }
 0x142   : > { %v5290_v48 = vadd.f32 %v3630_v49, %v3629_v59  ;;  %2594 = vmatmul.mubr.bf16.gmra.mrb[116].mxu0 %v5069_v3 }
 0x143   : > { %2601 = vmatprep.mubr.bf16.mxu0 %v5065_v32 }
 0x145   : > { %4121 = vmatmul.mubr.bf16.gmra.mrb[88].mxu1 %v5190_v40 }
 0x146   : > { %4124 = vmatprep.mubr.bf16.mxu1 %v5205_v63 }
 0x148   : > { %v3744_v23 = vpop.f32.mrb[16].mxu1 }
 0x149   : > { %v3745_v44 = vpop.f32.mrb[17].mxu1 }
 0x14a   : > { %v5297_v24 = vadd.f32 %v3745_v44, %v3744_v23  ;;  %v3747_v0 = vpop.f32.mrb[18].mxu1  ;;  %2602 = vmatmul.mubr.bf16.gmra.mrb[120].mxu0 %v5120_v7  ;;  %v2292_v44 = vrot.slane %v5320_v37, 1 }
 0x14b   : > { %v3748_v57 = vpop.f32.mrb[19].mxu1  ;;  %2609 = vmatprep.mubr.bf16.mxu0 %v5077_v2 }
 0x14c   : > { %v5300_v53 = vadd.f32 %v3748_v57, %v3747_v0  ;;  %v3632_v58 = vpop.f32.mrb[16].mxu0 }
 0x14d   : > { %v3633_v3 = vpop.f32.mrb[17].mxu0  ;;  %4125 = vmatmul.mubr.bf16.gmra.mrb[92].mxu1 %v4674_v10 }
 0x14e   : > { %v5304_v32 = vadd.f32 %v3633_v3, %v3632_v58  ;;  %v3635_v19 = vpop.f32.mrb[18].mxu0  ;;  %4128 = vmatprep.mubr.bf16.mxu1 %v4689_v34 }
 0x14f   : > { %v3636_v40 = vpop.f32.mrb[19].mxu0 }
 0x150   : > { %v3750_v56 = vpop.f32.mrb[20].mxu1  ;;  %v5307_v20 = vadd.f32 %v3636_v40, %v3635_v19 }
 0x151   : > { %v3751_v8 = vpop.f32.mrb[21].mxu1 }
 0x152   : > { %v5309_v16 = vadd.f32 %v3751_v8, %v3750_v56  ;;  %v3753_v7 = vpop.f32.mrb[22].mxu1  ;;  %2610 = vmatmul.mubr.bf16.gmra.mrb[124].mxu0 %v4448_v22  ;;  %v4451_v22 = vld [vmem:[#allocation2 + $0xc0] sm:$0xff]  }
 0x153   : > { %v3754_v63 = vpop.f32.mrb[23].mxu1  ;;  %2617 = vmatprep.mubr.bf16.mxu0 %v5087_v33 }
 0x154   : > { %v5311_v2 = vadd.f32 %v3754_v63, %v3753_v7 }
 0x155   : > { %4129 = vmatmul.mubr.bf16.gmra.mrb[0].mxu1 %v4751_v1  ;;  %v3638_v10 = vpop.f32.mrb[20].mxu0 }
 0x156   : > { %4132 = vmatprep.mubr.bf16.mxu1 %v4782_v62  ;;  %v3639_v34 = vpop.f32.mrb[21].mxu0  ;;  %v4436_v62 = vld [vmem:[#allocation2 + $0xd4] ss:$0 sps:$4 sm:$0x11]  }
 0x157   : > { %v5316_v17 = vadd.f32 %v3639_v34, %v3638_v10  ;;  %v3641_v45 = vpop.f32.mrb[22].mxu0  ;;  %v2293_v0 = vrot.slane %v4436_v62, 1 }
 0x158   : > { %v3756_v54 = vpop.f32.mrb[24].mxu1  ;;  %v3642_v6 = vpop.f32.mrb[23].mxu0 }
 0x159   : > { %v3757_v4 = vpop.f32.mrb[25].mxu1  ;;  %v5322_v50 = vadd.f32 %v3642_v6, %v3641_v45 }
 0x15a   : > { %v5318_v9 = vadd.f32 %v3757_v4, %v3756_v54  ;;  %v3759_v35 = vpop.f32.mrb[26].mxu1  ;;  %2618 = vmatmul.mubr.bf16.gmra.mrb[128].mxu0 %v4449_v55 }
 0x15b   : > { %v3760_v33 = vpop.f32.mrb[27].mxu1  ;;  %2625 = vmatprep.mubr.bf16.mxu0 %v5097_v46  ;;  %v2280_v46 = vshrl.u32 %v5320_v37, 16 }
 0x15c   : > { %v5324_v1 = vadd.f32 %v3760_v33, %v3759_v35 }
 0x15d   : > { %4133 = vmatmul.mubr.bf16.gmra.mrb[4].mxu1 %v4835_v14  ;;  %v3644_v26 = vpop.f32.mrb[24].mxu0  ;;  %v2287_v14 = vshll.u32 %v4436_v62, 16  ;;  %v2285_v59 = vor.u32 %v2284_v38, %v2280_v46 }
 0x15e   : > { %4136 = vmatprep.mubr.bf16.mxu1 %v4855_v31  ;;  %v3645_v43 = vpop.f32.mrb[25].mxu0 }
 0x15f   : > { %v5330_v21 = vadd.f32 %v3645_v43, %v3644_v26  ;;  %v3647_v29 = vpop.f32.mrb[26].mxu0  ;;  %v2289_v49 = vrot.slane %v2287_v14, 1 }
 0x160   : > { %v3762_v36 = vpop.f32.mrb[28].mxu1  ;;  %v3648_v11 = vpop.f32.mrb[27].mxu0 }
 0x161   : > { %v3763_v61 = vpop.f32.mrb[29].mxu1  ;;  %v5335_v39 = vadd.f32 %v3648_v11, %v3647_v29 }
 0x162   : > { %v5332_v5 = vadd.f32 %v3763_v61, %v3762_v36  ;;  %v3765_v42 = vpop.f32.mrb[30].mxu1  ;;  %2626 = vmatmul.mubr.bf16.gmra.mrb[132].mxu0 %v4450_v13 }
 0x163   : > { %v3766_v30 = vpop.f32.mrb[31].mxu1  ;;  %2633 = vmatprep.mubr.bf16.mxu0 %v5106_v12 }
 0x164   : > { %v5337_v31 = vadd.f32 %v3766_v30, %v3765_v42 }
 0x165   : > { %4137 = vmatmul.mubr.bf16.gmra.mrb[8].mxu1 %v4894_v47  ;;  %v3650_v23 = vpop.f32.mrb[28].mxu0  ;;  %v2290_v47 = vsel %vm941_vm9, %v2285_v59, %v2289_v49 }
 0x166   : > { %4140 = vmatprep.mubr.bf16.mxu1 %v4916_v15  ;;  %v3651_v57 = vpop.f32.mrb[29].mxu0  ;;  %v2294_v15 = vsel %vm1150_vm8, %v2292_v44, %v2293_v0 }
 0x167   : > { %v5343_v3 = vadd.f32 %v3651_v57, %v3650_v23  ;;  %v3653_v19 = vpop.f32.mrb[30].mxu0 }
 0x168   : > { %v3768_v58 = vpop.f32.mrb[32].mxu1  ;;  %v3654_v56 = vpop.f32.mrb[31].mxu0 }
 0x169   : > { %v3769_v40 = vpop.f32.mrb[33].mxu1  ;;  %v5348_v7 = vadd.f32 %v3654_v56, %v3653_v19 }
 0x16a   : > { %v5345_v8 = vadd.f32 %v3769_v40, %v3768_v58  ;;  %v3771_v12 = vpop.f32.mrb[34].mxu1  ;;  %2634 = vmatmul.mubr.bf16.gmra.mrb[136].mxu0 %v4451_v22 }
 0x16b   : > { %v3772_v63 = vpop.f32.mrb[35].mxu1  ;;  %2641 = vmatprep.mubr.bf16.mxu0 %v2290_v47 }
 0x16c   : > { %v5351_v10 = vadd.f32 %v3772_v63, %v3771_v12 }
 0x16d   : > { %4141 = vmatmul.mubr.bf16.gmra.mrb[12].mxu1 %v2294_v15  ;;  %v3656_v34 = vpop.f32.mrb[32].mxu0 }
 0x16e   : > { %v3657_v54 = vpop.f32.mrb[33].mxu0 }
 0x16f   : > { %v3658_v4 = vadd.f32 %v3657_v54, %v3656_v34  ;;  %v3659_v6 = vpop.f32.mrb[34].mxu0 }
 0x170   : > { %v3774_v45 = vpop.f32.mrb[36].mxu1  ;;  %v3660_v33 = vpop.f32.mrb[35].mxu0 }
 0x171   : > { %v3775_v35 = vpop.f32.mrb[37].mxu1  ;;  %v3661_v41 = vadd.f32 %v3660_v33, %v3659_v6 }
 0x172   : > { %v5353_v55 = vadd.f32 %v3775_v35, %v3774_v45  ;;  %v3777_v62 = vpop.f32.mrb[38].mxu1  ;;  %2642 = vmatmul.mubr.bf16.gmra.mrb[140].mxu0 %v5320_v37 }
 0x173   : > { %v3778_v26 = vpop.f32.mrb[39].mxu1 }
 0x174   : > { %v5356_v43 = vadd.f32 %v3778_v26, %v3777_v62 }
 0x175   : > { %v3662_v36 = vpop.f32.mrb[36].mxu0 }
 0x176   : > { %v3663_v29 = vpop.f32.mrb[37].mxu0 }
 0x177   : > { %v3664_v11 = vadd.f32 %v3663_v29, %v3662_v36  ;;  %v3665_v42 = vpop.f32.mrb[38].mxu0 }
 0x178   : > { %v3780_v61 = vpop.f32.mrb[40].mxu1  ;;  %v3666_v38 = vpop.f32.mrb[39].mxu0 }
 0x179   : > { %v3781_v46 = vpop.f32.mrb[41].mxu1  ;;  %v3667_v13 = vadd.f32 %v3666_v38, %v3665_v42 }
 0x17a   : > { %v5358_v14 = vadd.f32 %v3781_v46, %v3780_v61  ;;  %v3783_v30 = vpop.f32.mrb[42].mxu1 }
 0x17b   : > { %v3784_v59 = vpop.f32.mrb[43].mxu1 }
 0x17c   : > { %v5360_v49 = vadd.f32 %v3784_v59, %v3783_v30 }
 0x17d   : > { %v3668_v23 = vpop.f32.mrb[40].mxu0 }
 0x17e   : > { %v3669_v44 = vpop.f32.mrb[41].mxu0 }
 0x17f   : > { %v3670_v37 = vadd.f32 %v3669_v44, %v3668_v23  ;;  %v3671_v57 = vpop.f32.mrb[42].mxu0 }
 0x180   : > { %v3786_v0 = vpop.f32.mrb[44].mxu1  ;;  %v3672_v19 = vpop.f32.mrb[43].mxu0 }
 0x181   : > { %v3787_v58 = vpop.f32.mrb[45].mxu1  ;;  %v3673_v12 = vadd.f32 %v3672_v19, %v3671_v57 }
 0x182   : > { %v5362_v40 = vadd.f32 %v3787_v58, %v3786_v0  ;;  %v3789_v56 = vpop.f32.mrb[46].mxu1 }
 0x183   : > { %v3790_v47 = vpop.f32.mrb[47].mxu1 }
 0x184   : > { %v5364_v63 = vadd.f32 %v3790_v47, %v3789_v56 }
 0x185   : > { %v3674_v15 = vpop.f32.mrb[44].mxu0 }
 0x186   : > { %v3675_v22 = vpop.f32.mrb[45].mxu0 }
 0x187   : > { %v3676_v54 = vadd.f32 %v3675_v22, %v3674_v15  ;;  %v3677_v45 = vpop.f32.mrb[46].mxu0 }
 0x188   : > { %v3792_v34 = vpop.f32.mrb[48].mxu1  ;;  %v3678_v35 = vpop.f32.mrb[47].mxu0 }
 0x189   : > { %v3793_v6 = vpop.f32.mrb[49].mxu1  ;;  %v3679_v26 = vadd.f32 %v3678_v35, %v3677_v45 }
 0x18a   : > { %v3794_v33 = vadd.f32 %v3793_v6, %v3792_v34  ;;  %v3795_v62 = vpop.f32.mrb[50].mxu1 }
 0x18b   : > { %v3796_v36 = vpop.f32.mrb[51].mxu1 }
 0x18c   : > { %v5366_v29 = vadd.f32 %v3794_v33, %v3658_v4  ;;  %v3797_v61 = vadd.f32 %v3796_v36, %v3795_v62 }
 0x18d   : > { %v3680_v46 = vpop.f32.mrb[48].mxu0 }
 0x18e   : > { %v5368_v42 = vadd.f32 %v3797_v61, %v3661_v41  ;;  %v3681_v38 = vpop.f32.mrb[49].mxu0 }
 0x18f   : > { %v3682_v59 = vadd.f32 %v3681_v38, %v3680_v46  ;;  %v3683_v23 = vpop.f32.mrb[50].mxu0 }
 0x190   : > { %v3798_v30 = vpop.f32.mrb[52].mxu1  ;;  %v3684_v0 = vpop.f32.mrb[51].mxu0 }
 0x191   : > { %v3799_v44 = vpop.f32.mrb[53].mxu1  ;;  %v3685_v19 = vadd.f32 %v3684_v0, %v3683_v23 }
 0x192   : > { %v3800_v57 = vadd.f32 %v3799_v44, %v3798_v30  ;;  %v3801_v58 = vpop.f32.mrb[54].mxu1 }
 0x193   : > { %v3802_v56 = vpop.f32.mrb[55].mxu1 }
 0x194   : > { %v5370_v47 = vadd.f32 %v3800_v57, %v3664_v11  ;;  %v3803_v15 = vadd.f32 %v3802_v56, %v3801_v58 }
 0x195   : > { %v3686_v4 = vpop.f32.mrb[52].mxu0 }
 0x196   : > { %v5372_v22 = vadd.f32 %v3803_v15, %v3667_v13  ;;  %v3687_v34 = vpop.f32.mrb[53].mxu0 }
 0x197   : > { %v3688_v45 = vadd.f32 %v3687_v34, %v3686_v4  ;;  %v3689_v6 = vpop.f32.mrb[54].mxu0 }
 0x198   : > { %5572 = vst [vmem:[#allocation3_spill] sm:$0xff] %v5372_v22  ;;  %v3804_v41 = vpop.f32.mrb[56].mxu1  ;;  %v3690_v33 = vpop.f32.mrb[55].mxu0 }
 0x199   : > { %v3805_v35 = vpop.f32.mrb[57].mxu1  ;;  %v3691_v61 = vadd.f32 %v3690_v33, %v3689_v6 }
 0x19a   : > { %v3806_v62 = vadd.f32 %v3805_v35, %v3804_v41  ;;  %v3807_v36 = vpop.f32.mrb[58].mxu1 }
 0x19b   : > { %v3808_v46 = vpop.f32.mrb[59].mxu1 }
 0x19c   : > { %v5374_v38 = vadd.f32 %v3806_v62, %v3670_v37  ;;  %v3809_v30 = vadd.f32 %v3808_v46, %v3807_v36 }
 0x19d   : > { %v3692_v11 = vpop.f32.mrb[56].mxu0 }
 0x19e   : > { %v5376_v23 = vadd.f32 %v3809_v30, %v3673_v12  ;;  %v3693_v44 = vpop.f32.mrb[57].mxu0 }
 0x19f   : > { %v3694_v0 = vadd.f32 %v3693_v44, %v3692_v11  ;;  %v3695_v57 = vpop.f32.mrb[58].mxu0 }
 0x1a0   : > { %5573 = vst [vmem:[#allocation4_spill] sm:$0xff] %v5376_v23  ;;  %v3810_v13 = vpop.f32.mrb[60].mxu1  ;;  %v3696_v56 = vpop.f32.mrb[59].mxu0 }
 0x1a1   : > { %v3811_v58 = vpop.f32.mrb[61].mxu1  ;;  %v3697_v34 = vadd.f32 %v3696_v56, %v3695_v57 }
 0x1a2   : > { %v3812_v15 = vadd.f32 %v3811_v58, %v3810_v13  ;;  %v3813_v4 = vpop.f32.mrb[62].mxu1 }
 0x1a3   : > { %v3814_v22 = vpop.f32.mrb[63].mxu1 }
 0x1a4   : > { %v5378_v41 = vadd.f32 %v3812_v15, %v3676_v54  ;;  %v3815_v6 = vadd.f32 %v3814_v22, %v3813_v4 }
 0x1a5   : > { %v3698_v37 = vpop.f32.mrb[60].mxu0 }
 0x1a6   : > { %v5380_v35 = vadd.f32 %v3815_v6, %v3679_v26  ;;  %v3699_v33 = vpop.f32.mrb[61].mxu0 }
 0x1a7   : > { %v5382_v62 = vadd.f32 %v3699_v33, %v3698_v37  ;;  %v3701_v36 = vpop.f32.mrb[62].mxu0 }
 0x1a8   : > { %v3816_v12 = vpop.f32.mrb[64].mxu1  ;;  %v3702_v30 = vpop.f32.mrb[63].mxu0 }
 0x1a9   : > { %v3817_v46 = vpop.f32.mrb[65].mxu1  ;;  %v5384_v23 = vadd.f32 %v3702_v30, %v3701_v36 }
 0x1aa   : > { %v3818_v11 = vadd.f32 %v3817_v46, %v3816_v12  ;;  %v3819_v44 = vpop.f32.mrb[66].mxu1 }
 0x1ab   : > { %v3820_v13 = vpop.f32.mrb[67].mxu1 }
 0x1ac   : > { %v5386_v57 = vadd.f32 %v3818_v11, %v3682_v59  ;;  %v3821_v54 = vadd.f32 %v3820_v13, %v3819_v44 }
 0x1ad   : > { %v4018_v26 = vpop.f32.mrb[64].mxu0 }
 0x1ae   : > { %v5388_v58 = vadd.f32 %v3821_v54, %v3685_v19  ;;  %v1686_v22 = vadd.f32 %v4018_v26, %v5259_v52  ;;  %v1677_v56 = vpop.f32.mrb[65].mxu0 }
 0x1af   : > { %v1678_v15 = vadd.f32 %v5246_v60, %v1677_v56  ;;  %v4019_v4 = vpop.f32.mrb[66].mxu0 }
 0x1b0   : > { %v3822_v6 = vpop.f32.mrb[68].mxu1  ;;  %v5393_v37 = vadd.f32 %v5309_v16, %v1686_v22  ;;  %v1689_v33 = vadd.f32 %v4019_v4, %v5263_v18  ;;  %v1680_v12 = vpop.f32.mrb[67].mxu0 }
 0x1b1   : > { %v3823_v36 = vpop.f32.mrb[69].mxu1  ;;  %v5397_v59 = vadd.f32 %v5297_v24, %v1678_v15  ;;  %v1681_v19 = vadd.f32 %v5248_v28, %v1680_v12 }
 0x1b2   : > { %v3824_v46 = vadd.f32 %v3823_v36, %v3822_v6  ;;  %v3825_v30 = vpop.f32.mrb[70].mxu1  ;;  %v5401_v52 = vadd.f32 %v5311_v2, %v1689_v33 }
 0x1b3   : > { %v3826_v60 = vpop.f32.mrb[71].mxu1  ;;  %v5404_v11 = vadd.f32 %v5300_v53, %v1681_v19 }
 0x1b4   : > { %v5406_v16 = vadd.f32 %v3824_v46, %v3688_v45  ;;  %v3827_v44 = vadd.f32 %v3826_v60, %v3825_v30 }
 0x1b5   : > { %v4022_v18 = vpop.f32.mrb[68].mxu0 }
 0x1b6   : > { %v5408_v13 = vadd.f32 %v3827_v44, %v3691_v61  ;;  %v1702_v24 = vadd.f32 %v4022_v18, %v5286_v27  ;;  %v1693_v54 = vpop.f32.mrb[69].mxu0 }
 0x1b7   : > { %v1694_v28 = vadd.f32 %v5273_v25, %v1693_v54  ;;  %v4023_v26 = vpop.f32.mrb[70].mxu0 }
 0x1b8   : > { %v3828_v22 = vpop.f32.mrb[72].mxu1  ;;  %v5413_v2 = vadd.f32 %v5332_v5, %v1702_v24  ;;  %v1705_v56 = vadd.f32 %v4023_v26, %v5290_v48  ;;  %v1696_v53 = vpop.f32.mrb[71].mxu0 }
 0x1b9   : > { %v3829_v15 = vpop.f32.mrb[73].mxu1  ;;  %v5417_v45 = vadd.f32 %v5318_v9, %v1694_v28  ;;  %v1697_v61 = vadd.f32 %v5275_v51, %v1696_v53 }
 0x1ba   : > { %v3830_v4 = vadd.f32 %v3829_v15, %v3828_v22  ;;  %v3831_v6 = vpop.f32.mrb[74].mxu1  ;;  %v5421_v27 = vadd.f32 %v5337_v31, %v1705_v56 }
 0x1bb   : > { %v3832_v25 = vpop.f32.mrb[75].mxu1  ;;  %v2002_v33 = vadd.f32 %v5324_v1, %v1697_v61 }
 0x1bc   : > { %v5424_v12 = vadd.f32 %v3830_v4, %v3694_v0  ;;  %v3833_v5 = vadd.f32 %v3832_v25, %v3831_v6 }
 0x1bd   : > { %v4026_v36 = vpop.f32.mrb[72].mxu0 }
 0x1be   : > { %v5426_v48 = vadd.f32 %v3833_v5, %v3697_v34  ;;  %v1718_v19 = vadd.f32 %v4026_v36, %v5316_v17  ;;  %v1709_v9 = vpop.f32.mrb[73].mxu0 }
 0x1bf   : > { %v1710_v46 = vadd.f32 %v5304_v32, %v1709_v9  ;;  %v4027_v51 = vpop.f32.mrb[74].mxu0 }
 0x1c0   : > { %v3834_v30 = vpop.f32.mrb[76].mxu1  ;;  %v5431_v60 = vadd.f32 %v5353_v55, %v1718_v19  ;;  %v1721_v31 = vadd.f32 %v4027_v51, %v5322_v50  ;;  %v1712_v44 = vpop.f32.mrb[75].mxu0 }
 0x1c1   : > { %v3835_v1 = vpop.f32.mrb[77].mxu1  ;;  %v2015_v0 = vadd.f32 %v5345_v8, %v1710_v46  ;;  %v1713_v18 = vadd.f32 %v5307_v20, %v1712_v44 }
 0x1c2   : > { %v3836_v34 = vadd.f32 %v3835_v1, %v3834_v30  ;;  %v3837_v24 = vpop.f32.mrb[78].mxu1  ;;  %v5437_v17 = vadd.f32 %v5356_v43, %v1721_v31 }
 0x1c3   : > { %v3838_v54 = vpop.f32.mrb[79].mxu1  ;;  %v2018_v32 = vadd.f32 %v5351_v10, %v1713_v18 }
 0x1c4   : > { %v5441_v28 = vadd.f32 %v3836_v34, %v5382_v62  ;;  %v3839_v55 = vadd.f32 %v3838_v54, %v3837_v24 }
 0x1c5   : > { %v4030_v26 = vpop.f32.mrb[76].mxu0 }
 0x1c6   : > { %v5444_v50 = vadd.f32 %v3839_v55, %v5384_v23  ;;  %v1734_v8 = vadd.f32 %v4030_v26, %v5343_v3  ;;  %v1725_v22 = vpop.f32.mrb[77].mxu0 }
 0x1c7   : > { %v1726_v20 = vadd.f32 %v5330_v21, %v1725_v22  ;;  %v4031_v56 = vpop.f32.mrb[78].mxu0 }
 0x1c8   : > { %v5449_v43 = vadd.f32 %v5362_v40, %v1734_v8  ;;  %v1737_v53 = vadd.f32 %v4031_v56, %v5348_v7  ;;  %v1728_v10 = vpop.f32.mrb[79].mxu0 }
 0x1c9   : > { %v2031_v62 = vadd.f32 %v5358_v14, %v1726_v20  ;;  %v1729_v15 = vadd.f32 %v5335_v39, %v1728_v10 }
 0x1ca   : > { %v5455_v61 = vadd.f32 %v5364_v63, %v1737_v53 }
 0x1cb   : > { %v2034_v23 = vadd.f32 %v5360_v49, %v1729_v15 }
 0x1cd   : > { %v3880_v3 = vpop.f32.mrb[80].mxu0 }
 0x1ce   : > { %v3881_v4 = vpop.f32.mrb[81].mxu0 }
 0x1cf   : > { %v3882_v6 = vadd.f32 %v3881_v4, %v3880_v3  ;;  %v3883_v21 = vpop.f32.mrb[82].mxu0 }
 0x1d0   : > { %v3884_v25 = vpop.f32.mrb[83].mxu0 }
 0x1d1   : > { %v3885_v5 = vadd.f32 %v3884_v25, %v3883_v21  ;;  %v4166_v40 = vadd.f32 %v3882_v6, %v5397_v59 }
 0x1d3   : > { %v5460_v7 = vadd.f32 %v3885_v5, %v5404_v11 }
 0x1d5   : > { %v3886_v36 = vpop.f32.mrb[84].mxu0 }
 0x1d6   : > { %v3887_v14 = vpop.f32.mrb[85].mxu0 }
 0x1d7   : > { %v3888_v19 = vadd.f32 %v3887_v14, %v3886_v36  ;;  %v3889_v39 = vpop.f32.mrb[86].mxu0 }
 0x1d8   : > { %v3890_v9 = vpop.f32.mrb[87].mxu0 }
 0x1d9   : > { %v3891_v63 = vadd.f32 %v3890_v9, %v3889_v39  ;;  %v4162_v46 = vadd.f32 %v3888_v19, %v5393_v37 }
 0x1db   : > { %v4170_v49 = vadd.f32 %v3891_v63, %v5401_v52 }
 0x1dd   : > { %v3892_v51 = vpop.f32.mrb[88].mxu0 }
 0x1de   : > { %v3893_v30 = vpop.f32.mrb[89].mxu0 }
 0x1df   : > { %v3894_v31 = vadd.f32 %v3893_v30, %v3892_v51  ;;  %v3895_v44 = vpop.f32.mrb[90].mxu0 }
 0x1e0   : > { %v3896_v1 = vpop.f32.mrb[91].mxu0 }
 0x1e1   : > { %v3897_v18 = vadd.f32 %v3896_v1, %v3895_v44  ;;  %v5465_v59 = vadd.f32 %v3894_v31, %v5417_v45 }
 0x1e3   : > { %v5467_v11 = vadd.f32 %v3897_v18, %v2002_v33 }
 0x1e5   : > { %v3898_v34 = vpop.f32.mrb[92].mxu0 }
 0x1e6   : > { %v3899_v24 = vpop.f32.mrb[93].mxu0 }
 0x1e7   : > { %v3900_v54 = vadd.f32 %v3899_v24, %v3898_v34  ;;  %v3901_v55 = vpop.f32.mrb[94].mxu0 }
 0x1e8   : > { %v3902_v26 = vpop.f32.mrb[95].mxu0 }
 0x1e9   : > { %v3903_v8 = vadd.f32 %v3902_v26, %v3901_v55  ;;  %v4178_v37 = vadd.f32 %v3900_v54, %v5413_v2 }
 0x1eb   : > { %v5471_v52 = vadd.f32 %v3903_v8, %v5421_v27 }
 0x1ed   : > { %v3904_v22 = vpop.f32.mrb[96].mxu0 }
 0x1ee   : > { %v3905_v20 = vpop.f32.mrb[97].mxu0 }
 0x1ef   : > { %v3906_v56 = vadd.f32 %v3905_v20, %v3904_v22  ;;  %v3907_v53 = vpop.f32.mrb[98].mxu0 }
 0x1f0   : > { %v3908_v10 = vpop.f32.mrb[99].mxu0 }
 0x1f1   : > { %v3909_v45 = vadd.f32 %v3908_v10, %v3907_v53  ;;  %v5473_v15 = vadd.f32 %v3906_v56, %v2015_v0 }
 0x1f3   : > { %v5475_v33 = vadd.f32 %v3909_v45, %v2018_v32 }
 0x1f5   : > { %v3910_v3 = vpop.f32.mrb[100].mxu0 }
 0x1f6   : > { %v3911_v4 = vpop.f32.mrb[101].mxu0 }
 0x1f7   : > { %v3912_v6 = vadd.f32 %v3911_v4, %v3910_v3  ;;  %v3913_v21 = vpop.f32.mrb[102].mxu0 }
 0x1f8   : > { %v3914_v25 = vpop.f32.mrb[103].mxu0 }
 0x1f9   : > { %v3915_v5 = vadd.f32 %v3914_v25, %v3913_v21  ;;  %v5478_v2 = vadd.f32 %v3912_v6, %v5431_v60 }
 0x1fb   : > { %v5481_v27 = vadd.f32 %v3915_v5, %v5437_v17 }
 0x1fd   : > { %v3916_v36 = vpop.f32.mrb[104].mxu0 }
 0x1fe   : > { %v3917_v14 = vpop.f32.mrb[105].mxu0 }
 0x1ff   : > { %v3918_v19 = vadd.f32 %v3917_v14, %v3916_v36  ;;  %v3919_v39 = vpop.f32.mrb[106].mxu0 }
 0x200   : > { %v3920_v0 = vpop.f32.mrb[107].mxu0 }
 0x201   : > { %v3921_v9 = vadd.f32 %v3920_v0, %v3919_v39  ;;  %v5483_v32 = vadd.f32 %v3918_v19, %v2031_v62 }
 0x203   : > { %v5485_v63 = vadd.f32 %v3921_v9, %v2034_v23 }
 0x205   : > { %v3922_v51 = vpop.f32.mrb[108].mxu0 }
 0x206   : > { %v3923_v30 = vpop.f32.mrb[109].mxu0 }
 0x207   : > { %v3924_v31 = vadd.f32 %v3923_v30, %v3922_v51  ;;  %v3925_v44 = vpop.f32.mrb[110].mxu0 }
 0x208   : > { %v4114_v60 = vpop.f32.mrb[80].mxu1  ;;  %v3926_v1 = vpop.f32.mrb[111].mxu0 }
 0x209   : > { %v4163_v18 = vadd.f32 %v4162_v46, %v4114_v60  ;;  %v2684_v17 = vpop.f32.mrb[81].mxu1  ;;  %v3927_v34 = vadd.f32 %v3926_v1, %v3925_v44  ;;  %v5488_v55 = vadd.f32 %v3924_v31, %v5449_v43 }
 0x20a   : > { %v4167_v24 = vadd.f32 %v4166_v40, %v2684_v17  ;;  %v4115_v54 = vpop.f32.mrb[82].mxu1 }
 0x20b   : > { %v4171_v26 = vadd.f32 %v4170_v49, %v4115_v54  ;;  %v2687_v62 = vpop.f32.mrb[83].mxu1  ;;  %v5499_v46 = vadd.f32 %v3927_v34, %v5455_v61  ;;  %v3043_v53 = vmul.f32 %v4163_v18, %v4163_v18 }
 0x20c   : > { %v4175_v23 = vadd.f32 %v5460_v7, %v2687_v62  ;;  %v3041_v22 = vmul.f32 %v4167_v24, %v4167_v24 }
 0x20d   : > { %v3505_v40 = vpack.c.bf16 %v4171_v26, %v4163_v18  ;;  %v3928_v8 = vpop.f32.mrb[112].mxu0  ;;  %v3044_v21 = vmul.f32 %v4171_v26, %v4171_v26 }
 0x20e   : > { %v3500_v43 = vpack.c.bf16 %v4175_v23, %v4167_v24  ;;  %v3003_v20 = vadd.f32 %v4175_v23, %v4167_v24  ;;  %v3042_v49 = vmul.f32 %v4175_v23, %v4175_v23  ;;  %v3929_v56 = vpop.f32.mrb[113].mxu0 }
 0x20f   : > { %3577 = vst [vmem:[%s5495_s29 + $0x8] sm:$0xff] %v3505_v40   ;;  %v3930_v10 = vadd.f32 %v3929_v56, %v3928_v8  ;;  %v3931_v45 = vpop.f32.mrb[114].mxu0 }
 0x210   : > { %3501 = vst [vmem:[%s5495_s29] sm:$0xff] %v3500_v43   ;;  %v3004_v3 = vadd.f32 %v4163_v18, %v3003_v20  ;;  %v3073_v4 = vadd.f32 %v3042_v49, %v3041_v22  ;;  %v4118_v6 = vpop.f32.mrb[84].mxu1  ;;  %v3932_v7 = vpop.f32.mrb[115].mxu0 }
 0x211   : > { %v4179_v25 = vadd.f32 %v4178_v37, %v4118_v6  ;;  %v2700_v61 = vpop.f32.mrb[85].mxu1  ;;  %v3933_v5 = vadd.f32 %v3932_v7, %v3931_v45  ;;  %v5506_v51 = vadd.f32 %v5366_v29, %v3930_v10 }
 0x212   : > { %v3074_v36 = vadd.f32 %v3073_v4, %v3043_v53  ;;  %v4183_v14 = vadd.f32 %v5465_v59, %v2700_v61  ;;  %v3005_v19 = vadd.f32 %v4171_v26, %v3004_v3  ;;  %v4119_v39 = vpop.f32.mrb[86].mxu1 }
 0x213   : > { %v4187_v0 = vadd.f32 %v5471_v52, %v4119_v39  ;;  %v2703_v9 = vpop.f32.mrb[87].mxu1  ;;  %v5510_v1 = vadd.f32 %v5368_v42, %v3933_v5  ;;  %v3047_v54 = vmul.f32 %v4179_v25, %v4179_v25 }
 0x214   : > { %v3006_v30 = vadd.f32 %v4183_v14, %v3005_v19  ;;  %v3045_v31 = vmul.f32 %v4183_v14, %v4183_v14  ;;  %v3075_v44 = vadd.f32 %v3074_v36, %v3044_v21  ;;  %v4191_v37 = vadd.f32 %v5467_v11, %v2703_v9 }
 0x215   : > { %v3515_v60 = vpack.c.bf16 %v4187_v0, %v4179_v25  ;;  %v3934_v59 = vpop.f32.mrb[116].mxu0  ;;  %v3048_v8 = vmul.f32 %v4187_v0, %v4187_v0 }
 0x216   : > { %v3076_v18 = vadd.f32 %v3075_v44, %v3045_v31  ;;  %v3510_v17 = vpack.c.bf16 %v4191_v37, %v4183_v14  ;;  %v3007_v34 = vadd.f32 %v4191_v37, %v3006_v30  ;;  %v3046_v24 = vmul.f32 %v4191_v37, %v4191_v37  ;;  %v3935_v52 = vpop.f32.mrb[117].mxu0 }
 0x217   : > { %3579 = vst [vmem:[%s5495_s29 + $0x18] sm:$0xff] %v3515_v60   ;;  %v3936_v29 = vadd.f32 %v3935_v52, %v3934_v59  ;;  %v3937_v26 = vpop.f32.mrb[118].mxu0 }
 0x218   : > { %3578 = vst [vmem:[%s5495_s29 + $0x10] sm:$0xff] %v3510_v17   ;;  %v3008_v62 = vadd.f32 %v4179_v25, %v3007_v34  ;;  %v3077_v23 = vadd.f32 %v3076_v18, %v3046_v24  ;;  %v4122_v40 = vpop.f32.mrb[88].mxu1  ;;  %v3938_v11 = vpop.f32.mrb[119].mxu0  ;;  %v5574_v25 = vld [vmem:[#allocation3_spill] sm:$0xff] }
 0x219   : > { %v4195_v22 = vadd.f32 %v5478_v2, %v4122_v40  ;;  %v2716_v42 = vpop.f32.mrb[89].mxu1  ;;  %v3939_v43 = vadd.f32 %v3938_v11, %v3937_v26  ;;  %v4225_v3 = vadd.f32 %v5370_v47, %v3936_v29 }
 0x21a   : > { %v3078_v20 = vadd.f32 %v3077_v23, %v3047_v54  ;;  %v4199_v49 = vadd.f32 %v5473_v15, %v2716_v42  ;;  %v3009_v56 = vadd.f32 %v4187_v0, %v3008_v62  ;;  %v4123_v53 = vpop.f32.mrb[90].mxu1 }
 0x21b   : > { %v4203_v10 = vadd.f32 %v5481_v27, %v4123_v53  ;;  %v2719_v45 = vpop.f32.mrb[91].mxu1  ;;  %v4231_v61 = vadd.f32 %v5574_v25, %v3939_v43  ;;  %v3051_v27 = vmul.f32 %v4195_v22, %v4195_v22 }
 0x21c   : > { %v3010_v4 = vadd.f32 %v4199_v49, %v3009_v56  ;;  %v3049_v6 = vmul.f32 %v4199_v49, %v4199_v49  ;;  %v3079_v21 = vadd.f32 %v3078_v20, %v3048_v8  ;;  %v4207_v7 = vadd.f32 %v5475_v33, %v2719_v45  ;;  %v5575_v8 = vld [vmem:[#allocation4_spill] sm:$0xff] }
 0x21d   : > { %v3525_v2 = vpack.c.bf16 %v4203_v10, %v4195_v22  ;;  %v3940_v5 = vpop.f32.mrb[120].mxu0  ;;  %v3052_v44 = vmul.f32 %v4203_v10, %v4203_v10 }
 0x21e   : > { %v3080_v36 = vadd.f32 %v3079_v21, %v3049_v6  ;;  %v3520_v15 = vpack.c.bf16 %v4207_v7, %v4199_v49  ;;  %v3011_v14 = vadd.f32 %v4207_v7, %v3010_v4  ;;  %v3050_v19 = vmul.f32 %v4207_v7, %v4207_v7  ;;  %v3941_v39 = vpop.f32.mrb[121].mxu0 }
 0x21f   : > { %3581 = vst [vmem:[%s5495_s29 + $0x28] sm:$0xff] %v3525_v2   ;;  %v3942_v0 = vadd.f32 %v3941_v39, %v3940_v5  ;;  %v3943_v9 = vpop.f32.mrb[122].mxu0 }
 0x220   : > { %3580 = vst [vmem:[%s5495_s29 + $0x20] sm:$0xff] %v3520_v15   ;;  %v3012_v47 = vadd.f32 %v4195_v22, %v3011_v14  ;;  %v3081_v30 = vadd.f32 %v3080_v36, %v3050_v19  ;;  %v4126_v31 = vpop.f32.mrb[92].mxu1  ;;  %v3944_v37 = vpop.f32.mrb[123].mxu0 }
 0x221   : > { %v4211_v33 = vadd.f32 %v5488_v55, %v4126_v31  ;;  %v2732_v60 = vpop.f32.mrb[93].mxu1  ;;  %v3945_v59 = vadd.f32 %v3944_v37, %v3943_v9  ;;  %v4240_v29 = vadd.f32 %v5374_v38, %v3942_v0 }
 0x222   : > { %v3082_v18 = vadd.f32 %v3081_v30, %v3051_v27  ;;  %v4215_v17 = vadd.f32 %v5483_v32, %v2732_v60  ;;  %v3013_v34 = vadd.f32 %v4203_v10, %v3012_v47  ;;  %v4127_v24 = vpop.f32.mrb[94].mxu1 }
 0x223   : > { %v4219_v52 = vadd.f32 %v5499_v46, %v4127_v24  ;;  %v2735_v54 = vpop.f32.mrb[95].mxu1  ;;  %v4246_v11 = vadd.f32 %v5575_v8, %v3945_v59  ;;  %v3055_v46 = vmul.f32 %v4211_v33, %v4211_v33 }
 0x224   : > { %v3014_v26 = vadd.f32 %v4215_v17, %v3013_v34  ;;  %v3053_v62 = vmul.f32 %v4215_v17, %v4215_v17  ;;  %v3083_v23 = vadd.f32 %v3082_v18, %v3052_v44  ;;  %v4223_v40 = vadd.f32 %v5485_v63, %v2735_v54 }
 0x225   : > { %v3535_v55 = vpack.c.bf16 %v4219_v52, %v4211_v33  ;;  %v3946_v22 = vpop.f32.mrb[124].mxu0  ;;  %v3056_v4 = vmul.f32 %v4219_v52, %v4219_v52 }
 0x226   : > { %v3084_v42 = vadd.f32 %v3083_v23, %v3053_v62  ;;  %v3530_v32 = vpack.c.bf16 %v4223_v40, %v4215_v17  ;;  %v3015_v43 = vadd.f32 %v4223_v40, %v3014_v26  ;;  %v3054_v20 = vmul.f32 %v4223_v40, %v4223_v40  ;;  %v3947_v49 = vpop.f32.mrb[125].mxu0 }
 0x227   : > { %3583 = vst [vmem:[%s5495_s29 + $0x38] sm:$0xff] %v3535_v55   ;;  %v3948_v56 = vadd.f32 %v3947_v49, %v3946_v22  ;;  %v3949_v53 = vpop.f32.mrb[126].mxu0 }
 0x228   : > { %3582 = vst [vmem:[%s5495_s29 + $0x30] sm:$0xff] %v3530_v32   ;;  %v3016_v38 = vadd.f32 %v4211_v33, %v3015_v43  ;;  %v3085_v10 = vadd.f32 %v3084_v42, %v3054_v20  ;;  %v4130_v45 = vpop.f32.mrb[0].mxu1  ;;  %v3950_v6 = vpop.f32.mrb[127].mxu0 }
 0x229   : > { %v4226_v63 = vadd.f32 %v4225_v3, %v4130_v45  ;;  %v2748_v21 = vpop.f32.mrb[1].mxu1  ;;  %v3951_v7 = vadd.f32 %v3950_v6, %v3949_v53  ;;  %v4237_v19 = vadd.f32 %v5378_v41, %v3948_v56 }
 0x22a   : > { %v3086_v2 = vadd.f32 %v3085_v10, %v3055_v46  ;;  %v4229_v25 = vadd.f32 %v5506_v51, %v2748_v21  ;;  %v3017_v5 = vadd.f32 %v4219_v52, %v3016_v38  ;;  %v4131_v36 = vpop.f32.mrb[2].mxu1 }
 0x22b   : > { %v4232_v15 = vadd.f32 %v4231_v61, %v4131_v36  ;;  %v2751_v14 = vpop.f32.mrb[3].mxu1  ;;  %v4243_v3 = vadd.f32 %v5380_v35, %v3951_v7  ;;  %v3059_v61 = vmul.f32 %v4226_v63, %v4226_v63 }
 0x22c   : > { %v3018_v39 = vadd.f32 %v4229_v25, %v3017_v5  ;;  %v3057_v27 = vmul.f32 %v4229_v25, %v4229_v25  ;;  %v3087_v0 = vadd.f32 %v3086_v2, %v3056_v4  ;;  %v4235_v9 = vadd.f32 %v5510_v1, %v2751_v14 }
 0x22d   : > { %v3545_v47 = vpack.c.bf16 %v4232_v15, %v4226_v63  ;;  %v3952_v30 = vpop.f32.mrb[128].mxu0  ;;  %v3060_v34 = vmul.f32 %v4232_v15, %v4232_v15 }
 0x22e   : > { %v3088_v31 = vadd.f32 %v3087_v0, %v3057_v27  ;;  %v3540_v44 = vpack.c.bf16 %v4235_v9, %v4229_v25  ;;  %v3019_v51 = vadd.f32 %v4235_v9, %v3018_v39  ;;  %v3058_v37 = vmul.f32 %v4235_v9, %v4235_v9  ;;  %v3953_v33 = vpop.f32.mrb[129].mxu0 }
 0x22f   : > { %3585 = vst [vmem:[%s5495_s29 + $0x48] sm:$0xff] %v3545_v47   ;;  %v3954_v60 = vadd.f32 %v3953_v33, %v3952_v30  ;;  %v3955_v59 = vpop.f32.mrb[130].mxu0 }
 0x230   : > { %3584 = vst [vmem:[%s5495_s29 + $0x40] sm:$0xff] %v3540_v44   ;;  %v3020_v41 = vadd.f32 %v4226_v63, %v3019_v51  ;;  %v3089_v18 = vadd.f32 %v3088_v31, %v3058_v37  ;;  %v4134_v17 = vpop.f32.mrb[4].mxu1  ;;  %v3956_v24 = vpop.f32.mrb[131].mxu0 }
 0x231   : > { %v4238_v1 = vadd.f32 %v4237_v19, %v4134_v17  ;;  %v2764_v52 = vpop.f32.mrb[5].mxu1  ;;  %v3957_v54 = vadd.f32 %v3956_v24, %v3955_v59  ;;  %v4252_v8 = vadd.f32 %v5386_v57, %v3954_v60 }
 0x232   : > { %v3090_v35 = vadd.f32 %v3089_v18, %v3059_v61  ;;  %v4241_v26 = vadd.f32 %v4240_v29, %v2764_v52  ;;  %v3021_v62 = vadd.f32 %v4232_v15, %v3020_v41  ;;  %v4135_v23 = vpop.f32.mrb[6].mxu1 }
 0x233   : > { %v4244_v40 = vadd.f32 %v4243_v3, %v4135_v23  ;;  %v2767_v55 = vpop.f32.mrb[7].mxu1  ;;  %v4258_v49 = vadd.f32 %v5388_v58, %v3957_v54  ;;  %v3063_v45 = vmul.f32 %v4238_v1, %v4238_v1 }
 0x234   : > { %v3022_v22 = vadd.f32 %v4241_v26, %v3021_v62  ;;  %v3061_v42 = vmul.f32 %v4241_v26, %v4241_v26  ;;  %v3091_v32 = vadd.f32 %v3090_v35, %v3060_v34  ;;  %v4247_v43 = vadd.f32 %v4246_v11, %v2767_v55 }
 0x235   : > { %v3555_v20 = vpack.c.bf16 %v4244_v40, %v4238_v1  ;;  %v3958_v46 = vpop.f32.mrb[132].mxu0  ;;  %v3064_v7 = vmul.f32 %v4244_v40, %v4244_v40 }
 0x236   : > { %v3092_v56 = vadd.f32 %v3091_v32, %v3061_v42  ;;  %v3550_v53 = vpack.c.bf16 %v4247_v43, %v4241_v26  ;;  %v3023_v38 = vadd.f32 %v4247_v43, %v3022_v22  ;;  %v3062_v29 = vmul.f32 %v4247_v43, %v4247_v43  ;;  %v3959_v10 = vpop.f32.mrb[133].mxu0 }
 0x237   : > { %3587 = vst [vmem:[%s5495_s29 + $0x58] sm:$0xff] %v3555_v20   ;;  %v3960_v4 = vadd.f32 %v3959_v10, %v3958_v46  ;;  %v3961_v6 = vpop.f32.mrb[134].mxu0 }
 0x238   : > { %3586 = vst [vmem:[%s5495_s29 + $0x50] sm:$0xff] %v3550_v53   ;;  %v3024_v57 = vadd.f32 %v4238_v1, %v3023_v38  ;;  %v3093_v63 = vadd.f32 %v3092_v56, %v3062_v29  ;;  %v4138_v21 = vpop.f32.mrb[8].mxu1  ;;  %v3962_v2 = vpop.f32.mrb[135].mxu0 }
 0x239   : > { %v2780_v11 = vpop.f32.mrb[9].mxu1  ;;  %v3963_v25 = vadd.f32 %v3962_v2, %v3961_v6  ;;  %v4249_v58 = vadd.f32 %v5406_v16, %v3960_v4 }
 0x23a   : > { %v3094_v5 = vadd.f32 %v3093_v63, %v3063_v45  ;;  %v4253_v36 = vadd.f32 %v4252_v8, %v2780_v11  ;;  %v4139_v15 = vpop.f32.mrb[10].mxu1  ;;  %v3025_v14 = vadd.f32 %v4244_v40, %v3024_v57 }
 0x23b   : > { %v2783_v19 = vpop.f32.mrb[11].mxu1  ;;  %v4250_v39 = vadd.f32 %v4249_v58, %v4138_v21  ;;  %v4255_v9 = vadd.f32 %v5408_v13, %v3963_v25 }
 0x23c   : > { %v3065_v27 = vmul.f32 %v4253_v36, %v4253_v36  ;;  %v3095_v0 = vadd.f32 %v3094_v5, %v3064_v7  ;;  %v3026_v47 = vadd.f32 %v4253_v36, %v3025_v14  ;;  %v4259_v3 = vadd.f32 %v4258_v49, %v2783_v19 }
 0x23d   : > { %v3964_v30 = vpop.f32.mrb[136].mxu0  ;;  %v4256_v44 = vadd.f32 %v4255_v9, %v4139_v15  ;;  %v3067_v18 = vmul.f32 %v4250_v39, %v4250_v39 }
 0x23e   : > { %v3096_v31 = vadd.f32 %v3095_v0, %v3065_v27  ;;  %v3965_v51 = vpop.f32.mrb[137].mxu0  ;;  %v3560_v37 = vpack.c.bf16 %v4259_v3, %v4253_v36  ;;  %v3027_v33 = vadd.f32 %v4259_v3, %v3026_v47  ;;  %v3066_v16 = vmul.f32 %v4259_v3, %v4259_v3 }
 0x23f   : > { %v3966_v61 = vadd.f32 %v3965_v51, %v3964_v30  ;;  %v3967_v60 = vpop.f32.mrb[138].mxu0  ;;  %v3565_v59 = vpack.c.bf16 %v4256_v44, %v4250_v39  ;;  %v3068_v35 = vmul.f32 %v4256_v44, %v4256_v44 }
 0x240   : > { %v4142_v41 = vpop.f32.mrb[12].mxu1  ;;  %v3968_v17 = vpop.f32.mrb[139].mxu0  ;;  %3588 = vst [vmem:[%s5495_s29 + $0x60] sm:$0xff] %v3560_v37   ;;  %v3028_v34 = vadd.f32 %v4250_v39, %v3027_v33  ;;  %v3097_v13 = vadd.f32 %v3096_v31, %v3066_v16 }
 0x241   : > { %v2796_v24 = vpop.f32.mrb[13].mxu1  ;;  %3589 = vst [vmem:[%s5495_s29 + $0x68] sm:$0xff] %v3565_v59   ;;  %v3969_v1 = vadd.f32 %v3968_v17, %v3967_v60  ;;  %v4264_v52 = vadd.f32 %v5424_v12, %v3966_v61 }
 0x242   : > { %v4143_v54 = vpop.f32.mrb[14].mxu1  ;;  %v3098_v26 = vadd.f32 %v3097_v13, %v3067_v18  ;;  %v3029_v62 = vadd.f32 %v4256_v44, %v3028_v34 }
 0x243   : > { %v2799_v23 = vpop.f32.mrb[15].mxu1  ;;  %v4265_v40 = vadd.f32 %v4264_v52, %v2796_v24  ;;  %v4270_v55 = vadd.f32 %v5426_v48, %v3969_v1 }
 0x244   : > { %v3099_v8 = vadd.f32 %v3098_v26, %v3068_v35 }
 0x245   : > { %v3970_v22 = vpop.f32.mrb[140].mxu0  ;;  %v3030_v42 = vadd.f32 %v4265_v40, %v3029_v62  ;;  %v3069_v32 = vmul.f32 %v4265_v40, %v4265_v40  ;;  %v4271_v43 = vadd.f32 %v4270_v55, %v2799_v23 }
 0x246   : > { %v3971_v20 = vpop.f32.mrb[141].mxu0 }
 0x247   : > { %v3972_v49 = vadd.f32 %v3971_v20, %v3970_v22  ;;  %v3100_v46 = vadd.f32 %v3099_v8, %v3069_v32  ;;  %v3973_v56 = vpop.f32.mrb[142].mxu0  ;;  %v3570_v53 = vpack.c.bf16 %v4271_v43, %v4265_v40  ;;  %v3031_v12 = vadd.f32 %v4271_v43, %v3030_v42 }
 0x248   : > { %v3974_v38 = vpop.f32.mrb[143].mxu0  ;;  %v3070_v29 = vmul.f32 %v4271_v43, %v4271_v43 }
 0x249   : > { %v4261_v10 = vadd.f32 %v5441_v28, %v3972_v49  ;;  %v3975_v45 = vadd.f32 %v3974_v38, %v3973_v56  ;;  %3590 = vst [vmem:[%s5495_s29 + $0x70] sm:$0xff] %v3570_v53  }
 0x24a   : > { %v3101_v48 = vadd.f32 %v3100_v46, %v3070_v29 }
 0x24b   : > { %v4262_v4 = vadd.f32 %v4261_v10, %v4142_v41  ;;  %v4267_v6 = vadd.f32 %v5444_v50, %v3975_v45 }
 0x24d   : > { %v3071_v57 = vmul.f32 %v4262_v4, %v4262_v4  ;;  %v4268_v63 = vadd.f32 %v4267_v6, %v4143_v54  ;;  %v3032_v21 = vadd.f32 %v4262_v4, %v3031_v12 }
 0x24f   : > { %v3575_v7 = vpack.c.bf16 %v4268_v63, %v4262_v4  ;;  %v3072_v2 = vmul.f32 %v4268_v63, %v4268_v63  ;;  %v3033_v11 = vadd.f32 %v4268_v63, %v3032_v21  ;;  %v3102_v25 = vadd.f32 %v3101_v48, %v3071_v57 }
 0x251   : > { %3591 = vst [vmem:[%s5495_s29 + $0x78] sm:$0xff] %v3575_v7   ;;  %v3034_v5 = vrot.slane %v3033_v11, 4  ;;  %v3103_v58 = vadd.f32 %v3102_v25, %v3072_v2 }
 0x253   : > { %v3035_v36 = vadd.f32 %v3034_v5, %v3033_v11  ;;  %v3104_v28 = vrot.slane %v3103_v58, 4 }
 0x255   : > { %v3036_v15 = vrot.slane %v3035_v36, 2  ;;  %v3105_v14 = vadd.f32 %v3104_v28, %v3103_v58 }
 0x257   : > { %v3037_v19 = vadd.f32 %v3036_v15, %v3035_v36  ;;  %v3106_v39 = vrot.slane %v3105_v14, 2 }
 0x259   : > { %v3038_v27 = vrot.slane %v3037_v19, 1  ;;  %v3107_v50 = vadd.f32 %v3106_v39, %v3105_v14 }
 0x25b   : > { %v3039_v0 = vadd.f32 %v3038_v27, %v3037_v19  ;;  %v3108_v9 = vrot.slane %v3107_v50, 1 }
 0x25d   : > { %3040 = vst [vmem:[%s211_s5] sm:$0x1] %v3039_v0  ;;  %v3109_v47 = vadd.f32 %v3108_v9, %v3107_v50 }
 0x25f   : > { %3110 = vst [vmem:[%s214_s8] sm:$0x1] %v3109_v47 }
 0x260 PF: > { %s15_s15 = sadd.s32 1, %s4458_s15  }
 0x261   : > { %p12_p4 = scmp.ge.s32.totalorder %s15_s15, 4  }
 0x263   :  { %14 = sbr.rel (!%p12_p4) target bundleno = 1 (0x1), region = 85 }

// kernel: resnet_block_forward.3
= control target key start
LH: loop header
LB: loop body
LE: loop exit
PB: predicated region body
PF: predicated region fallthrough
CT: control target
= control target key end

     0   :  { %s4898_s18 = smov 0   ;;  %s6026_s0 = inlined_call_operand.vmem [shape: bf16[2,16,16,128], index: 0, kind: input, shape index: {}]   ;;  %s6027_s1 = inlined_call_operand.vmem [shape: f32[2,128], index: 1, kind: input, shape index: {}]   ;;  %s6028_s2 = inlined_call_operand.vmem [shape: bf16[3,384,128], index: 2, kind: input, shape index: {}]   ;;  %s6029_s3 = inlined_call_operand.vmem [shape: bf16[2,16,16,128], index: 3, kind: output, shape index: {0}]   ;;  %s6030_s4 = inlined_call_operand.vmem [shape: f32[2,1,128], index: 4, kind: output, shape index: {1}]   ;;  %s6031_s5 = inlined_call_operand.vmem [shape: f32[2,1,128], index: 5, kind: output, shape index: {2}]  }
   0x1 LB: > { %s3476_s19 = sadd.s32 4294967295, %s4865_s18   ;;  %p3480_p0 = scmp.ge.s32.totalorder %s4865_s18, 1  ;;  %s4865_s18 = sphi %s4898_s18, %s16_s18  }
   0x2   : > { %p192_p1 = scmp.lt.s32.totalorder %s4865_s18, 3 }
   0x4   : > { %p193_p2 = pnand %p3480_p0, %p192_p1 }
   0x6   : > { %196 = sbr.rel (%p193_p2) target bundleno = 628 (0x274), region = 32 }
   0xd   : > { %v4909_v0 = vld [vmem:[%s6028_s2 + $0x140] sm:$0xff]   ;;  %v4867_v3 = vmov 0   ;;  %v4922_v4 = vld [vmem:[%s6028_s2 + $0x148] sm:$0xff]   ;;  %v4934_v7 = vld [vmem:[%s6028_s2 + $0x150] sm:$0xff]   ;;  %p226_p3 = scmp.lt.s32.totalorder %s3476_s19, 1  ;;  %v308_v13 = vlaneseq  ;;  %vm886_vm0 = vcmask 1043456  }
   0xe   : > { %v4733_v1 = vld [vmem:[%s6028_s2 + $0x100] sm:$0xff]   ;;  %4547 = vmatprep.subr.bf16.mxu1 %v4909_v0  ;;  %455 = vst [vmem:[#allocation2 + $0x6c] sm:$0xf] %v4867_v3  ;;  %456 = vst [vmem:[#allocation2 + $0x70] sm:$0xf] %v4867_v3  ;;  %v4736_v5 = vld [vmem:[%s6028_s2 + $0x108] sm:$0xff]  }
   0xf   : > { %v4734_v2 = vld [vmem:[%s6028_s2 + $0xc0] sm:$0xff]   ;;  %457 = vst [vmem:[#allocation2 + $0x74] sm:$0x1] %v4867_v3  ;;  %428 = vst [vmem:[#allocation2] sm:$0xf] %v4867_v3  ;;  %4555 = vmatpush3.bf16.msra.mxu1 %v4909_v0  ;;  %3995 = vmatprep.subr.bf16.mxu0 %v4733_v1  ;;  %v4737_v6 = vld [vmem:[%s6028_s2 + $0xc8] sm:$0xff]  }
  0x10   : > { %429 = vst [vmem:[#allocation2 + $0x4] sm:$0xf] %v4867_v3  ;;  %430 = vst [vmem:[#allocation2 + $0x8] sm:$0x1] %v4867_v3  ;;  %3996 = vmatpush3.bf16.msra.mxu0 %v4734_v2  ;;  %4548 = vmatprep.subr.bf16.mxu1 %v4922_v4  ;;  %v4739_v8 = vld [vmem:[%s6028_s2 + $0x110] sm:$0xff]   ;;  %v4947_v10 = vld [vmem:[%s6028_s2 + $0x158] sm:$0xff]  }
  0x11   : > { %431 = vst [vmem:[#allocation2 + $0xc] sm:$0xf] %v4867_v3  ;;  %432 = vst [vmem:[#allocation2 + $0x10] sm:$0xf] %v4867_v3  ;;  %3997 = vmatprep.subr.bf16.mxu0 %v4736_v5  ;;  %v4740_v9 = vld [vmem:[%s6028_s2 + $0xd0] sm:$0xff]   ;;  %v4742_v11 = vld [vmem:[%s6028_s2 + $0x118] sm:$0xff]  }
  0x12   : > { %433 = vst [vmem:[#allocation2 + $0x14] sm:$0x1] %v4867_v3  ;;  %434 = vst [vmem:[#allocation2 + $0x18] sm:$0xf] %v4867_v3  ;;  %v4743_v12 = vld [vmem:[%s6028_s2 + $0xd8] sm:$0xff]   ;;  %v4962_v14 = vld [vmem:[%s6028_s2 + $0x160] sm:$0xff]  }
  0x13   : > { %435 = vst [vmem:[#allocation2 + $0x1c] sm:$0xf] %v4867_v3  ;;  %436 = vst [vmem:[#allocation2 + $0x20] sm:$0x1] %v4867_v3  ;;  %4556 = vmatpush3.bf16.msra.mxu1 %v4922_v4  ;;  %v4745_v15 = vld [vmem:[%s6028_s2 + $0x120] sm:$0xff]   ;;  %s6045_s19 = smov (!%p226_p3, %s3476_s19), 1 }
  0x14   : > { %437 = vst [vmem:[#allocation2 + $0x24] sm:$0xf] %v4867_v3  ;;  %438 = vst [vmem:[#allocation2 + $0x28] sm:$0xf] %v4867_v3  ;;  %3998 = vmatpush3.bf16.msra.mxu0 %v4737_v6  ;;  %4549 = vmatprep.subr.bf16.mxu1 %v4934_v7  ;;  %v4746_v16 = vld [vmem:[%s6028_s2 + $0xe0] sm:$0xff]   ;;  %v309_v17 = vshrl.u32 %v308_v13, 7  ;;  %s238_s24 = scalar_lea.vmem %s6030_s4, %s6045_s19  ;;  %s241_s26 = scalar_lea.vmem %s6031_s5, %s6045_s19 }
  0x15   : > { %439 = vst [vmem:[#allocation2 + $0x2c] sm:$0x1] %v4867_v3  ;;  %440 = vst [vmem:[#allocation2 + $0x30] sm:$0xf] %v4867_v3  ;;  %3999 = vmatprep.subr.bf16.mxu0 %v4739_v8  ;;  %v4979_v18 = vld [vmem:[%s6028_s2 + $0x168] sm:$0xff]   ;;  %s3755_s6 = sshll.u32 %s6045_s19, 7 }
  0x16   : > { %441 = vst [vmem:[#allocation2 + $0x34] sm:$0xf] %v4867_v3  ;;  %442 = vst [vmem:[#allocation2 + $0x38] sm:$0x1] %v4867_v3  ;;  %v4748_v19 = vld [vmem:[%s6028_s2 + $0x128] sm:$0xff]   ;;  %v310_v21 = vsub.s32 0, %v309_v17  ;;  %s5000_s13 = scalar_lea.vmem %s6026_s0, %s3755_s6  ;;  %s5959_s22 = scalar_lea.vmem %s6029_s3, %s3755_s6 }
  0x17   : > { %443 = vst [vmem:[#allocation2 + $0x3c] sm:$0xf] %v4867_v3  ;;  %444 = vst [vmem:[#allocation2 + $0x40] sm:$0xf] %v4867_v3  ;;  %4557 = vmatpush3.bf16.msra.mxu1 %v4934_v7  ;;  %v4749_v20 = vld [vmem:[%s6028_s2 + $0xe8] sm:$0xff]   ;;  %v4993_v22 = vld [vmem:[%s6028_s2 + $0x170] sm:$0xff]  }
  0x18   : > { %445 = vst [vmem:[#allocation2 + $0x44] sm:$0x1] %v4867_v3  ;;  %446 = vst [vmem:[#allocation2 + $0x48] sm:$0xf] %v4867_v3  ;;  %4000 = vmatpush3.bf16.msra.mxu0 %v4740_v9  ;;  %4550 = vmatprep.subr.bf16.mxu1 %v4947_v10  ;;  %v346_v23 = vsub.s32 1, %v309_v17  ;;  %v4751_v24 = vld [vmem:[%s6028_s2 + $0x130] sm:$0xff]  }
  0x19   : > { %447 = vst [vmem:[#allocation2 + $0x4c] sm:$0xf] %v4867_v3  ;;  %448 = vst [vmem:[#allocation2 + $0x50] sm:$0x1] %v4867_v3  ;;  %4001 = vmatprep.subr.bf16.mxu0 %v4742_v11  ;;  %v243_v25 = vld [vmem:[%s6027_s1] sm:$0x3] }
  0x1a   : > { %449 = vst [vmem:[#allocation2 + $0x54] sm:$0xf] %v4867_v3  ;;  %450 = vst [vmem:[#allocation2 + $0x58] sm:$0xf] %v4867_v3  ;;  %v3972_v26 = vld [vmem:[%s5000_s13 + $0x40] sm:$0xff]   ;;  %v4752_v27 = vld [vmem:[%s6028_s2 + $0xf0] sm:$0xff]   ;;  %v5019_v31 = vrot.slane %v243_v25, %v310_v21  ;;  %v5021_v32 = vrot.slane %v243_v25, %v346_v23 }
  0x1b   : > { %451 = vst [vmem:[#allocation2 + $0x5c] sm:$0x1] %v4867_v3  ;;  %452 = vst [vmem:[#allocation2 + $0x60] sm:$0xf] %v4867_v3  ;;  %4558 = vmatpush3.bf16.msra.mxu1 %v4947_v10  ;;  %v5017_v28 = vld [vmem:[%s6028_s2 + $0x178] sm:$0xff]   ;;  %v3855_v29 = vunpack.c.l.bf16 %v3972_v26  ;;  %v3856_v30 = vunpack.c.h.bf16 %v3972_v26  ;;  %v3973_v36 = vld [vmem:[%s5000_s13 + $0x48] sm:$0xff]  }
  0x1c   : > { %453 = vst [vmem:[#allocation2 + $0x64] sm:$0xf] %v4867_v3  ;;  %454 = vst [vmem:[#allocation2 + $0x68] sm:$0x1] %v4867_v3  ;;  %4002 = vmatpush3.bf16.msra.mxu0 %v4743_v12  ;;  %4551 = vmatprep.subr.bf16.mxu1 %v4962_v14  ;;  %v4754_v33 = vld [vmem:[%s6028_s2 + $0x138] sm:$0xff]   ;;  %v3859_v38 = vunpack.c.l.bf16 %v3973_v36  ;;  %v3860_v39 = vunpack.c.h.bf16 %v3973_v36  ;;  %v4760_v42 = vld [vmem:[%s6028_s2 + $0x40] sm:$0xff]  }
  0x1d   : > { %458 = vst [vmem:[#allocation2 + $0x78] sm:$0xf] %v4867_v3  ;;  %459 = vst [vmem:[#allocation2 + $0x7c] sm:$0xf] %v4867_v3  ;;  %4003 = vmatprep.subr.bf16.mxu0 %v4745_v15  ;;  %v328_v34 = vmul.f32 %v3855_v29, %v5019_v31  ;;  %v329_v35 = vmul.f32 %v3856_v30, %v5019_v31  ;;  %v4757_v37 = vld [vmem:[%s6028_s2 + $0xf8] sm:$0xff]   ;;  %vm893_vm3 = vcmask 1040384  }
  0x1e   : > { %460 = vst [vmem:[#allocation2 + $0x80] sm:$0x1] %v4867_v3  ;;  %461 = vst [vmem:[#allocation2 + $0x84] sm:$0xf] %v4867_v3  ;;  %vm562_vm1 = vsmask.f32 256  ;;  %v330_v43 = vmul.f32 %v3859_v38, %v5019_v31  ;;  %v331_v44 = vmul.f32 %v3860_v39, %v5019_v31 }
  0x1f   : > { %462 = vst [vmem:[#allocation2 + $0x88] sm:$0xf] %v4867_v3  ;;  %463 = vst [vmem:[#allocation2 + $0x8c] sm:$0x1] %v4867_v3  ;;  %4559 = vmatpush3.bf16.msra.mxu1 %v4962_v14  ;;  %v364_v40 = vadd.f32 %v5021_v32, %v328_v34  ;;  %v365_v41 = vadd.f32 %v5021_v32, %v329_v35  ;;  %vm563_vm2 = vsmask.f32 4368 }
  0x20   : > { %464 = vst [vmem:[#allocation2 + $0x90] sm:$0xf] %v4867_v3  ;;  %465 = vst [vmem:[#allocation2 + $0x94] sm:$0xf] %v4867_v3  ;;  %4004 = vmatpush3.bf16.msra.mxu0 %v4746_v16  ;;  %4552 = vmatprep.subr.bf16.mxu1 %v4979_v18  ;;  %v3822_v47 = vld [vmem:[%s5000_s13] sm:$0xff]   ;;  %v366_v48 = vadd.f32 %v5021_v32, %v330_v43  ;;  %v367_v49 = vadd.f32 %v5021_v32, %v331_v44  ;;  %v3974_v58 = vld [vmem:[%s5000_s13 + $0x50] sm:$0xff]  }
  0x21   : > { %466 = vst [vmem:[#allocation2 + $0x98] sm:$0x1] %v4867_v3  ;;  %467 = vst [vmem:[#allocation2 + $0x9c] sm:$0xf] %v4867_v3  ;;  %4005 = vmatprep.subr.bf16.mxu0 %v4748_v19  ;;  %v396_v45 = vmax.f32 %v364_v40, 0.0  ;;  %v397_v46 = vmax.f32 %v365_v41, 0.0  ;;  %v3823_v50 = vunpack.c.l.bf16 %v3822_v47  ;;  %v3824_v51 = vunpack.c.h.bf16 %v3822_v47 }
  0x22   : > { %468 = vst [vmem:[#allocation2 + $0xa0] sm:$0xf] %v4867_v3  ;;  %469 = vst [vmem:[#allocation2 + $0xa4] sm:$0x1] %v4867_v3  ;;  %vm887_vm4 = vsmask.f32 7938  ;;  %v3863_v13 = vunpack.c.l.bf16 %v3974_v58  ;;  %v3864_v15 = vunpack.c.h.bf16 %v3974_v58 }
  0x23   : > { %470 = vst [vmem:[#allocation2 + $0xa8] sm:$0xf] %v4867_v3  ;;  %471 = vst [vmem:[#allocation2 + $0xac] sm:$0xf] %v4867_v3  ;;  %4560 = vmatpush3.bf16.msra.mxu1 %v4979_v18  ;;  %v3773_v52 = vpack.c.bf16 %v396_v45, %v396_v45  ;;  %v3774_v53 = vpack.c.bf16 %v397_v46, %v397_v46  ;;  %v398_v54 = vmax.f32 %v366_v48, 0.0  ;;  %v399_v55 = vmax.f32 %v367_v49, 0.0 }
  0x24   : > { %472 = vst [vmem:[#allocation2 + $0xb0] sm:$0x1] %v4867_v3  ;;  %473 = vst [vmem:[#allocation2 + $0xb4] sm:$0xf] %v4867_v3  ;;  %4006 = vmatpush3.bf16.msra.mxu0 %v4749_v20  ;;  %4553 = vmatprep.subr.bf16.mxu1 %v4993_v22  ;;  %v312_v56 = vmul.f32 %v3823_v50, %v5019_v31  ;;  %v313_v57 = vmul.f32 %v3824_v51, %v5019_v31  ;;  %v947_v1 = vld [vmem:[#allocation2 + $0x6c] sm:$0xf] }
  0x25   : > { %474 = vst [vmem:[#allocation2 + $0xb8] sm:$0xf] %v4867_v3  ;;  %475 = vst [vmem:[#allocation2 + $0xbc] sm:$0x1] %v4867_v3  ;;  %4007 = vmatprep.subr.bf16.mxu0 %v4751_v24  ;;  %v702_v59 = vshrl.u32 %v3773_v52, 16  ;;  %v705_v60 = vshll.u32 %v3773_v52, 16  ;;  %v3775_v2 = vpack.c.bf16 %v398_v54, %v398_v54  ;;  %v332_v39 = vmul.f32 %v3863_v13, %v5019_v31 }
  0x26   : > { %476 = vst [vmem:[#allocation2 + $0xc0] sm:$0xf] %v4867_v3  ;;  %477 = vst [vmem:[#allocation2 + $0xc4] sm:$0xf] %v4867_v3  ;;  %v710_v61 = vshrl.u32 %v3774_v53, 16  ;;  %v713_v62 = vshll.u32 %v3774_v53, 16  ;;  %v348_v5 = vadd.f32 %v5021_v32, %v312_v56  ;;  %v349_v6 = vadd.f32 %v5021_v32, %v313_v57 }
  0x27   : > { %478 = vst [vmem:[#allocation2 + $0xc8] sm:$0x1] %v4867_v3  ;;  %479 = vst [vmem:[#allocation2 + $0xcc] sm:$0xf] %v4867_v3  ;;  %4561 = vmatpush3.bf16.msra.mxu1 %v4993_v22  ;;  %v704_v9 = vrot.slane %v702_v59, 7  ;;  %v719_v17 = vshrl.u32 %v3775_v2, 16  ;;  %v333_v47 = vmul.f32 %v3864_v15, %v5019_v31  ;;  %v368_v48 = vadd.f32 %v5021_v32, %v332_v39 }
  0x28   : > { %480 = vst [vmem:[#allocation2 + $0xd0] sm:$0xf] %v4867_v3  ;;  %481 = vst [vmem:[#allocation2 + $0xd4] sm:$0x1] %v4867_v3  ;;  %4008 = vmatpush3.bf16.msra.mxu0 %v4752_v27  ;;  %4554 = vmatprep.subr.bf16.mxu1 %v5017_v28  ;;  %v3776_v3 = vpack.c.bf16 %v399_v55, %v399_v55  ;;  %v712_v11 = vrot.slane %v710_v61, 7  ;;  %v722_v19 = vshll.u32 %v3775_v2, 16 }
  0x29   : > { %4009 = vmatprep.subr.bf16.mxu0 %v4754_v33  ;;  %vm5051_vm5 = vmand %vm893_vm3, %vm562_vm1  ;;  %v951_v12 = vld [vmem:[#allocation2 + $0x74] sm:$0x1]  ;;  %v707_v23 = vor.u32 %v705_v60, %v704_v9  ;;  %v708_v24 = vrot.slane %v704_v9, 4  ;;  %v954_v27 = vld [vmem:[#allocation2 + $0x78] sm:$0xf]  ;;  %v721_v29 = vrot.slane %v719_v17, 7  ;;  %v369_v58 = vadd.f32 %v5021_v32, %v333_v47 }
  0x2a   : > { %vm5059_vm6 = vmor %vm562_vm1, %vm563_vm2  ;;  %v727_v20 = vshrl.u32 %v3776_v3, 16  ;;  %v730_v21 = vshll.u32 %v3776_v3, 16  ;;  %v715_v25 = vor.u32 %v713_v62, %v712_v11  ;;  %v717_v26 = vrot.slane %v712_v11, 4  ;;  %v958_v33 = vld [vmem:[#allocation2 + $0x80] sm:$0x1]  ;;  %v3975_v40 = vld [vmem:[%s5000_s13 + $0x58] sm:$0xff]  }
  0x2b   : > { %4562 = vmatpush3.bf16.msra.mxu1 %v5017_v28  ;;  %vm5065_vm7 = vmand %vm886_vm0, %vm887_vm4  ;;  %v380_v34 = vmax.f32 %v348_v5, 0.0  ;;  %v381_v35 = vmax.f32 %v349_v6, 0.0  ;;  %v724_v41 = vor.u32 %v722_v19, %v721_v29  ;;  %vm1410_vm8 = vcmask 1046528   ;;  %v3965_v53 = vld [vmem:[%s5000_s13 + $0x8] sm:$0xff]   ;;  %v895_v6 = vld [vmem:[#allocation2 + $0x14] sm:$0x1] }
  0x2c   : > { %4010 = vmatpush3.bf16.msra.mxu0 %v4757_v37  ;;  %4131 = vmatprep.subr.bf16.mxu1 %v4760_v42  ;;  %v729_v30 = vrot.slane %v727_v20, 7  ;;  %v716_v36 = vsel %vm5059_vm6, %v708_v24, %v715_v25  ;;  %v948_v37 = vsel %vm5065_vm7, %v707_v23, %v947_v1  ;;  %v952_v38 = vsel %vm5051_vm5, %v717_v26, %v951_v12  ;;  %v889_v5 = vld [vmem:[#allocation2 + $0xc] sm:$0xf]  ;;  %v5091_v15 = vld [vmem:[%s5000_s13 + $0x60] sm:$0xff]  }
  0x2d   : > { %4403 = vmatprep.subr.bf16.mxu0 %v4909_v0  ;;  %949 = vst [vmem:[#allocation2 + $0x6c] sm:$0xf] %v948_v37  ;;  %950 = vst [vmem:[#allocation2 + $0x70] sm:$0xf] %v716_v36  ;;  %v725_v42 = vrot.slane %v721_v29, 4  ;;  %v3757_v45 = vpack.c.bf16 %v380_v34, %v380_v34  ;;  %v3758_v46 = vpack.c.bf16 %v381_v35, %v381_v35  ;;  %v3867_v52 = vunpack.c.l.bf16 %v3975_v40 }
  0x2e   : > { %953 = vst [vmem:[#allocation2 + $0x74] sm:$0x1] %v952_v38  ;;  %v732_v43 = vor.u32 %v730_v21, %v729_v30  ;;  %v734_v44 = vrot.slane %v729_v30, 4  ;;  %v955_v50 = vsel %vm5065_vm7, %v724_v41, %v954_v27  ;;  %v400_v59 = vmax.f32 %v368_v48, 0.0  ;;  %v4761_v48 = vld [vmem:[%s6028_s2] sm:$0xff]  }
  0x2f   : > { %956 = vst [vmem:[#allocation2 + $0x78] sm:$0xf] %v955_v50  ;;  %v566_v54 = vshrl.u32 %v3757_v45, 16  ;;  %v569_v55 = vshll.u32 %v3757_v45, 16  ;;  %v574_v56 = vshrl.u32 %v3758_v46, 16  ;;  %v577_v57 = vshll.u32 %v3758_v46, 16 }
  0x30   : > { %v733_v49 = vsel %vm5059_vm6, %v725_v42, %v732_v43  ;;  %v959_v51 = vsel %vm5051_vm5, %v734_v44, %v958_v33  ;;  %v3868_v60 = vunpack.c.h.bf16 %v3975_v40  ;;  %v334_v61 = vmul.f32 %v3867_v52, %v5019_v31  ;;  %v961_v42 = vld [vmem:[#allocation2 + $0x84] sm:$0xf] }
  0x31   : > { %957 = vst [vmem:[#allocation2 + $0x7c] sm:$0xf] %v733_v49  ;;  %960 = vst [vmem:[#allocation2 + $0x80] sm:$0x1] %v959_v51  ;;  %v568_v62 = vrot.slane %v566_v54, 7  ;;  %v576_v1 = vrot.slane %v574_v56, 7  ;;  %v3827_v2 = vunpack.c.l.bf16 %v3965_v53  ;;  %v3828_v3 = vunpack.c.h.bf16 %v3965_v53 }
  0x32   : > { %v401_v9 = vmax.f32 %v369_v58, 0.0  ;;  %v3777_v11 = vpack.c.bf16 %v400_v59, %v400_v59  ;;  %v335_v12 = vmul.f32 %v3868_v60, %v5019_v31  ;;  %v370_v13 = vadd.f32 %v5021_v32, %v334_v61  ;;  %v4764_v56 = vld [vmem:[%s6028_s2 + $0x48] sm:$0xff]  }
  0x33   : > { %v571_v17 = vor.u32 %v569_v55, %v568_v62  ;;  %v579_v19 = vor.u32 %v577_v57, %v576_v1  ;;  %v314_v20 = vmul.f32 %v3827_v2, %v5019_v31  ;;  %v315_v21 = vmul.f32 %v3828_v3, %v5019_v31 }
  0x34   : > { %v4755_v23 = vld [vmem:[#allocation2 + $0x6c] sm:$0xff]   ;;  %v572_v25 = vrot.slane %v568_v62, 4  ;;  %v581_v26 = vrot.slane %v576_v1, 4  ;;  %v3778_v27 = vpack.c.bf16 %v401_v9, %v401_v9  ;;  %v371_v29 = vadd.f32 %v5021_v32, %v335_v12 }
  0x35   : > { %v4756_v24 = vld [vmem:[#allocation2 + $0x74] ss:$0 sps:$4 sm:$0x11]   ;;  %v890_v30 = vsel %vm5065_vm7, %v571_v17, %v889_v5  ;;  %v736_v33 = vshrl.u32 %v3777_v11, 16  ;;  %v739_v34 = vshll.u32 %v3777_v11, 16  ;;  %v402_v35 = vmax.f32 %v370_v13, 0.0 }
  0x36   : > { %v1438_v36 = vrot.slane %v4755_v23, 1  ;;  %v1439_v37 = vrot.slane %v4756_v24, 1  ;;  %v580_v38 = vsel %vm5059_vm6, %v572_v25, %v579_v19  ;;  %891 = vst [vmem:[#allocation2 + $0xc] sm:$0xf] %v890_v30  ;;  %v896_v39 = vsel %vm5051_vm5, %v581_v26, %v895_v6  ;;  %v965_v62 = vld [vmem:[#allocation2 + $0x8c] sm:$0x1] }
  0x37   : > { %892 = vst [vmem:[#allocation2 + $0x10] sm:$0xf] %v580_v38  ;;  %897 = vst [vmem:[#allocation2 + $0x14] sm:$0x1] %v896_v39  ;;  %v3779_v43 = vpack.c.bf16 %v402_v35, %v402_v35  ;;  %v350_v44 = vadd.f32 %v5021_v32, %v314_v20  ;;  %v351_v45 = vadd.f32 %v5021_v32, %v315_v21  ;;  %v3871_v46 = vunpack.c.l.bf16 %v5091_v15  ;;  %v4765_v5 = vld [vmem:[%s6028_s2 + $0x8] sm:$0xff]   ;;  %v4770_v23 = vld [vmem:[%s6028_s2 + $0x50] sm:$0xff]  }
  0x38   : > { %v4758_v40 = vld [vmem:[#allocation2 + $0x78] sm:$0xff]   ;;  %v4759_v41 = vld [vmem:[#allocation2 + $0x80] ss:$0 sps:$4 sm:$0x11]   ;;  %v5106_v47 = vsel %vm1410_vm8, %v1438_v36, %v1439_v37  ;;  %v738_v49 = vrot.slane %v736_v33, 7  ;;  %v744_v50 = vshrl.u32 %v3778_v27, 16  ;;  %v3872_v36 = vunpack.c.h.bf16 %v5091_v15 }
  0x39   : > { %v747_v51 = vshll.u32 %v3778_v27, 16  ;;  %4435 = vmatprep.mubr.bf16.mxu1 %v5106_v47  ;;  %v1441_v52 = vrot.slane %v4758_v40, 1  ;;  %v1442_v53 = vrot.slane %v4759_v41, 1  ;;  %v403_v54 = vmax.f32 %v371_v29, 0.0  ;;  %v968_v12 = vld [vmem:[#allocation2 + $0x90] sm:$0xf] }
  0x3a   : > { %v753_v55 = vshrl.u32 %v3779_v43, 16  ;;  %v741_v57 = vor.u32 %v739_v34, %v738_v49  ;;  %v742_v58 = vrot.slane %v738_v49, 4  ;;  %v746_v59 = vrot.slane %v744_v50, 7  ;;  %v972_v35 = vld [vmem:[#allocation2 + $0x98] sm:$0x1]  ;;  %v4771_v40 = vld [vmem:[%s6028_s2 + $0x10] sm:$0xff]  }
  0x3b   : > { %v756_v60 = vshll.u32 %v3779_v43, 16  ;;  %v5116_v61 = vsel %vm1410_vm8, %v1441_v52, %v1442_v53  ;;  %vm1201_vm9 = vsmask.f32 7424  ;;  %v3780_v1 = vpack.c.bf16 %v403_v54, %v403_v54  ;;  %v898_v15 = vld [vmem:[#allocation2 + $0x18] sm:$0xf]  ;;  %v3977_v53 = vld [vmem:[%s5000_s13 + $0x68] sm:$0xff]  }
  0x3c   : > { %v755_v2 = vrot.slane %v753_v55, 7  ;;  %v382_v3 = vmax.f32 %v350_v44, 0.0  ;;  %4436 = vmatmul.mubr.bf16.vlgmr.msra.gmra.mrb[0].mxu1 %v5116_v61  ;;  %v749_v6 = vor.u32 %v747_v51, %v746_v59  ;;  %v751_v9 = vrot.slane %v746_v59, 4 }
  0x3d   : > { %v962_v11 = vsel %vm5065_vm7, %v741_v57, %v961_v42  ;;  %v383_v13 = vmax.f32 %v351_v45, 0.0  ;;  %4132 = vmatpush3.bf16.msra.mxu1 %v4761_v48  ;;  %v761_v20 = vshrl.u32 %v3780_v1, 16  ;;  %v764_v21 = vshll.u32 %v3780_v1, 16  ;;  %v4775_v1 = vld [vmem:[%s6028_s2 + $0x18] sm:$0xff]  }
  0x3e   : > { %963 = vst [vmem:[#allocation2 + $0x84] sm:$0xf] %v962_v11  ;;  %v758_v17 = vor.u32 %v756_v60, %v755_v2  ;;  %v759_v19 = vrot.slane %v755_v2, 4  ;;  %v5127_v24 = vld [vmem:[#allocation2 + $0xc] sm:$0xff]   ;;  %4133 = vmatprep.subr.bf16.mxu1 %v4764_v56  ;;  %v750_v25 = vsel %vm5059_vm6, %v742_v58, %v749_v6  ;;  %v966_v26 = vsel %vm5051_vm5, %v751_v9, %v965_v62  ;;  %v902_v62 = vld [vmem:[#allocation2 + $0x20] sm:$0x1] }
  0x3f   : > { %v3759_v27 = vpack.c.bf16 %v382_v3, %v382_v3  ;;  %v3760_v29 = vpack.c.bf16 %v383_v13, %v383_v13  ;;  %v4763_v30 = vld [vmem:[#allocation2 + $0x14] ss:$0 sps:$4 sm:$0x11]   ;;  %964 = vst [vmem:[#allocation2 + $0x88] sm:$0xf] %v750_v25  ;;  %v763_v33 = vrot.slane %v761_v20, 7  ;;  %v336_v37 = vmul.f32 %v3871_v46, %v5019_v31 }
  0x40   : > { %967 = vst [vmem:[#allocation2 + $0x8c] sm:$0x1] %v966_v26  ;;  %v969_v34 = vsel %vm5065_vm7, %v758_v17, %v968_v12  ;;  %v1215_v38 = vshrl.u32 %v5127_v24, 16  ;;  %v1217_v39 = vshll.u32 %v5127_v24, 16  ;;  %v1222_v43 = vshll.u32 %v4763_v30, 16  ;;  %v4774_v46 = vld [vmem:[%s6028_s2 + $0x58] sm:$0xff]  }
  0x41   : > { %970 = vst [vmem:[#allocation2 + $0x90] sm:$0xf] %v969_v34  ;;  %v583_v41 = vshrl.u32 %v3759_v27, 16  ;;  %v586_v42 = vshll.u32 %v3759_v27, 16  ;;  %4134 = vmatpush3.bf16.msra.mxu1 %v4765_v5  ;;  %v766_v44 = vor.u32 %v764_v21, %v763_v33  ;;  %v768_v45 = vrot.slane %v763_v33, 4  ;;  %v4780_v11 = vld [vmem:[%s6028_s2 + $0x60] sm:$0xff]  }
  0x42   : > { %v591_v48 = vshrl.u32 %v3760_v29, 16  ;;  %v1219_v49 = vrot.slane %v1217_v39, 1  ;;  %4135 = vmatprep.subr.bf16.mxu1 %v4770_v23  ;;  %v594_v51 = vshll.u32 %v3760_v29, 16  ;;  %v337_v52 = vmul.f32 %v3872_v36, %v5019_v31  ;;  %v3966_v12 = vld [vmem:[%s5000_s13 + $0x10] sm:$0xff]   ;;  %v4781_v30 = vld [vmem:[%s6028_s2 + $0x20] sm:$0xff]  }
  0x43   : > { %v585_v50 = vrot.slane %v583_v41, 7  ;;  %v1224_v54 = vrot.slane %v1222_v43, 1  ;;  %v767_v55 = vsel %vm5059_vm6, %v759_v19, %v766_v44  ;;  %v973_v56 = vsel %vm5051_vm5, %v768_v45, %v972_v35 }
  0x44   : > { %v593_v57 = vrot.slane %v591_v48, 7  ;;  %v1220_v58 = vor.u32 %v1219_v49, %v1215_v38  ;;  %971 = vst [vmem:[#allocation2 + $0x94] sm:$0xf] %v767_v55  ;;  %974 = vst [vmem:[#allocation2 + $0x98] sm:$0x1] %v973_v56  ;;  %v372_v2 = vadd.f32 %v5021_v32, %v336_v37  ;;  %v373_v6 = vadd.f32 %v5021_v32, %v337_v52  ;;  %v5177_v37 = vld [vmem:[%s5000_s13 + $0x70] sm:$0xff]  }
  0x45   : > { %v588_v59 = vor.u32 %v586_v42, %v585_v50  ;;  %v589_v60 = vrot.slane %v585_v50, 4  ;;  %4136 = vmatpush3.bf16.msra.mxu1 %v4771_v40  ;;  %v3875_v9 = vunpack.c.l.bf16 %v3977_v53  ;;  %v3876_v21 = vunpack.c.h.bf16 %v3977_v53 }
  0x46   : > { %v596_v3 = vor.u32 %v594_v51, %v593_v57  ;;  %v598_v5 = vrot.slane %v593_v57, 4  ;;  %v5161_v13 = vsel %vm1201_vm9, %v1220_v58, %v1224_v54  ;;  %v4766_v17 = vld [vmem:[#allocation2 + $0x84] sm:$0xff]   ;;  %4137 = vmatprep.subr.bf16.mxu1 %v4774_v46  ;;  %v404_v20 = vmax.f32 %v372_v2, 0.0  ;;  %v975_v46 = vld [vmem:[#allocation2 + $0x9c] sm:$0xf] }
  0x47   : > { %v899_v19 = vsel %vm5065_vm7, %v588_v59, %v898_v15  ;;  %1774 = vmatprep.mubr.bf16.mxu0 %v5161_v13  ;;  %v4767_v23 = vld [vmem:[#allocation2 + $0x8c] ss:$0 sps:$4 sm:$0x11]   ;;  %v405_v27 = vmax.f32 %v373_v6, 0.0  ;;  %v338_v29 = vmul.f32 %v3875_v9, %v5019_v31  ;;  %v1444_v33 = vrot.slane %v4766_v17, 1  ;;  %v4790_v6 = vld [vmem:[%s6028_s2 + $0x70] sm:$0xff]  }
  0x48   : > { %v597_v25 = vsel %vm5059_vm6, %v589_v60, %v596_v3  ;;  %900 = vst [vmem:[#allocation2 + $0x18] sm:$0xf] %v899_v19  ;;  %v903_v26 = vsel %vm5051_vm5, %v598_v5, %v902_v62  ;;  %1775 = vmatmul.mubr.bf16.vlgmr.msra.gmra.mrb[0].mxu0 %v5127_v24  ;;  %v3781_v34 = vpack.c.bf16 %v404_v20, %v404_v20  ;;  %v3831_v36 = vunpack.c.l.bf16 %v3966_v12  ;;  %v4784_v24 = vld [vmem:[%s6028_s2 + $0x68] sm:$0xff]   ;;  %v979_v58 = vld [vmem:[#allocation2 + $0xa4] sm:$0x1] }
  0x49   : > { %901 = vst [vmem:[#allocation2 + $0x1c] sm:$0xf] %v597_v25  ;;  %904 = vst [vmem:[#allocation2 + $0x20] sm:$0x1] %v903_v26  ;;  %v339_v35 = vmul.f32 %v3876_v21, %v5019_v31  ;;  %4404 = vmatpush3.bf16.msra.mxu0 %v4909_v0  ;;  %v1445_v38 = vrot.slane %v4767_v23, 1  ;;  %4138 = vmatpush3.bf16.msra.mxu1 %v4775_v1  ;;  %v3782_v39 = vpack.c.bf16 %v405_v27, %v405_v27  ;;  %v4785_v5 = vld [vmem:[%s6028_s2 + $0x28] sm:$0xff]  }
  0x4a   : > { %v374_v40 = vadd.f32 %v5021_v32, %v338_v29  ;;  %v3832_v41 = vunpack.c.h.bf16 %v3966_v12  ;;  %v770_v42 = vshrl.u32 %v3781_v34, 16  ;;  %v773_v43 = vshll.u32 %v3781_v34, 16  ;;  %4139 = vmatprep.subr.bf16.mxu1 %v4780_v11  ;;  %4405 = vmatprep.subr.bf16.mxu0 %v4922_v4 }
  0x4b   : > { %v375_v44 = vadd.f32 %v5021_v32, %v339_v35  ;;  %v316_v45 = vmul.f32 %v3831_v36, %v5019_v31  ;;  %v5188_v0 = vsel %vm1410_vm8, %v1444_v33, %v1445_v38  ;;  %v4768_v48 = vld [vmem:[#allocation2 + $0x90] sm:$0xff]   ;;  %v778_v15 = vshrl.u32 %v3782_v39, 16  ;;  %v4769_v51 = vld [vmem:[#allocation2 + $0x98] ss:$0 sps:$4 sm:$0x11]  }
  0x4c   : > { %v317_v49 = vmul.f32 %v3832_v41, %v5019_v31  ;;  %v3879_v50 = vunpack.c.l.bf16 %v5177_v37  ;;  %4439 = vmatprep.mubr.bf16.mxu1 %v5188_v0  ;;  %v772_v52 = vrot.slane %v770_v42, 7  ;;  %v781_v53 = vshll.u32 %v3782_v39, 16  ;;  %v4791_v33 = vld [vmem:[%s6028_s2 + $0x30] sm:$0xff]   ;;  %v982_v39 = vld [vmem:[#allocation2 + $0xa8] sm:$0xf] }
  0x4d   : > { %v406_v54 = vmax.f32 %v374_v40, 0.0  ;;  %v352_v55 = vadd.f32 %v5021_v32, %v316_v45  ;;  %v1447_v56 = vrot.slane %v4768_v48, 1  ;;  %v780_v57 = vrot.slane %v778_v15, 7  ;;  %4140 = vmatpush3.bf16.msra.mxu1 %v4781_v30  ;;  %4406 = vmatpush3.bf16.msra.mxu0 %v4922_v4  ;;  %v986_v15 = vld [vmem:[#allocation2 + $0xb0] sm:$0x1] }
  0x4e   : > { %v407_v59 = vmax.f32 %v375_v44, 0.0  ;;  %v353_v60 = vadd.f32 %v5021_v32, %v317_v49  ;;  %v1448_v62 = vrot.slane %v4769_v51, 1  ;;  %v775_v1 = vor.u32 %v773_v43, %v772_v52  ;;  %4141 = vmatprep.subr.bf16.mxu1 %v4784_v24  ;;  %4407 = vmatprep.subr.bf16.mxu0 %v4934_v7 }
  0x4f   : > { %v776_v2 = vrot.slane %v772_v52, 4  ;;  %v3783_v3 = vpack.c.bf16 %v406_v54, %v406_v54  ;;  %v783_v11 = vor.u32 %v781_v53, %v780_v57  ;;  %v785_v12 = vrot.slane %v780_v57, 4  ;;  %v3979_v52 = vld [vmem:[%s5000_s13 + $0x78] sm:$0xff]  }
  0x50   : > { %v5203_v9 = vld [vmem:[#allocation2 + $0x18] sm:$0xff]   ;;  %v3784_v4 = vpack.c.bf16 %v407_v59, %v407_v59  ;;  %v3880_v17 = vunpack.c.h.bf16 %v5177_v37  ;;  %v5207_v19 = vsel %vm1410_vm8, %v1447_v56, %v1448_v62  ;;  %v4773_v20 = vld [vmem:[#allocation2 + $0x20] ss:$0 sps:$4 sm:$0x11]   ;;  %v976_v21 = vsel %vm5065_vm7, %v775_v1, %v975_v46 }
  0x51   : > { %v787_v23 = vshrl.u32 %v3783_v3, 16  ;;  %v790_v25 = vshll.u32 %v3783_v3, 16  ;;  %4440 = vmatmul.mubr.bf16.gmra.mrb[4].mxu1 %v5207_v19  ;;  %v1227_v26 = vshrl.u32 %v5203_v9, 16  ;;  %v1229_v27 = vshll.u32 %v5203_v9, 16  ;;  %977 = vst [vmem:[#allocation2 + $0x9c] sm:$0xf] %v976_v21  ;;  %4408 = vmatpush3.bf16.msra.mxu0 %v4934_v7 }
  0x52   : > { %v784_v29 = vsel %vm5059_vm6, %v776_v2, %v783_v11  ;;  %v980_v30 = vsel %vm5051_vm5, %v785_v12, %v979_v58  ;;  %v1234_v34 = vshll.u32 %v4773_v20, 16  ;;  %v795_v36 = vshrl.u32 %v3784_v4, 16  ;;  %4142 = vmatpush3.bf16.msra.mxu1 %v4785_v5  ;;  %4409 = vmatprep.subr.bf16.mxu0 %v4947_v10  ;;  %v4794_v7 = vld [vmem:[%s6028_s2 + $0x78] sm:$0xff]   ;;  %v5246_v62 = vld [vmem:[%s6028_s2 + $0x80] sm:$0xff]  }
  0x53   : > { %978 = vst [vmem:[#allocation2 + $0xa0] sm:$0xf] %v784_v29  ;;  %981 = vst [vmem:[#allocation2 + $0xa4] sm:$0x1] %v980_v30  ;;  %v789_v35 = vrot.slane %v787_v23, 7  ;;  %v798_v37 = vshll.u32 %v3784_v4, 16  ;;  %v340_v24 = vmul.f32 %v3879_v50, %v5019_v31  ;;  %4143 = vmatprep.subr.bf16.mxu1 %v4790_v6  ;;  %v341_v51 = vmul.f32 %v3880_v17, %v5019_v31 }
  0x54   : > { %v1231_v38 = vrot.slane %v1229_v27, 1  ;;  %v384_v40 = vmax.f32 %v352_v55, 0.0  ;;  %v385_v41 = vmax.f32 %v353_v60, 0.0  ;;  %v1236_v42 = vrot.slane %v1234_v34, 1  ;;  %v5234_v56 = vld [vmem:[%s5000_s13 + $0x18] sm:$0xff]  }
  0x55   : > { %v792_v43 = vor.u32 %v790_v25, %v789_v35  ;;  %v793_v44 = vrot.slane %v789_v35, 4  ;;  %v797_v45 = vrot.slane %v795_v36, 7  ;;  %4410 = vmatpush3.bf16.msra.mxu0 %v4947_v10  ;;  %v376_v55 = vadd.f32 %v5021_v32, %v340_v24  ;;  %v4795_v57 = vld [vmem:[%s6028_s2 + $0x38] sm:$0xff]   ;;  %v905_v5 = vld [vmem:[#allocation2 + $0x24] sm:$0xf] }
  0x56   : > { %v1232_v48 = vor.u32 %v1231_v38, %v1227_v26  ;;  %v3761_v46 = vpack.c.bf16 %v384_v40, %v384_v40  ;;  %v3762_v49 = vpack.c.bf16 %v385_v41, %v385_v41  ;;  %4144 = vmatpush3.bf16.msra.mxu1 %v4791_v33  ;;  %4411 = vmatprep.subr.bf16.mxu0 %v4962_v14  ;;  %v909_v4 = vld [vmem:[#allocation2 + $0x2c] sm:$0x1]  ;;  %v3883_v17 = vunpack.c.l.bf16 %v3979_v52 }
  0x57   : > { %v800_v50 = vor.u32 %v798_v37, %v797_v45  ;;  %v802_v53 = vrot.slane %v797_v45, 4  ;;  %v983_v54 = vsel %vm5065_vm7, %v792_v43, %v982_v39  ;;  %4145 = vmatprep.subr.bf16.mxu1 %v4794_v7  ;;  %v377_v6 = vadd.f32 %v5021_v32, %v341_v51  ;;  %v3968_v7 = vld [vmem:[%s5000_s13 + $0x20] sm:$0xff]  }
  0x58   : > { %v5241_v58 = vsel %vm1201_vm9, %v1232_v48, %v1236_v42  ;;  %984 = vst [vmem:[#allocation2 + $0xa8] sm:$0xf] %v983_v54  ;;  %v600_v10 = vshrl.u32 %v3761_v46, 16  ;;  %v603_v59 = vshll.u32 %v3761_v46, 16  ;;  %v608_v60 = vshrl.u32 %v3762_v49, 16 }
  0x59   : > { %1782 = vmatprep.mubr.bf16.mxu0 %v5241_v58  ;;  %v801_v1 = vsel %vm5059_vm6, %v793_v44, %v800_v50  ;;  %v987_v2 = vsel %vm5051_vm5, %v802_v53, %v986_v15  ;;  %v611_v3 = vshll.u32 %v3762_v49, 16  ;;  %v3884_v20 = vunpack.c.h.bf16 %v3979_v52  ;;  %4412 = vmatpush3.bf16.msra.mxu0 %v4962_v14  ;;  %v989_v49 = vld [vmem:[#allocation2 + $0xb4] sm:$0xf]  ;;  %v993_v53 = vld [vmem:[#allocation2 + $0xbc] sm:$0x1] }
  0x5a   : > { %1783 = vmatmul.mubr.bf16.gmra.mrb[4].mxu0 %v5203_v9  ;;  %v5255_v11 = vld [vmem:[#allocation2 + $0x9c] sm:$0xff]   ;;  %985 = vst [vmem:[#allocation2 + $0xac] sm:$0xf] %v801_v1  ;;  %988 = vst [vmem:[#allocation2 + $0xb0] sm:$0x1] %v987_v2  ;;  %v602_v12 = vrot.slane %v600_v10, 7  ;;  %v3835_v21 = vunpack.c.l.bf16 %v5234_v56  ;;  %v3836_v29 = vunpack.c.h.bf16 %v5234_v56  ;;  %4146 = vmatpush3.bf16.msra.mxu1 %v4795_v57  ;;  %v342_v35 = vmul.f32 %v3883_v17, %v5019_v31 }
  0x5b   : > { %v5258_v23 = vld [vmem:[#allocation2 + $0xa4] ss:$0 sps:$4 sm:$0x11]   ;;  %v610_v25 = vrot.slane %v608_v60, 7  ;;  %v408_v26 = vmax.f32 %v376_v55, 0.0  ;;  %v409_v27 = vmax.f32 %v377_v6, 0.0  ;;  %4451 = vmatprep.subr.bf16.mxu1 %v5246_v62  ;;  %4413 = vmatprep.subr.bf16.mxu0 %v4979_v18  ;;  %v343_v14 = vmul.f32 %v3884_v20, %v5019_v31 }
  0x5c   : > { %v1450_v30 = vrot.slane %v5255_v11, 1  ;;  %v605_v33 = vor.u32 %v603_v59, %v602_v12  ;;  %v606_v34 = vrot.slane %v602_v12, 4  ;;  %v1451_v36 = vrot.slane %v5258_v23, 1 }
  0x5d   : > { %v613_v37 = vor.u32 %v611_v3, %v610_v25  ;;  %v615_v38 = vrot.slane %v610_v25, 4  ;;  %v3785_v39 = vpack.c.bf16 %v408_v26, %v408_v26  ;;  %v3786_v41 = vpack.c.bf16 %v409_v27, %v409_v27  ;;  %4414 = vmatpush3.bf16.msra.mxu0 %v4979_v18  ;;  %v5300_v27 = vld [vmem:[%s5000_s13 + $0x28] sm:$0xff]  }
  0x5e   : > { %v906_v40 = vsel %vm5065_vm7, %v605_v33, %v905_v5  ;;  %v378_v24 = vadd.f32 %v5021_v32, %v342_v35  ;;  %v5273_v42 = vsel %vm1410_vm8, %v1450_v30, %v1451_v36  ;;  %v379_v51 = vadd.f32 %v5021_v32, %v343_v14  ;;  %4415 = vmatprep.subr.bf16.mxu0 %v4993_v22  ;;  %v4840_v5 = vld [vmem:[%s6028_s2 + $0x170] sm:$0xff]   ;;  %v996_v36 = vld [vmem:[#allocation2 + $0xc0] sm:$0xf] }
  0x5f   : > { %v614_v43 = vsel %vm5059_vm6, %v606_v34, %v613_v37  ;;  %907 = vst [vmem:[#allocation2 + $0x24] sm:$0xf] %v906_v40  ;;  %v910_v44 = vsel %vm5051_vm5, %v615_v38, %v909_v4  ;;  %v804_v45 = vshrl.u32 %v3785_v39, 16  ;;  %4443 = vmatprep.mubr.bf16.mxu1 %v5273_v42  ;;  %v807_v48 = vshll.u32 %v3785_v39, 16  ;;  %v4841_v40 = vld [vmem:[%s6028_s2 + $0x178] sm:$0xff]  }
  0x60   : > { %908 = vst [vmem:[#allocation2 + $0x28] sm:$0xf] %v614_v43  ;;  %911 = vst [vmem:[#allocation2 + $0x2c] sm:$0x1] %v910_v44  ;;  %v812_v15 = vshrl.u32 %v3786_v41, 16  ;;  %v815_v46 = vshll.u32 %v3786_v41, 16  ;;  %v318_v54 = vmul.f32 %v3835_v21, %v5019_v31  ;;  %v319_v18 = vmul.f32 %v3836_v29, %v5019_v31 }
  0x61   : > { %v5283_v52 = vld [vmem:[#allocation2 + $0xa8] sm:$0xff]   ;;  %v806_v50 = vrot.slane %v804_v45, 7  ;;  %v3839_v55 = vunpack.c.l.bf16 %v3968_v7  ;;  %v5287_v56 = vld [vmem:[#allocation2 + $0xb0] ss:$0 sps:$4 sm:$0x11]   ;;  %v410_v10 = vmax.f32 %v378_v24, 0.0  ;;  %v3840_v60 = vunpack.c.h.bf16 %v3968_v7  ;;  %4416 = vmatpush3.bf16.msra.mxu0 %v4840_v5 }
  0x62   : > { %v814_v57 = vrot.slane %v812_v15, 7  ;;  %v411_v59 = vmax.f32 %v379_v51, 0.0  ;;  %v1453_v1 = vrot.slane %v5283_v52, 1  ;;  %v354_v3 = vadd.f32 %v5021_v32, %v318_v54  ;;  %4417 = vmatprep.subr.bf16.mxu0 %v5017_v28 }
  0x63   : > { %v809_v2 = vor.u32 %v807_v48, %v806_v50  ;;  %v810_v22 = vrot.slane %v806_v50, 4  ;;  %v1454_v6 = vrot.slane %v5287_v56, 1  ;;  %v3787_v17 = vpack.c.bf16 %v410_v10, %v410_v10  ;;  %v1000_v48 = vld [vmem:[#allocation2 + $0xc8] sm:$0x1] }
  0x64   : > { %v817_v12 = vor.u32 %v815_v46, %v814_v57  ;;  %v819_v4 = vrot.slane %v814_v57, 4  ;;  %v3788_v21 = vpack.c.bf16 %v411_v59, %v411_v59  ;;  %v355_v25 = vadd.f32 %v5021_v32, %v319_v18  ;;  %v912_v18 = vld [vmem:[#allocation2 + $0x30] sm:$0xf] }
  0x65   : > { %v990_v20 = vsel %vm5065_vm7, %v809_v2, %v989_v49  ;;  %v386_v26 = vmax.f32 %v354_v3, 0.0  ;;  %v5303_v29 = vsel %vm1410_vm8, %v1453_v1, %v1454_v6  ;;  %v821_v28 = vshrl.u32 %v3787_v17, 16  ;;  %4418 = vmatpush3.bf16.msra.mxu0 %v4841_v40  ;;  %v4813_v49 = vld [vmem:[%s6028_s2 + $0x1c0] sm:$0xff]  }
  0x66   : > { %v818_v30 = vsel %vm5059_vm6, %v810_v22, %v817_v12  ;;  %991 = vst [vmem:[#allocation2 + $0xb4] sm:$0xf] %v990_v20  ;;  %v994_v33 = vsel %vm5051_vm5, %v819_v4, %v993_v53  ;;  %4444 = vmatmul.mubr.bf16.gmra.mrb[8].mxu1 %v5303_v29  ;;  %v824_v35 = vshll.u32 %v3787_v17, 16  ;;  %v320_v38 = vmul.f32 %v3839_v55, %v5019_v31  ;;  %v5326_v55 = vld [vmem:[#allocation2 + $0x8] ss:$0 sps:$4 sm:$0x11]  }
  0x67   : > { %v5310_v34 = vld [vmem:[#allocation2 + $0x24] sm:$0xff]   ;;  %992 = vst [vmem:[#allocation2 + $0xb8] sm:$0xf] %v818_v30  ;;  %995 = vst [vmem:[#allocation2 + $0xbc] sm:$0x1] %v994_v33  ;;  %v3763_v37 = vpack.c.bf16 %v386_v26, %v386_v26  ;;  %v321_v39 = vmul.f32 %v3840_v60, %v5019_v31  ;;  %v823_v14 = vrot.slane %v821_v28, 7  ;;  %v3843_v43 = vunpack.c.l.bf16 %v5300_v27  ;;  %4267 = vmatprep.subr.bf16.mxu0 %v4813_v49 }
  0x68   : > { %v5317_v41 = vld [vmem:[#allocation2 + $0x2c] ss:$0 sps:$4 sm:$0x11]   ;;  %v829_v24 = vshrl.u32 %v3788_v21, 16  ;;  %v832_v7 = vshll.u32 %v3788_v21, 16  ;;  %v1239_v44 = vshrl.u32 %v5310_v34, 16  ;;  %v356_v33 = vadd.f32 %v5021_v32, %v320_v38 }
  0x69   : > { %v1241_v45 = vshll.u32 %v5310_v34, 16  ;;  %v387_v15 = vmax.f32 %v355_v25, 0.0  ;;  %v617_v46 = vshrl.u32 %v3763_v37, 16  ;;  %v1246_v51 = vshll.u32 %v5317_v41, 16  ;;  %v5328_v1 = vld [vmem:[#allocation2] sm:$0xff]  }
  0x6a   : > { %v826_v50 = vor.u32 %v824_v35, %v823_v14  ;;  %v827_v53 = vrot.slane %v823_v14, 4  ;;  %v831_v54 = vrot.slane %v829_v24, 7  ;;  %v620_v60 = vshll.u32 %v3763_v37, 16  ;;  %v916_v30 = vld [vmem:[#allocation2 + $0x38] sm:$0x1] }
  0x6b   : > { %v1243_v57 = vrot.slane %v1241_v45, 1  ;;  %v3764_v10 = vpack.c.bf16 %v387_v15, %v387_v15  ;;  %v619_v59 = vrot.slane %v617_v46, 7  ;;  %v1248_v2 = vrot.slane %v1246_v51, 1 }
  0x6c   : > { %v834_v22 = vor.u32 %v832_v7, %v831_v54  ;;  %v836_v3 = vrot.slane %v831_v54, 4  ;;  %v997_v5 = vsel %vm5065_vm7, %v826_v50, %v996_v36  ;;  %v1203_v40 = vshrl.u32 %v5328_v1, 16 }
  0x6d   : > { %v1244_v6 = vor.u32 %v1243_v57, %v1239_v44  ;;  %998 = vst [vmem:[#allocation2 + $0xc0] sm:$0xf] %v997_v5  ;;  %v622_v12 = vor.u32 %v620_v60, %v619_v59  ;;  %v623_v4 = vrot.slane %v619_v59, 4  ;;  %v625_v17 = vshrl.u32 %v3764_v10, 16 }
  0x6e   : > { %v5332_v20 = vld [vmem:[#allocation2 + $0xb4] sm:$0xff]   ;;  %v835_v21 = vsel %vm5059_vm6, %v827_v53, %v834_v22  ;;  %v1001_v25 = vsel %vm5051_vm5, %v836_v3, %v1000_v48  ;;  %v628_v26 = vshll.u32 %v3764_v10, 16  ;;  %v5342_v35 = vld [vmem:[#allocation2 + $0xbc] ss:$0 sps:$4 sm:$0x11]   ;;  %v1205_v38 = vshll.u32 %v5328_v1, 16 }
  0x6f   : > { %v5340_v28 = vsel %vm1201_vm9, %v1244_v6, %v1248_v2  ;;  %999 = vst [vmem:[#allocation2 + $0xc4] sm:$0xf] %v835_v21  ;;  %1002 = vst [vmem:[#allocation2 + $0xc8] sm:$0x1] %v1001_v25  ;;  %v627_v36 = vrot.slane %v625_v17, 7  ;;  %v913_v37 = vsel %vm5065_vm7, %v622_v12, %v912_v18  ;;  %v1456_v14 = vrot.slane %v5332_v20, 1 }
  0x70   : > { %1790 = vmatprep.mubr.bf16.mxu0 %v5340_v28  ;;  %914 = vst [vmem:[#allocation2 + $0x30] sm:$0xf] %v913_v37  ;;  %v1210_v24 = vshll.u32 %v5326_v55, 16  ;;  %v357_v7 = vadd.f32 %v5021_v32, %v321_v39  ;;  %v1457_v44 = vrot.slane %v5342_v35, 1  ;;  %v388_v15 = vmax.f32 %v356_v33, 0.0  ;;  %v3970_v53 = vld [vmem:[%s5000_s13 + $0x30] sm:$0xff]  }
  0x71   : > { %1791 = vmatmul.mubr.bf16.gmra.mrb[8].mxu0 %v5310_v34  ;;  %v630_v45 = vor.u32 %v628_v26, %v627_v36  ;;  %v632_v48 = vrot.slane %v627_v36, 4  ;;  %v1207_v46 = vrot.slane %v1205_v38, 1  ;;  %v3844_v50 = vunpack.c.h.bf16 %v5300_v27  ;;  %v5364_v10 = vld [vmem:[%s5000_s13 + $0x38] sm:$0xff]  }
  0x72   : > { %v1212_v49 = vrot.slane %v1210_v24, 1  ;;  %v389_v51 = vmax.f32 %v357_v7, 0.0  ;;  %v5357_v54 = vsel %vm1410_vm8, %v1456_v14, %v1457_v44  ;;  %v3765_v57 = vpack.c.bf16 %v388_v15, %v388_v15  ;;  %v919_v25 = vld [vmem:[#allocation2 + $0x3c] sm:$0xf]  ;;  %v923_v24 = vld [vmem:[#allocation2 + $0x44] sm:$0x1] }
  0x73   : > { %v631_v18 = vsel %vm5059_vm6, %v623_v4, %v630_v45  ;;  %v917_v39 = vsel %vm5051_vm5, %v632_v48, %v916_v30  ;;  %4447 = vmatprep.mubr.bf16.mxu1 %v5357_v54  ;;  %v1208_v59 = vor.u32 %v1207_v46, %v1203_v40  ;;  %v322_v2 = vmul.f32 %v3843_v43, %v5019_v31 }
  0x74   : > { %915 = vst [vmem:[#allocation2 + $0x34] sm:$0xf] %v631_v18  ;;  %918 = vst [vmem:[#allocation2 + $0x38] sm:$0x1] %v917_v39  ;;  %v3766_v60 = vpack.c.bf16 %v389_v51, %v389_v51  ;;  %v323_v22 = vmul.f32 %v3844_v50, %v5019_v31  ;;  %v634_v3 = vshrl.u32 %v3765_v57, 16  ;;  %v637_v5 = vshll.u32 %v3765_v57, 16 }
  0x75   : > { %v3847_v6 = vunpack.c.l.bf16 %v3970_v53  ;;  %v3848_v12 = vunpack.c.h.bf16 %v3970_v53  ;;  %v1213_v17 = vsel %vm1201_vm9, %v1208_v59, %v1212_v49  ;;  %v358_v26 = vadd.f32 %v5021_v32, %v322_v2 }
  0x76   : > { %v5371_v4 = vld [vmem:[#allocation2 + $0xc0] sm:$0xff]   ;;  %v642_v21 = vshrl.u32 %v3766_v60, 16  ;;  %v359_v30 = vadd.f32 %v5021_v32, %v323_v22  ;;  %v5376_v33 = vld [vmem:[#allocation2 + $0xc8] ss:$0 sps:$4 sm:$0x11]   ;;  %v636_v27 = vrot.slane %v634_v3, 7  ;;  %v3851_v37 = vunpack.c.l.bf16 %v5364_v10 }
  0x77   : > { %v324_v43 = vmul.f32 %v3847_v6, %v5019_v31  ;;  %v325_v36 = vmul.f32 %v3848_v12, %v5019_v31  ;;  %v1545_v40 = vrot.slane %v5371_v4, 1  ;;  %v645_v38 = vshll.u32 %v3766_v60, 16 }
  0x78   : > { %v644_v14 = vrot.slane %v642_v21, 7  ;;  %v390_v7 = vmax.f32 %v358_v26, 0.0  ;;  %v1546_v44 = vrot.slane %v5376_v33, 1  ;;  %v639_v45 = vor.u32 %v637_v5, %v636_v27  ;;  %v926_v26 = vld [vmem:[#allocation2 + $0x48] sm:$0xf] }
  0x79   : > { %v640_v48 = vrot.slane %v636_v27, 4  ;;  %v391_v15 = vmax.f32 %v359_v30, 0.0  ;;  %v360_v50 = vadd.f32 %v5021_v32, %v324_v43  ;;  %v361_v59 = vadd.f32 %v5021_v32, %v325_v36 }
  0x7a   : > { %v647_v46 = vor.u32 %v645_v38, %v644_v14  ;;  %v649_v49 = vrot.slane %v644_v14, 4  ;;  %v3767_v51 = vpack.c.bf16 %v390_v7, %v390_v7  ;;  %v5385_v53 = vsel %vm1410_vm8, %v1545_v40, %v1546_v44 }
  0x7b   : > { %v5387_v18 = vld [vmem:[#allocation2 + $0x30] sm:$0xff]   ;;  %v920_v39 = vsel %vm5065_vm7, %v639_v45, %v919_v25  ;;  %v3768_v57 = vpack.c.bf16 %v391_v15, %v391_v15  ;;  %4448 = vmatmul.mubr.bf16.gmra.mrb[12].mxu1 %v5385_v53  ;;  %v5393_v60 = vld [vmem:[#allocation2 + $0x38] ss:$0 sps:$4 sm:$0x11]   ;;  %v392_v43 = vmax.f32 %v360_v50, 0.0  ;;  %v393_v36 = vmax.f32 %v361_v59, 0.0 }
  0x7c   : > { %v648_v2 = vsel %vm5059_vm6, %v640_v48, %v647_v46  ;;  %921 = vst [vmem:[#allocation2 + $0x3c] sm:$0xf] %v920_v39  ;;  %v924_v22 = vsel %vm5051_vm5, %v649_v49, %v923_v24  ;;  %v651_v3 = vshrl.u32 %v3767_v51, 16  ;;  %v654_v5 = vshll.u32 %v3767_v51, 16  ;;  %2240 = vmatprep.mubr.bf16.mxu1 %v1213_v17  ;;  %v930_v17 = vld [vmem:[#allocation2 + $0x50] sm:$0x1] }
  0x7d   : > { %v1251_v6 = vshrl.u32 %v5387_v18, 16  ;;  %v1253_v12 = vshll.u32 %v5387_v18, 16  ;;  %922 = vst [vmem:[#allocation2 + $0x40] sm:$0xf] %v648_v2  ;;  %925 = vst [vmem:[#allocation2 + $0x44] sm:$0x1] %v924_v22  ;;  %v3852_v38 = vunpack.c.h.bf16 %v5364_v10  ;;  %v326_v24 = vmul.f32 %v3851_v37, %v5019_v31 }
  0x7e   : > { %v659_v21 = vshrl.u32 %v3768_v57, 16  ;;  %v662_v25 = vshll.u32 %v3768_v57, 16  ;;  %v1258_v30 = vshll.u32 %v5393_v60, 16  ;;  %v653_v27 = vrot.slane %v651_v3, 7  ;;  %v4805_v50 = vld [vmem:[%s6028_s2 + $0x88] sm:$0xff]  }
  0x7f   : > { %v1255_v40 = vrot.slane %v1253_v12, 1  ;;  %v3769_v48 = vpack.c.bf16 %v392_v43, %v392_v43  ;;  %v3770_v51 = vpack.c.bf16 %v393_v36, %v393_v36  ;;  %v327_v37 = vmul.f32 %v3852_v38, %v5019_v31  ;;  %v937_v12 = vld [vmem:[#allocation2 + $0x5c] sm:$0x1] }
  0x80   : > { %v661_v14 = vrot.slane %v659_v21, 7  ;;  %v1260_v7 = vrot.slane %v1258_v30, 1  ;;  %v656_v44 = vor.u32 %v654_v5, %v653_v27  ;;  %v657_v45 = vrot.slane %v653_v27, 4  ;;  %v933_v5 = vld [vmem:[#allocation2 + $0x54] sm:$0xf] }
  0x81   : > { %v1256_v15 = vor.u32 %v1255_v40, %v1251_v6  ;;  %v668_v57 = vshrl.u32 %v3769_v48, 16  ;;  %v671_v10 = vshll.u32 %v3769_v48, 16  ;;  %v676_v3 = vshrl.u32 %v3770_v51, 16 }
  0x82   : > { %v664_v46 = vor.u32 %v662_v25, %v661_v14  ;;  %v666_v49 = vrot.slane %v661_v14, 4  ;;  %v927_v39 = vsel %vm5065_vm7, %v656_v44, %v926_v26  ;;  %v362_v21 = vadd.f32 %v5021_v32, %v326_v24 }
  0x83   : > { %v5411_v59 = vsel %vm1201_vm9, %v1256_v15, %v1260_v7  ;;  %928 = vst [vmem:[#allocation2 + $0x48] sm:$0xf] %v927_v39  ;;  %2241 = vmatmul.mubr.bf16.vlgmr.msra.gmra.mrb[16].mxu1 %v5328_v1  ;;  %v670_v31 = vrot.slane %v668_v57, 7  ;;  %v363_v25 = vadd.f32 %v5021_v32, %v327_v37  ;;  %v678_v30 = vrot.slane %v676_v3, 7  ;;  %v4808_v32 = vld [vmem:[%s6028_s2 + $0x90] sm:$0xff]   ;;  %v4809_v39 = vld [vmem:[%s6028_s2 + $0x98] sm:$0xff]  }
  0x84   : > { %v665_v2 = vsel %vm5059_vm6, %v657_v45, %v664_v46  ;;  %v931_v22 = vsel %vm5051_vm5, %v666_v49, %v930_v17  ;;  %1798 = vmatprep.mubr.bf16.mxu0 %v5411_v59  ;;  %v5419_v6 = vld [vmem:[#allocation2 + $0x3c] sm:$0xff]   ;;  %v5424_v26 = vld [vmem:[#allocation2 + $0x44] ss:$0 sps:$4 sm:$0x11]   ;;  %4452 = vmatpush3.bf16.msra.mxu1 %v5246_v62  ;;  %v679_v27 = vshll.u32 %v3770_v51, 16  ;;  %v394_v62 = vmax.f32 %v362_v21, 0.0 }
  0x85   : > { %929 = vst [vmem:[#allocation2 + $0x4c] sm:$0xf] %v665_v2  ;;  %932 = vst [vmem:[#allocation2 + $0x50] sm:$0x1] %v931_v22  ;;  %1799 = vmatmul.mubr.bf16.gmra.mrb[12].mxu0 %v5387_v18  ;;  %v1263_v43 = vshrl.u32 %v5419_v6, 16  ;;  %v1265_v36 = vshll.u32 %v5419_v6, 16  ;;  %2248 = vmatprep.mubr.bf16.mxu1 %v5161_v13  ;;  %v673_v40 = vor.u32 %v671_v10, %v670_v31 }
  0x86   : > { %v674_v14 = vrot.slane %v670_v31, 4  ;;  %4453 = vmatprep.subr.bf16.mxu1 %v4805_v50  ;;  %v1270_v38 = vshll.u32 %v5424_v26, 16  ;;  %v681_v24 = vor.u32 %v679_v27, %v678_v30  ;;  %v683_v7 = vrot.slane %v678_v30, 4  ;;  %v5448_v2 = vld [vmem:[#allocation2 + $0xc] sm:$0xff]   ;;  %v940_v31 = vld [vmem:[#allocation2 + $0x60] sm:$0xf] }
  0x87   : > { %v1267_v44 = vrot.slane %v1265_v36, 1  ;;  %v934_v45 = vsel %vm5065_vm7, %v673_v40, %v933_v5  ;;  %v395_v17 = vmax.f32 %v363_v25, 0.0  ;;  %v3771_v46 = vpack.c.bf16 %v394_v62, %v394_v62 }
  0x88   : > { %v1272_v48 = vrot.slane %v1270_v38, 1  ;;  %v682_v13 = vsel %vm5059_vm6, %v674_v14, %v681_v24  ;;  %935 = vst [vmem:[#allocation2 + $0x54] sm:$0xf] %v934_v45  ;;  %v938_v15 = vsel %vm5051_vm5, %v683_v7, %v937_v12  ;;  %4454 = vmatpush3.bf16.msra.mxu1 %v4805_v50  ;;  %v4810_v38 = vld [vmem:[%s6028_s2 + $0xa0] sm:$0xff]  }
  0x89   : > { %v1268_v49 = vor.u32 %v1267_v44, %v1263_v43  ;;  %936 = vst [vmem:[#allocation2 + $0x58] sm:$0xf] %v682_v13  ;;  %939 = vst [vmem:[#allocation2 + $0x5c] sm:$0x1] %v938_v15  ;;  %v3772_v51 = vpack.c.bf16 %v395_v17, %v395_v17  ;;  %4455 = vmatprep.subr.bf16.mxu1 %v4808_v32  ;;  %v685_v10 = vshrl.u32 %v3771_v46, 16  ;;  %v688_v22 = vshll.u32 %v3771_v46, 16 }
  0x8a   : > { %v944_v43 = vld [vmem:[#allocation2 + $0x68] sm:$0x1] }
  0x8b   : > { %v5446_v37 = vsel %vm1201_vm9, %v1268_v49, %v1272_v48  ;;  %2249 = vmatmul.mubr.bf16.gmra.mrb[20].mxu1 %v5448_v2  ;;  %v693_v3 = vshrl.u32 %v3772_v51, 16  ;;  %v696_v5 = vshll.u32 %v3772_v51, 16  ;;  %v687_v25 = vrot.slane %v685_v10, 7  ;;  %v4811_v15 = vld [vmem:[%s6028_s2 + $0xa8] sm:$0xff]   ;;  %v4812_v10 = vld [vmem:[%s6028_s2 + $0xb0] sm:$0xff]  }
  0x8c   : > { %v5443_v57 = vld [vmem:[#allocation2 + $0x48] sm:$0xff]   ;;  %v5451_v50 = vld [vmem:[#allocation2 + $0x50] ss:$0 sps:$4 sm:$0x11]   ;;  %1806 = vmatprep.mubr.bf16.mxu0 %v5446_v37  ;;  %2256 = vmatprep.mubr.bf16.mxu1 %v5241_v58 }
  0x8d   : > { %v1275_v12 = vshrl.u32 %v5443_v57, 16  ;;  %v1277_v21 = vshll.u32 %v5443_v57, 16  ;;  %1807 = vmatmul.mubr.bf16.gmra.mrb[16].mxu0 %v5419_v6  ;;  %v1282_v30 = vshll.u32 %v5451_v50, 16  ;;  %v695_v27 = vrot.slane %v693_v3, 7  ;;  %4456 = vmatpush3.bf16.msra.mxu1 %v4808_v32 }
  0x8e   : > { %v690_v40 = vor.u32 %v688_v22, %v687_v25  ;;  %v691_v14 = vrot.slane %v687_v25, 4  ;;  %4457 = vmatprep.subr.bf16.mxu1 %v4809_v39  ;;  %v5488_v22 = vld [vmem:[#allocation2 + $0x6c] sm:$0xff]  }
  0x8f   : > { %v1279_v36 = vrot.slane %v1277_v21, 1  ;;  %v1284_v24 = vrot.slane %v1282_v30, 1  ;;  %v698_v7 = vor.u32 %v696_v5, %v695_v27  ;;  %v700_v62 = vrot.slane %v695_v27, 4  ;;  %v4821_v21 = vld [vmem:[%s6028_s2 + $0xb8] sm:$0xff]  }
  0x90   : > { %v5462_v45 = vld [vmem:[#allocation2 + $0x54] sm:$0xff]   ;;  %v941_v17 = vsel %vm5065_vm7, %v690_v40, %v940_v31  ;;  %v5466_v48 = vld [vmem:[#allocation2 + $0x5c] ss:$0 sps:$4 sm:$0x11]   ;;  %v1313_v3 = vshll.u32 %v5488_v22, 16 }
  0x91   : > { %v1280_v44 = vor.u32 %v1279_v36, %v1275_v12  ;;  %v699_v32 = vsel %vm5059_vm6, %v691_v14, %v698_v7  ;;  %942 = vst [vmem:[#allocation2 + $0x60] sm:$0xf] %v941_v17  ;;  %v945_v13 = vsel %vm5051_vm5, %v700_v62, %v944_v43  ;;  %4458 = vmatpush3.bf16.msra.mxu1 %v4809_v39  ;;  %v1287_v16 = vshrl.u32 %v5462_v45, 16  ;;  %v4844_v43 = vld [vmem:[#allocation2 + $0x74] ss:$0 sps:$4 sm:$0x11]  }
  0x92   : > { %v1289_v49 = vshll.u32 %v5462_v45, 16  ;;  %943 = vst [vmem:[#allocation2 + $0x64] sm:$0xf] %v699_v32  ;;  %946 = vst [vmem:[#allocation2 + $0x68] sm:$0x1] %v945_v13  ;;  %4459 = vmatprep.subr.bf16.mxu1 %v4810_v38  ;;  %v1294_v63 = vshll.u32 %v5466_v48, 16 }
  0x93   : > { %v5476_v46 = vsel %vm1201_vm9, %v1280_v44, %v1284_v24  ;;  %2257 = vmatmul.mubr.bf16.gmra.mrb[24].mxu1 %v5203_v9  ;;  %v1311_v12 = vshrl.u32 %v5488_v22, 16  ;;  %v1315_v27 = vrot.slane %v1313_v3, 1  ;;  %v1318_v36 = vshll.u32 %v4844_v43, 16  ;;  %v5512_v24 = vld [vmem:[%s6028_s2 + $0x200] sm:$0xff]   ;;  %v5514_v17 = vld [vmem:[#allocation2 + $0x78] sm:$0xff]  }
  0x94   : > { %1814 = vmatprep.mubr.bf16.mxu0 %v5476_v46  ;;  %v1291_v8 = vrot.slane %v1289_v49, 1  ;;  %2264 = vmatprep.mubr.bf16.mxu1 %v5340_v28  ;;  %v1296_v51 = vrot.slane %v1294_v63, 1  ;;  %v1325_v32 = vshll.u32 %v5514_v17, 16  ;;  %v4846_v63 = vld [vmem:[#allocation2 + $0x80] ss:$0 sps:$4 sm:$0x11]  }
  0x95   : > { %1815 = vmatmul.mubr.bf16.gmra.mrb[20].mxu0 %v5443_v57  ;;  %4460 = vmatpush3.bf16.msra.mxu1 %v4810_v38  ;;  %v1316_v62 = vor.u32 %v1315_v27, %v1311_v12  ;;  %v1320_v44 = vrot.slane %v1318_v36, 1  ;;  %v5531_v3 = vld [vmem:[#allocation2 + $0x84] sm:$0xff]  }
  0x96   : > { %v1292_v39 = vor.u32 %v1291_v8, %v1287_v16  ;;  %4461 = vmatprep.subr.bf16.mxu1 %v4811_v15  ;;  %v1323_v16 = vshrl.u32 %v5514_v17, 16  ;;  %v1327_v49 = vrot.slane %v1325_v32, 1  ;;  %v1330_v8 = vshll.u32 %v4846_v63, 16  ;;  %v4850_v32 = vld [vmem:[#allocation2 + $0x98] ss:$0 sps:$4 sm:$0x11]  }
  0x97   : > { %v1337_v12 = vshll.u32 %v5531_v3, 16  ;;  %v1335_v27 = vshrl.u32 %v5531_v3, 16 }
  0x98   : > { %v5492_v9 = vsel %vm1201_vm9, %v1292_v39, %v1296_v51  ;;  %v1411_v51 = vrot.slane %v5328_v1, 1  ;;  %v1328_v39 = vor.u32 %v1327_v49, %v1323_v16  ;;  %v4848_v1 = vld [vmem:[#allocation2 + $0x8c] ss:$0 sps:$4 sm:$0x11]   ;;  %v1354_v16 = vshll.u32 %v4850_v32, 16 }
  0x99   : > { %1822 = vmatprep.mubr.bf16.mxu0 %v5492_v9  ;;  %v5495_v5 = vld [vmem:[#allocation2 + $0x60] sm:$0xff]   ;;  %4462 = vmatpush3.bf16.msra.mxu1 %v4811_v15  ;;  %v5497_v31 = vld [vmem:[#allocation2 + $0x68] ss:$0 sps:$4 sm:$0x11]   ;;  %v5524_v15 = vsel %vm1201_vm9, %v1316_v62, %v1320_v44  ;;  %v1339_v43 = vrot.slane %v1337_v12, 1  ;;  %v1342_v36 = vshll.u32 %v4848_v1, 16 }
  0x9a   : > { %4463 = vmatprep.subr.bf16.mxu1 %v4812_v10  ;;  %v1299_v25 = vshrl.u32 %v5495_v5, 16  ;;  %v1301_v30 = vshll.u32 %v5495_v5, 16  ;;  %v1306_v40 = vshll.u32 %v5497_v31, 16  ;;  %v1356_v63 = vrot.slane %v1354_v16, 1 }
  0x9b   : > { %2265 = vmatmul.mubr.bf16.gmra.mrb[28].mxu1 %v5310_v34  ;;  %v1366_v12 = vshll.u32 %v5258_v23, 16  ;;  %v1378_v23 = vshll.u32 %v5287_v56, 16  ;;  %v1383_v32 = vshrl.u32 %v5332_v20, 16  ;;  %v1390_v56 = vshll.u32 %v5342_v35, 16 }
  0x9c   : > { %2272 = vmatprep.mubr.bf16.mxu1 %v5411_v59  ;;  %v1303_v14 = vrot.slane %v1301_v30, 1  ;;  %v1308_v38 = vrot.slane %v1306_v40, 1  ;;  %v1344_v40 = vrot.slane %v1342_v36, 1  ;;  %v1371_v36 = vshrl.u32 %v5283_v52, 16 }
  0x9d   : > { %1823 = vmatmul.mubr.bf16.gmra.mrb[24].mxu0 %v5462_v45  ;;  %4464 = vmatpush3.bf16.msra.mxu1 %v4812_v10  ;;  %v1332_v10 = vrot.slane %v1330_v8, 1  ;;  %v1361_v8 = vshll.u32 %v5255_v11, 16  ;;  %v1540_v35 = vshll.u32 %v5376_v33, 16  ;;  %v1414_v33 = vrot.slane %v5448_v2, 1 }
  0x9e   : > { %4465 = vmatprep.subr.bf16.mxu1 %v4821_v21  ;;  %v1304_v7 = vor.u32 %v1303_v14, %v1299_v25  ;;  %v5546_v14 = vld [vmem:[#allocation2 + $0x90] sm:$0xff]   ;;  %v1420_v2 = vrot.slane %v5310_v34, 1  ;;  %v4816_v34 = vld [vmem:[%s6028_s2 + $0x188] sm:$0xff]  }
  0x9f   : > { %v5540_v30 = vsel %vm1201_vm9, %v1328_v39, %v1332_v10  ;;  %v1347_v62 = vshrl.u32 %v5546_v14, 16  ;;  %v1359_v39 = vshrl.u32 %v5255_v11, 16  ;;  %v1363_v10 = vrot.slane %v1361_v8, 1 }
  0xa0   : > { %v5518_v13 = vsel %vm1201_vm9, %v1304_v7, %v1308_v38  ;;  %v1349_v38 = vshll.u32 %v5546_v14, 16  ;;  %v1535_v8 = vshll.u32 %v5371_v4, 16 }
  0xa1   : > { %4466 = vmatpush3.bf16.msra.mxu1 %v4821_v21  ;;  %1830 = vmatprep.mubr.bf16.mxu0 %v5518_v13  ;;  %v1412_v21 = vrot.slane %v5326_v55, 1  ;;  %v1340_v55 = vor.u32 %v1339_v43, %v1335_v27  ;;  %v1368_v27 = vrot.slane %v1366_v12, 1  ;;  %v1373_v43 = vshll.u32 %v5283_v52, 16 }
  0xa2   : > { %4499 = vmatprep.subr.bf16.mxu1 %v5512_v24  ;;  %v1351_v44 = vrot.slane %v1349_v38, 1  ;;  %v1380_v38 = vrot.slane %v1378_v23, 1  ;;  %v1537_v12 = vrot.slane %v1535_v8, 1  ;;  %v5612_v23 = vld [vmem:[#allocation2 + $0x18] sm:$0xff]   ;;  %v1424_v8 = vrot.slane %v5393_v60, 1 }
  0xa3   : > { %2273 = vmatmul.mubr.bf16.gmra.mrb[32].mxu1 %v5387_v18  ;;  %v5536_v25 = vsel %vm1410_vm8, %v1411_v51, %v1412_v21  ;;  %v5551_v7 = vsel %vm1201_vm9, %v1340_v55, %v1344_v40  ;;  %v1364_v21 = vor.u32 %v1363_v10, %v1359_v39  ;;  %v1375_v55 = vrot.slane %v1373_v43, 1  ;;  %v4851_v43 = vld [vmem:[#allocation2 + $0x14] ss:$0 sps:$4 sm:$0x11]   ;;  %v4819_v60 = vld [vmem:[%s6028_s2 + $0x1d8] sm:$0xff]  }
  0xa4   : > { %2280 = vmatprep.mubr.bf16.mxu1 %v5446_v37  ;;  %v1352_v49 = vor.u32 %v1351_v44, %v1347_v62  ;;  %v1385_v62 = vshll.u32 %v5332_v20, 16  ;;  %v1533_v10 = vshrl.u32 %v5371_v4, 16 }
  0xa5   : > { %1831 = vmatmul.mubr.bf16.gmra.mrb[28].mxu0 %v5495_v5  ;;  %v5570_v1 = vsel %vm1201_vm9, %v1364_v21, %v1368_v27  ;;  %v1376_v40 = vor.u32 %v1375_v55, %v1371_v36  ;;  %v1542_v21 = vrot.slane %v1540_v35, 1  ;;  %v1415_v36 = vrot.slane %v4851_v43, 1 }
  0xa6   : > { %1838 = vmatprep.mubr.bf16.mxu0 %v5524_v15  ;;  %v5560_v51 = vsel %vm1201_vm9, %v1352_v49, %v1356_v63  ;;  %v1387_v16 = vrot.slane %v1385_v62, 1  ;;  %v1392_v63 = vrot.slane %v1390_v56, 1  ;;  %v4814_v56 = vld [vmem:[%s6028_s2 + $0x180] sm:$0xff]   ;;  %v1427_v35 = vrot.slane %v5424_v26, 1  ;;  %v4820_v26 = vld [vmem:[%s6028_s2 + $0x198] sm:$0xff]  }
  0xa7   : > { %v5580_v44 = vsel %vm1201_vm9, %v1376_v40, %v1380_v38  ;;  %v5607_v55 = vsel %vm1410_vm8, %v1414_v33, %v1415_v36  ;;  %v1417_v40 = vrot.slane %v5612_v23, 1  ;;  %v4853_v38 = vld [vmem:[#allocation2 + $0x20] ss:$0 sps:$4 sm:$0x11]   ;;  %v1429_v43 = vrot.slane %v5443_v57, 1 }
  0xa8   : > { %v1388_v49 = vor.u32 %v1387_v16, %v1383_v32  ;;  %v1418_v62 = vrot.slane %v4853_v38, 1  ;;  %v1421_v32 = vrot.slane %v5317_v41, 1  ;;  %v1423_v41 = vrot.slane %v5387_v18, 1 }
  0xa9   : > { %v1430_v36 = vrot.slane %v5451_v50, 1  ;;  %v1433_v38 = vrot.slane %v5466_v48, 1  ;;  %v4824_v50 = vld [vmem:[%s6028_s2 + $0x1e8] sm:$0xff]  }
  0xaa   : > { %v5590_v39 = vsel %vm1201_vm9, %v1388_v49, %v1392_v63  ;;  %v5618_v16 = vsel %vm1410_vm8, %v1417_v40, %v1418_v62  ;;  %v5626_v49 = vld [vmem:[#allocation2 + $0x9c] sm:$0xff]   ;;  %v5630_v63 = vsel %vm1410_vm8, %v1420_v2, %v1421_v32  ;;  %v1432_v40 = vrot.slane %v5462_v45, 1  ;;  %v4825_v48 = vld [vmem:[%s6028_s2 + $0x1a8] sm:$0xff]  }
  0xab   : > { %2281 = vmatmul.mubr.bf16.gmra.mrb[36].mxu1 %v5419_v6  ;;  %v5672_v62 = vsel %vm1410_vm8, %v1429_v43, %v1430_v36  ;;  %v4823_v2 = vld [vmem:[%s6028_s2 + $0x1a0] sm:$0xff]  }
  0xac   : > { %2288 = vmatprep.mubr.bf16.mxu1 %v5476_v46  ;;  %v5682_v32 = vsel %vm1410_vm8, %v1432_v40, %v1433_v38 }
  0xad   : > { %1839 = vmatmul.mubr.bf16.gmra.mrb[32].mxu0 %v5488_v22 }
  0xae   : > { %1846 = vmatprep.mubr.bf16.mxu0 %v5540_v30 }
  0xb3   : > { %2289 = vmatmul.mubr.bf16.gmra.mrb[40].mxu1 %v5443_v57 }
  0xb4   : > { %2296 = vmatprep.mubr.bf16.mxu1 %v5492_v9 }
  0xb5   : > { %1847 = vmatmul.mubr.bf16.gmra.mrb[36].mxu0 %v5514_v17 }
  0xb6   : > { %1854 = vmatprep.mubr.bf16.mxu0 %v5551_v7 }
  0xbb   : > { %2297 = vmatmul.mubr.bf16.gmra.mrb[44].mxu1 %v5462_v45 }
  0xbc   : > { %2304 = vmatprep.mubr.bf16.mxu1 %v5518_v13 }
  0xbd   : > { %1855 = vmatmul.mubr.bf16.gmra.mrb[40].mxu0 %v5531_v3 }
  0xbe   : > { %1862 = vmatprep.mubr.bf16.mxu0 %v5560_v51 }
  0xc3   : > { %2305 = vmatmul.mubr.bf16.gmra.mrb[48].mxu1 %v5495_v5 }
  0xc4   : > { %2312 = vmatprep.mubr.bf16.mxu1 %v5524_v15 }
  0xc5   : > { %1863 = vmatmul.mubr.bf16.gmra.mrb[44].mxu0 %v5546_v14 }
  0xc6   : > { %1870 = vmatprep.mubr.bf16.mxu0 %v5570_v1 }
  0xcb   : > { %2313 = vmatmul.mubr.bf16.gmra.mrb[52].mxu1 %v5488_v22 }
  0xcc   : > { %2320 = vmatprep.mubr.bf16.mxu1 %v5540_v30 }
  0xcd   : > { %1871 = vmatmul.mubr.bf16.gmra.mrb[48].mxu0 %v5255_v11  ;;  %v1538_v11 = vor.u32 %v1537_v12, %v1533_v10  ;;  %v4817_v10 = vld [vmem:[%s6028_s2 + $0x1d0] sm:$0xff]   ;;  %v1426_v12 = vrot.slane %v5419_v6, 1 }
  0xce   : > { %1878 = vmatprep.mubr.bf16.mxu0 %v5580_v44 }
  0xcf   : > { %v5599_v27 = vsel %vm1201_vm9, %v1538_v11, %v1542_v21  ;;  %v5646_v11 = vsel %vm1410_vm8, %v1423_v41, %v1424_v8  ;;  %v4818_v21 = vld [vmem:[%s6028_s2 + $0x190] sm:$0xff]   ;;  %v5656_v33 = vsel %vm1410_vm8, %v1426_v12, %v1427_v35  ;;  %v4855_v12 = vld [vmem:[#allocation2 + $0x24] sm:$0xff]  }
  0xd0   : > { %v4827_v41 = vld [vmem:[%s6028_s2 + $0x1b0] sm:$0xff]  }
  0xd1   : > { %v4832_v8 = vld [vmem:[%s6028_s2 + $0x210] sm:$0xff]  }
  0xd3   : > { %2321 = vmatmul.mubr.bf16.gmra.mrb[56].mxu1 %v5514_v17 }
  0xd4   : > { %2328 = vmatprep.mubr.bf16.mxu1 %v5551_v7 }
  0xd5   : > { %1879 = vmatmul.mubr.bf16.gmra.mrb[52].mxu0 %v5283_v52 }
  0xd6   : > { %1886 = vmatprep.mubr.bf16.mxu0 %v5590_v39 }
  0xdb   : > { %2329 = vmatmul.mubr.bf16.gmra.mrb[60].mxu1 %v5531_v3 }
  0xdc   : > { %2336 = vmatprep.mubr.bf16.mxu1 %v5560_v51 }
  0xdd   : > { %1887 = vmatmul.mubr.bf16.gmra.mrb[56].mxu0 %v5332_v20 }
  0xde   : > { %1894 = vmatprep.mubr.bf16.mxu0 %v5599_v27 }
  0xe3   : > { %2337 = vmatmul.mubr.bf16.gmra.mrb[64].mxu1 %v5546_v14 }
  0xe4   : > { %2344 = vmatprep.mubr.bf16.mxu1 %v5570_v1 }
  0xe5   : > { %1895 = vmatmul.mubr.bf16.gmra.mrb[60].mxu0 %v5371_v4  ;;  %v4815_v4 = vld [vmem:[%s6028_s2 + $0x1c8] sm:$0xff]  }
  0xe6   : > { %4419 = vmatprep.mubr.bf16.mxu0 %v5607_v55 }
  0xeb   : > { %2345 = vmatmul.mubr.bf16.gmra.mrb[68].mxu1 %v5626_v49 }
  0xec   : > { %2352 = vmatprep.mubr.bf16.mxu1 %v5580_v44 }
  0xed   : > { %4420 = vmatmul.mubr.bf16.vlgmr.msra.gmra.mrb[64].mxu0 %v5618_v16 }
  0xee   : > { %4268 = vmatpush3.bf16.msra.mxu0 %v4814_v56  ;;  %4423 = vmatprep.mubr.bf16.mxu0 %v5630_v63  ;;  %v1435_v56 = vrot.slane %v5495_v5, 1 }
  0xef   : > { %4269 = vmatprep.subr.bf16.mxu0 %v4815_v4  ;;  %v1436_v4 = vrot.slane %v5497_v31, 1  ;;  %v4828_v31 = vld [vmem:[%s6028_s2 + $0x1f8] sm:$0xff]  }
  0xf2   : > { %4270 = vmatpush3.bf16.msra.mxu0 %v4816_v34  ;;  %v5699_v34 = vsel %vm1410_vm8, %v1435_v56, %v1436_v4 }
  0xf3   : > { %4271 = vmatprep.subr.bf16.mxu0 %v4817_v10  ;;  %2353 = vmatmul.mubr.bf16.gmra.mrb[72].mxu1 %v5283_v52  ;;  %v4822_v52 = vld [vmem:[%s6028_s2 + $0x1e0] sm:$0xff]   ;;  %v4829_v10 = vld [vmem:[%s6028_s2 + $0x1b8] sm:$0xff]  }
  0xf4   : > { %2360 = vmatprep.mubr.bf16.mxu1 %v5590_v39 }
  0xf5   : > { %4424 = vmatmul.mubr.bf16.gmra.mrb[68].mxu0 %v5646_v11 }
  0xf6   : > { %4272 = vmatpush3.bf16.msra.mxu0 %v4818_v21  ;;  %4427 = vmatprep.mubr.bf16.mxu0 %v5656_v33 }
  0xf7   : > { %4273 = vmatprep.subr.bf16.mxu0 %v4819_v60 }
  0xfa   : > { %4274 = vmatpush3.bf16.msra.mxu0 %v4820_v26 }
  0xfb   : > { %4275 = vmatprep.subr.bf16.mxu0 %v4822_v52  ;;  %2361 = vmatmul.mubr.bf16.gmra.mrb[76].mxu1 %v5332_v20  ;;  %v4826_v20 = vld [vmem:[%s6028_s2 + $0x1f0] sm:$0xff]  }
  0xfc   : > { %4467 = vmatprep.mubr.bf16.mxu1 %v5536_v25  ;;  %v4831_v25 = vld [vmem:[%s6028_s2 + $0x208] sm:$0xff]  }
  0xfd   : > { %4428 = vmatmul.mubr.bf16.gmra.mrb[72].mxu0 %v5672_v62 }
  0xfe   : > { %4276 = vmatpush3.bf16.msra.mxu0 %v4823_v2  ;;  %4431 = vmatprep.mubr.bf16.mxu0 %v5682_v32 }
  0xff   : > { %4277 = vmatprep.subr.bf16.mxu0 %v4824_v50 }
 0x102   : > { %4278 = vmatpush3.bf16.msra.mxu0 %v4825_v48 }
 0x103   : > { %4279 = vmatprep.subr.bf16.mxu0 %v4826_v20  ;;  %4468 = vmatmul.mubr.bf16.vlgmr.msra.gmra.mrb[80].mxu1 %v5607_v55  ;;  %v4835_v55 = vld [vmem:[%s6028_s2 + $0x228] sm:$0xff]  }
 0x104   : > { %4500 = vmatpush3.bf16.msra.mxu1 %v5512_v24  ;;  %4471 = vmatprep.mubr.bf16.mxu1 %v5618_v16  ;;  %v4833_v24 = vld [vmem:[%s6028_s2 + $0x218] sm:$0xff]  }
 0x105   : > { %4432 = vmatmul.mubr.bf16.gmra.mrb[76].mxu0 %v5699_v34  ;;  %4501 = vmatprep.subr.bf16.mxu1 %v4831_v25 }
 0x106   : > { %4280 = vmatpush3.bf16.msra.mxu0 %v4827_v41  ;;  %2781 = vmatprep.mubr.bf16.mxu0 %v5241_v58  ;;  %v4834_v58 = vld [vmem:[%s6028_s2 + $0x220] sm:$0xff]  }
 0x107   : > { %4281 = vmatprep.subr.bf16.mxu0 %v4828_v31 }
 0x108   : > { %4502 = vmatpush3.bf16.msra.mxu1 %v4831_v25 }
 0x109   : > { %4503 = vmatprep.subr.bf16.mxu1 %v4832_v8 }
 0x10a   : > { %4282 = vmatpush3.bf16.msra.mxu0 %v4829_v10 }
 0x10b   : > { %4472 = vmatmul.mubr.bf16.gmra.mrb[84].mxu1 %v5630_v63 }
 0x10c   : > { %4475 = vmatprep.mubr.bf16.mxu1 %v5646_v11  ;;  %4504 = vmatpush3.bf16.msra.mxu1 %v4832_v8 }
 0x10d   : > { %2782 = vmatmul.mubr.bf16.vlgmr.msra.gmra.mrb[80].mxu0 %v5612_v23  ;;  %4505 = vmatprep.subr.bf16.mxu1 %v4833_v24  ;;  %v4836_v23 = vld [vmem:[%s6028_s2 + $0x230] sm:$0xff]  }
 0x10e   : > { %2789 = vmatprep.mubr.bf16.mxu0 %v5340_v28  ;;  %v4837_v28 = vld [vmem:[%s6028_s2 + $0x238] sm:$0xff]  }
 0x110   : > { %4506 = vmatpush3.bf16.msra.mxu1 %v4833_v24 }
 0x111   : > { %4507 = vmatprep.subr.bf16.mxu1 %v4834_v58 }
 0x113   : > { %4476 = vmatmul.mubr.bf16.gmra.mrb[88].mxu1 %v5656_v33 }
 0x114   : > { %4479 = vmatprep.mubr.bf16.mxu1 %v5672_v62  ;;  %4508 = vmatpush3.bf16.msra.mxu1 %v4834_v58 }
 0x115   : > { %2790 = vmatmul.mubr.bf16.gmra.mrb[84].mxu0 %v4855_v12  ;;  %4509 = vmatprep.subr.bf16.mxu1 %v4835_v55 }
 0x116   : > { %2797 = vmatprep.mubr.bf16.mxu0 %v5411_v59 }
 0x118   : > { %4510 = vmatpush3.bf16.msra.mxu1 %v4835_v55 }
 0x119   : > { %4511 = vmatprep.subr.bf16.mxu1 %v4836_v23 }
 0x11b   : > { %4480 = vmatmul.mubr.bf16.gmra.mrb[92].mxu1 %v5682_v32  ;;  %v4011_v35 = vpop.f32.mrb[0].mxu0 }
 0x11c   : > { %4483 = vmatprep.mubr.bf16.mxu1 %v5699_v34  ;;  %4512 = vmatpush3.bf16.msra.mxu1 %v4836_v23  ;;  %v4012_v21 = vpop.f32.mrb[1].mxu0 }
 0x11d   : > { %2798 = vmatmul.mubr.bf16.gmra.mrb[88].mxu0 %v5387_v18  ;;  %v5743_v60 = vadd.f32 %v4012_v21, %v4011_v35  ;;  %v4014_v26 = vpop.f32.mrb[2].mxu0  ;;  %4513 = vmatprep.subr.bf16.mxu1 %v4837_v28  ;;  %v4839_v35 = vld [vmem:[#allocation2 + $0xd4] ss:$0 sps:$4 sm:$0x11]  }
 0x11e   : > { %2805 = vmatprep.mubr.bf16.mxu0 %v5446_v37  ;;  %v4015_v59 = vpop.f32.mrb[3].mxu0 }
 0x11f   : > { %v5746_v43 = vadd.f32 %v4015_v59, %v4014_v26 }
 0x120   : > { %4514 = vmatpush3.bf16.msra.mxu1 %v4837_v28 }
 0x123   : > { %4484 = vmatmul.mubr.bf16.gmra.mrb[0].mxu1 %v5106_v47 }
 0x124   : > { %4487 = vmatprep.mubr.bf16.mxu1 %v5116_v61 }
 0x125   : > { %2806 = vmatmul.mubr.bf16.gmra.mrb[92].mxu0 %v5419_v6 }
 0x126   : > { %2813 = vmatprep.mubr.bf16.mxu0 %v5476_v46 }
 0x12b   : > { %4488 = vmatmul.mubr.bf16.gmra.mrb[4].mxu1 %v5188_v0 }
 0x12c   : > { %4491 = vmatprep.mubr.bf16.mxu1 %v5207_v19 }
 0x12d   : > { %v4017_v18 = vpop.f32.mrb[4].mxu0  ;;  %2814 = vmatmul.mubr.bf16.gmra.mrb[96].mxu0 %v5443_v57 }
 0x12e   : > { %v4018_v37 = vpop.f32.mrb[5].mxu0  ;;  %2821 = vmatprep.mubr.bf16.mxu0 %v5492_v9 }
 0x12f   : > { %v5756_v36 = vadd.f32 %v4018_v37, %v4017_v18  ;;  %v4020_v52 = vpop.f32.mrb[6].mxu0 }
 0x130   : > { %v4021_v40 = vpop.f32.mrb[7].mxu0 }
 0x131   : > { %v5758_v38 = vadd.f32 %v4021_v40, %v4020_v52 }
 0x133   : > { %4492 = vmatmul.mubr.bf16.gmra.mrb[8].mxu1 %v5273_v42 }
 0x134   : > { %4495 = vmatprep.mubr.bf16.mxu1 %v5303_v29 }
 0x135   : > { %2822 = vmatmul.mubr.bf16.gmra.mrb[100].mxu0 %v5462_v45 }
 0x136   : > { %2829 = vmatprep.mubr.bf16.mxu0 %v5518_v13 }
 0x13b   : > { %4496 = vmatmul.mubr.bf16.gmra.mrb[12].mxu1 %v5357_v54 }
 0x13c   : > { %4515 = vmatprep.mubr.bf16.mxu1 %v5618_v16 }
 0x13d   : > { %2830 = vmatmul.mubr.bf16.gmra.mrb[104].mxu0 %v5495_v5 }
 0x13e   : > { %2837 = vmatprep.mubr.bf16.mxu0 %v5524_v15 }
 0x143   : > { %4516 = vmatmul.mubr.bf16.vlgmr.msra.gmra.mrb[80].mxu1 %v5630_v63 }
 0x144   : > { %v4023_v6 = vpop.f32.mrb[8].mxu0  ;;  %4519 = vmatprep.mubr.bf16.mxu1 %v5646_v11 }
 0x145   : > { %v4024_v57 = vpop.f32.mrb[9].mxu0  ;;  %2838 = vmatmul.mubr.bf16.gmra.mrb[108].mxu0 %v5488_v22 }
 0x146   : > { %v5771_v46 = vadd.f32 %v4024_v57, %v4023_v6  ;;  %v4026_v45 = vpop.f32.mrb[10].mxu0  ;;  %2845 = vmatprep.mubr.bf16.mxu0 %v5540_v30 }
 0x147   : > { %v4027_v9 = vpop.f32.mrb[11].mxu0 }
 0x148   : > { %v5774_v13 = vadd.f32 %v4027_v9, %v4026_v45  ;;  %v2547_v45 = vshll.u32 %v4839_v35, 16 }
 0x14b   : > { %4520 = vmatmul.mubr.bf16.gmra.mrb[84].mxu1 %v5656_v33 }
 0x14c   : > { %4523 = vmatprep.mubr.bf16.mxu1 %v5672_v62 }
 0x14d   : > { %2846 = vmatmul.mubr.bf16.gmra.mrb[112].mxu0 %v5514_v17 }
 0x14e   : > { %2853 = vmatprep.mubr.bf16.mxu0 %v5551_v7 }
 0x153   : > { %4524 = vmatmul.mubr.bf16.gmra.mrb[88].mxu1 %v5682_v32 }
 0x154   : > { %4527 = vmatprep.mubr.bf16.mxu1 %v5699_v34 }
 0x155   : > { %2854 = vmatmul.mubr.bf16.gmra.mrb[116].mxu0 %v5531_v3 }
 0x156   : > { %2861 = vmatprep.mubr.bf16.mxu0 %v5560_v51  ;;  %v4147_v22 = vpop.f32.mrb[16].mxu1 }
 0x157   : > { %v4148_v15 = vpop.f32.mrb[17].mxu1 }
 0x158   : > { %v4029_v5 = vpop.f32.mrb[12].mxu0  ;;  %v5784_v16 = vadd.f32 %v4148_v15, %v4147_v22  ;;  %v4150_v63 = vpop.f32.mrb[18].mxu1  ;;  %v4857_v15 = vld [vmem:[#allocation2 + $0xb4] sm:$0xff]  }
 0x159   : > { %v4030_v30 = vpop.f32.mrb[13].mxu0  ;;  %v4151_v33 = vpop.f32.mrb[19].mxu1 }
 0x15a   : > { %v5786_v11 = vadd.f32 %v4030_v30, %v4029_v5  ;;  %v4032_v17 = vpop.f32.mrb[14].mxu0  ;;  %v5788_v62 = vadd.f32 %v4151_v33, %v4150_v63  ;;  %v2553_v5 = vrot.slane %v4839_v35, 1  ;;  %v2549_v33 = vrot.slane %v2547_v45, 1 }
 0x15b   : > { %v4033_v7 = vpop.f32.mrb[15].mxu0  ;;  %4528 = vmatmul.mubr.bf16.gmra.mrb[92].mxu1 %v5106_v47 }
 0x15c   : > { %v5790_v2 = vadd.f32 %v4033_v7, %v4032_v17  ;;  %4531 = vmatprep.mubr.bf16.mxu1 %v5116_v61 }
 0x15d   : > { %2862 = vmatmul.mubr.bf16.gmra.mrb[120].mxu0 %v5546_v14 }
 0x15e   : > { %2869 = vmatprep.mubr.bf16.mxu0 %v5570_v1  ;;  %v4153_v3 = vpop.f32.mrb[20].mxu1 }
 0x15f   : > { %v4154_v51 = vpop.f32.mrb[21].mxu1 }
 0x160   : > { %v4035_v50 = vpop.f32.mrb[16].mxu0  ;;  %v5796_v32 = vadd.f32 %v4154_v51, %v4153_v3  ;;  %v4156_v48 = vpop.f32.mrb[22].mxu1 }
 0x161   : > { %v4036_v56 = vpop.f32.mrb[17].mxu0  ;;  %v4157_v4 = vpop.f32.mrb[23].mxu1 }
 0x162   : > { %v5798_v20 = vadd.f32 %v4036_v56, %v4035_v50  ;;  %v4038_v25 = vpop.f32.mrb[18].mxu0  ;;  %v5800_v34 = vadd.f32 %v4157_v4, %v4156_v48 }
 0x163   : > { %v4039_v47 = vpop.f32.mrb[19].mxu0  ;;  %4532 = vmatmul.mubr.bf16.gmra.mrb[0].mxu1 %v5188_v0 }
 0x164   : > { %v5803_v61 = vadd.f32 %v4039_v47, %v4038_v25  ;;  %4535 = vmatprep.mubr.bf16.mxu1 %v5207_v19  ;;  %v4838_v19 = vld [vmem:[#allocation2 + $0xcc] sm:$0xff]  }
 0x165   : > { %2870 = vmatmul.mubr.bf16.gmra.mrb[124].mxu0 %v5626_v49  ;;  %v2542_v21 = vshll.u32 %v4838_v19, 16  ;;  %v2540_v57 = vshrl.u32 %v4838_v19, 16  ;;  %v2552_v22 = vrot.slane %v4838_v19, 1 }
 0x166   : > { %2877 = vmatprep.mubr.bf16.mxu0 %v5580_v44  ;;  %v4159_v14 = vpop.f32.mrb[24].mxu1  ;;  %v4856_v44 = vld [vmem:[#allocation2 + $0xa8] sm:$0xff]  }
 0x167   : > { %v4160_v1 = vpop.f32.mrb[25].mxu1  ;;  %v2554_v51 = vsel %vm1410_vm8, %v2552_v22, %v2553_v5 }
 0x168   : > { %v4041_v41 = vpop.f32.mrb[20].mxu0  ;;  %v5808_v31 = vadd.f32 %v4160_v1, %v4159_v14  ;;  %v4162_v8 = vpop.f32.mrb[26].mxu1  ;;  %v4858_v14 = vld [vmem:[#allocation2 + $0xc0] sm:$0xff]  }
 0x169   : > { %v4042_v10 = vpop.f32.mrb[21].mxu0  ;;  %v4163_v24 = vpop.f32.mrb[27].mxu1 }
 0x16a   : > { %v5810_v58 = vadd.f32 %v4042_v10, %v4041_v41  ;;  %v4044_v55 = vpop.f32.mrb[22].mxu0  ;;  %v5812_v0 = vadd.f32 %v4163_v24, %v4162_v8 }
 0x16b   : > { %v4045_v12 = vpop.f32.mrb[23].mxu0  ;;  %4536 = vmatmul.mubr.bf16.gmra.mrb[4].mxu1 %v5273_v42 }
 0x16c   : > { %v5815_v49 = vadd.f32 %v4045_v12, %v4044_v55  ;;  %4539 = vmatprep.mubr.bf16.mxu1 %v5303_v29 }
 0x16d   : > { %2878 = vmatmul.mubr.bf16.gmra.mrb[128].mxu0 %v4856_v44 }
 0x16e   : > { %2885 = vmatprep.mubr.bf16.mxu0 %v5590_v39  ;;  %v4165_v23 = vpop.f32.mrb[28].mxu1  ;;  %v2544_v39 = vrot.slane %v2542_v21, 1 }
 0x16f   : > { %v4166_v28 = vpop.f32.mrb[29].mxu1 }
 0x170   : > { %v4047_v26 = vpop.f32.mrb[24].mxu0  ;;  %v5819_v59 = vadd.f32 %v4166_v28, %v4165_v23  ;;  %v4168_v18 = vpop.f32.mrb[30].mxu1  ;;  %v2545_v17 = vor.u32 %v2544_v39, %v2540_v57 }
 0x171   : > { %v4048_v37 = vpop.f32.mrb[25].mxu0  ;;  %v4169_v52 = vpop.f32.mrb[31].mxu1 }
 0x172   : > { %v5821_v42 = vadd.f32 %v4048_v37, %v4047_v26  ;;  %v4050_v40 = vpop.f32.mrb[26].mxu0  ;;  %v5823_v6 = vadd.f32 %v4169_v52, %v4168_v18 }
 0x173   : > { %v4051_v29 = vpop.f32.mrb[27].mxu0  ;;  %4540 = vmatmul.mubr.bf16.gmra.mrb[8].mxu1 %v5357_v54 }
 0x174   : > { %v5826_v9 = vadd.f32 %v4051_v29, %v4050_v40  ;;  %4543 = vmatprep.mubr.bf16.mxu1 %v5385_v53 }
 0x175   : > { %2886 = vmatmul.mubr.bf16.gmra.mrb[132].mxu0 %v4857_v15 }
 0x176   : > { %2893 = vmatprep.mubr.bf16.mxu0 %v5599_v27  ;;  %v4171_v30 = vpop.f32.mrb[32].mxu1  ;;  %v2550_v27 = vsel %vm1201_vm9, %v2545_v17, %v2549_v33 }
 0x177   : > { %v4172_v63 = vpop.f32.mrb[33].mxu1 }
 0x178   : > { %v4053_v7 = vpop.f32.mrb[28].mxu0  ;;  %v5830_v3 = vadd.f32 %v4172_v63, %v4171_v30  ;;  %v4174_v54 = vpop.f32.mrb[34].mxu1 }
 0x179   : > { %v4054_v50 = vpop.f32.mrb[29].mxu0  ;;  %v4175_v48 = vpop.f32.mrb[35].mxu1 }
 0x17a   : > { %v5833_v56 = vadd.f32 %v4054_v50, %v4053_v7  ;;  %v4056_v53 = vpop.f32.mrb[30].mxu0  ;;  %v5835_v4 = vadd.f32 %v4175_v48, %v4174_v54 }
 0x17b   : > { %v4057_v25 = vpop.f32.mrb[31].mxu0  ;;  %4544 = vmatmul.mubr.bf16.gmra.mrb[12].mxu1 %v2554_v51 }
 0x17c   : > { %v5838_v47 = vadd.f32 %v4057_v25, %v4056_v53 }
 0x17d   : > { %2894 = vmatmul.mubr.bf16.gmra.mrb[136].mxu0 %v4858_v14 }
 0x17e   : > { %2901 = vmatprep.mubr.bf16.mxu0 %v2550_v27  ;;  %v4177_v1 = vpop.f32.mrb[36].mxu1 }
 0x17f   : > { %v4178_v41 = vpop.f32.mrb[37].mxu1 }
 0x180   : > { %v4059_v8 = vpop.f32.mrb[32].mxu0  ;;  %v5840_v10 = vadd.f32 %v4178_v41, %v4177_v1  ;;  %v4180_v24 = vpop.f32.mrb[38].mxu1 }
 0x181   : > { %v4060_v55 = vpop.f32.mrb[33].mxu0  ;;  %v4181_v12 = vpop.f32.mrb[39].mxu1 }
 0x182   : > { %v4061_v44 = vadd.f32 %v4060_v55, %v4059_v8  ;;  %v4062_v23 = vpop.f32.mrb[34].mxu0  ;;  %v5842_v28 = vadd.f32 %v4181_v12, %v4180_v24 }
 0x183   : > { %v4063_v35 = vpop.f32.mrb[35].mxu0 }
 0x184   : > { %v4064_v21 = vadd.f32 %v4063_v35, %v4062_v23 }
 0x185   : > { %2902 = vmatmul.mubr.bf16.gmra.mrb[140].mxu0 %v4838_v19 }
 0x186   : > { %v4183_v26 = vpop.f32.mrb[40].mxu1 }
 0x187   : > { %v4184_v18 = vpop.f32.mrb[41].mxu1 }
 0x188   : > { %v4065_v37 = vpop.f32.mrb[36].mxu0  ;;  %v5844_v52 = vadd.f32 %v4184_v18, %v4183_v26  ;;  %v4186_v40 = vpop.f32.mrb[42].mxu1 }
 0x189   : > { %v4066_v29 = vpop.f32.mrb[37].mxu0  ;;  %v4187_v57 = vpop.f32.mrb[43].mxu1 }
 0x18a   : > { %v4067_v39 = vadd.f32 %v4066_v29, %v4065_v37  ;;  %v4068_v45 = vpop.f32.mrb[38].mxu0  ;;  %v5846_v22 = vadd.f32 %v4187_v57, %v4186_v40 }
 0x18b   : > { %v4069_v5 = vpop.f32.mrb[39].mxu0 }
 0x18c   : > { %v4070_v15 = vadd.f32 %v4069_v5, %v4068_v45 }
 0x18e   : > { %v4189_v30 = vpop.f32.mrb[44].mxu1 }
 0x18f   : > { %v4190_v63 = vpop.f32.mrb[45].mxu1 }
 0x190   : > { %v4071_v17 = vpop.f32.mrb[40].mxu0  ;;  %v5848_v33 = vadd.f32 %v4190_v63, %v4189_v30  ;;  %v4192_v19 = vpop.f32.mrb[46].mxu1 }
 0x191   : > { %v4072_v7 = vpop.f32.mrb[41].mxu0  ;;  %v4193_v54 = vpop.f32.mrb[47].mxu1 }
 0x192   : > { %v4073_v51 = vadd.f32 %v4072_v7, %v4071_v17  ;;  %v4074_v50 = vpop.f32.mrb[42].mxu0  ;;  %v5850_v48 = vadd.f32 %v4193_v54, %v4192_v19 }
 0x193   : > { %v4075_v53 = vpop.f32.mrb[43].mxu0 }
 0x194   : > { %v4076_v25 = vadd.f32 %v4075_v53, %v4074_v50 }
 0x196   : > { %v4195_v27 = vpop.f32.mrb[48].mxu1 }
 0x197   : > { %v4196_v14 = vpop.f32.mrb[49].mxu1 }
 0x198   : > { %v4077_v1 = vpop.f32.mrb[44].mxu0  ;;  %v4197_v41 = vadd.f32 %v4196_v14, %v4195_v27  ;;  %v4198_v8 = vpop.f32.mrb[50].mxu1 }
 0x199   : > { %v4078_v24 = vpop.f32.mrb[45].mxu0  ;;  %v4199_v55 = vpop.f32.mrb[51].mxu1 }
 0x19a   : > { %v4079_v12 = vadd.f32 %v4078_v24, %v4077_v1  ;;  %v4080_v23 = vpop.f32.mrb[46].mxu0  ;;  %v5852_v35 = vadd.f32 %v4197_v41, %v4061_v44  ;;  %v4200_v26 = vadd.f32 %v4199_v55, %v4198_v8 }
 0x19b   : > { %v4081_v18 = vpop.f32.mrb[47].mxu0 }
 0x19c   : > { %v4082_v37 = vadd.f32 %v4081_v18, %v4080_v23  ;;  %v5854_v40 = vadd.f32 %v4200_v26, %v4064_v21 }
 0x19e   : > { %v4201_v29 = vpop.f32.mrb[52].mxu1 }
 0x19f   : > { %v4202_v57 = vpop.f32.mrb[53].mxu1 }
 0x1a0   : > { %v4083_v45 = vpop.f32.mrb[48].mxu0  ;;  %v4203_v5 = vadd.f32 %v4202_v57, %v4201_v29  ;;  %v4204_v30 = vpop.f32.mrb[54].mxu1 }
 0x1a1   : > { %v4084_v63 = vpop.f32.mrb[49].mxu0  ;;  %v4205_v17 = vpop.f32.mrb[55].mxu1 }
 0x1a2   : > { %v4085_v19 = vadd.f32 %v4084_v63, %v4083_v45  ;;  %v4086_v7 = vpop.f32.mrb[50].mxu0  ;;  %v5856_v54 = vadd.f32 %v4203_v5, %v4067_v39  ;;  %v4206_v50 = vadd.f32 %v4205_v17, %v4204_v30 }
 0x1a3   : > { %v4087_v53 = vpop.f32.mrb[51].mxu0 }
 0x1a4   : > { %v4088_v44 = vadd.f32 %v4087_v53, %v4086_v7  ;;  %v5858_v27 = vadd.f32 %v4206_v50, %v4070_v15 }
 0x1a6   : > { %v4207_v14 = vpop.f32.mrb[56].mxu1 }
 0x1a7   : > { %v4208_v1 = vpop.f32.mrb[57].mxu1 }
 0x1a8   : > { %v4089_v21 = vpop.f32.mrb[52].mxu0  ;;  %v4209_v41 = vadd.f32 %v4208_v1, %v4207_v14  ;;  %v4210_v8 = vpop.f32.mrb[58].mxu1 }
 0x1a9   : > { %v4090_v24 = vpop.f32.mrb[53].mxu0  ;;  %v4211_v55 = vpop.f32.mrb[59].mxu1 }
 0x1aa   : > { %v4091_v23 = vadd.f32 %v4090_v24, %v4089_v21  ;;  %v4092_v26 = vpop.f32.mrb[54].mxu0  ;;  %v5860_v18 = vadd.f32 %v4209_v41, %v4073_v51  ;;  %v4212_v29 = vadd.f32 %v4211_v55, %v4210_v8 }
 0x1ab   : > { %v4093_v57 = vpop.f32.mrb[55].mxu0 }
 0x1ac   : > { %6038 = vst [vmem:[#allocation3_spill] sm:$0xff] %v5860_v18  ;;  %v4094_v39 = vadd.f32 %v4093_v57, %v4092_v26  ;;  %v5862_v45 = vadd.f32 %v4212_v29, %v4076_v25 }
 0x1ae   : > { %6039 = vst [vmem:[#allocation4_spill] sm:$0xff] %v5862_v45  ;;  %v4213_v5 = vpop.f32.mrb[60].mxu1 }
 0x1af   : > { %v4214_v30 = vpop.f32.mrb[61].mxu1 }
 0x1b0   : > { %v4095_v15 = vpop.f32.mrb[56].mxu0  ;;  %v4215_v63 = vadd.f32 %v4214_v30, %v4213_v5  ;;  %v4216_v17 = vpop.f32.mrb[62].mxu1 }
 0x1b1   : > { %v4096_v7 = vpop.f32.mrb[57].mxu0  ;;  %v4217_v50 = vpop.f32.mrb[63].mxu1 }
 0x1b2   : > { %v4097_v53 = vadd.f32 %v4096_v7, %v4095_v15  ;;  %v4098_v14 = vpop.f32.mrb[58].mxu0  ;;  %v5864_v1 = vadd.f32 %v4215_v63, %v4079_v12  ;;  %v4218_v21 = vadd.f32 %v4217_v50, %v4216_v17 }
 0x1b3   : > { %v4099_v24 = vpop.f32.mrb[59].mxu0 }
 0x1b4   : > { %v4100_v51 = vadd.f32 %v4099_v24, %v4098_v14  ;;  %v5866_v41 = vadd.f32 %v4218_v21, %v4082_v37 }
 0x1b6   : > { %6040 = vst [vmem:[#allocation5_spill] sm:$0xff] %v5866_v41  ;;  %v4219_v8 = vpop.f32.mrb[64].mxu1 }
 0x1b7   : > { %v4220_v55 = vpop.f32.mrb[65].mxu1 }
 0x1b8   : > { %v4101_v25 = vpop.f32.mrb[60].mxu0  ;;  %v4221_v26 = vadd.f32 %v4220_v55, %v4219_v8  ;;  %v4222_v29 = vpop.f32.mrb[66].mxu1 }
 0x1b9   : > { %v4102_v57 = vpop.f32.mrb[61].mxu0  ;;  %v4223_v45 = vpop.f32.mrb[67].mxu1 }
 0x1ba   : > { %v4103_v5 = vadd.f32 %v4102_v57, %v4101_v25  ;;  %v4104_v30 = vpop.f32.mrb[62].mxu0  ;;  %v5868_v18 = vadd.f32 %v4221_v26, %v4085_v19  ;;  %v4224_v15 = vadd.f32 %v4223_v45, %v4222_v29 }
 0x1bb   : > { %v4105_v7 = vpop.f32.mrb[63].mxu0 }
 0x1bc   : > { %v4106_v12 = vadd.f32 %v4105_v7, %v4104_v30  ;;  %v5870_v63 = vadd.f32 %v4224_v15, %v4088_v44 }
 0x1be   : > { %v4225_v17 = vpop.f32.mrb[68].mxu1 }
 0x1bf   : > { %v4226_v50 = vpop.f32.mrb[69].mxu1 }
 0x1c0   : > { %v4421_v37 = vpop.f32.mrb[64].mxu0  ;;  %v4227_v14 = vadd.f32 %v4226_v50, %v4225_v17  ;;  %v4228_v21 = vpop.f32.mrb[70].mxu1 }
 0x1c1   : > { %v1946_v24 = vadd.f32 %v4421_v37, %v5756_v36  ;;  %v1937_v8 = vpop.f32.mrb[65].mxu0  ;;  %v4229_v55 = vpop.f32.mrb[71].mxu1 }
 0x1c2   : > { %v1938_v41 = vadd.f32 %v5743_v60, %v1937_v8  ;;  %v4422_v25 = vpop.f32.mrb[66].mxu0  ;;  %v5874_v57 = vadd.f32 %v4227_v14, %v4091_v23  ;;  %v4230_v19 = vadd.f32 %v4229_v55, %v4228_v21 }
 0x1c3   : > { %v5877_v45 = vadd.f32 %v5796_v32, %v1946_v24  ;;  %v1949_v44 = vadd.f32 %v4422_v25, %v5758_v38  ;;  %v1940_v26 = vpop.f32.mrb[67].mxu0 }
 0x1c4   : > { %v5881_v29 = vadd.f32 %v5784_v16, %v1938_v41  ;;  %v1941_v30 = vadd.f32 %v5746_v43, %v1940_v26  ;;  %v5884_v36 = vadd.f32 %v4230_v19, %v4094_v39 }
 0x1c5   : > { %v5887_v15 = vadd.f32 %v5800_v34, %v1949_v44 }
 0x1c6   : > { %v2246_v60 = vadd.f32 %v5788_v62, %v1941_v30  ;;  %v4231_v23 = vpop.f32.mrb[72].mxu1 }
 0x1c7   : > { %v4232_v7 = vpop.f32.mrb[73].mxu1 }
 0x1c8   : > { %v4425_v17 = vpop.f32.mrb[68].mxu0  ;;  %v4233_v32 = vadd.f32 %v4232_v7, %v4231_v23  ;;  %v4234_v50 = vpop.f32.mrb[74].mxu1 }
 0x1c9   : > { %v1962_v38 = vadd.f32 %v4425_v17, %v5786_v11  ;;  %v1953_v37 = vpop.f32.mrb[69].mxu0  ;;  %v4235_v14 = vpop.f32.mrb[75].mxu1 }
 0x1ca   : > { %v1954_v16 = vadd.f32 %v5771_v46, %v1953_v37  ;;  %v4426_v41 = vpop.f32.mrb[70].mxu0  ;;  %v5892_v43 = vadd.f32 %v4233_v32, %v4097_v53  ;;  %v4236_v39 = vadd.f32 %v4235_v14, %v4234_v50 }
 0x1cb   : > { %v5895_v34 = vadd.f32 %v5819_v59, %v1962_v38  ;;  %v1965_v62 = vadd.f32 %v4426_v41, %v5790_v2  ;;  %v1956_v21 = vpop.f32.mrb[71].mxu0 }
 0x1cc   : > { %v2259_v24 = vadd.f32 %v5808_v31, %v1954_v16  ;;  %v1957_v8 = vadd.f32 %v5774_v13, %v1956_v21  ;;  %v5900_v55 = vadd.f32 %v4236_v39, %v4100_v51 }
 0x1cd   : > { %v5903_v11 = vadd.f32 %v5823_v6, %v1965_v62 }
 0x1ce   : > { %v2262_v46 = vadd.f32 %v5812_v0, %v1957_v8  ;;  %v4237_v53 = vpop.f32.mrb[76].mxu1 }
 0x1cf   : > { %v4238_v25 = vpop.f32.mrb[77].mxu1 }
 0x1d0   : > { %v4429_v19 = vpop.f32.mrb[72].mxu0  ;;  %v4239_v44 = vadd.f32 %v4238_v25, %v4237_v53  ;;  %v4240_v59 = vpop.f32.mrb[78].mxu1 }
 0x1d1   : > { %v1978_v26 = vadd.f32 %v4429_v19, %v5810_v58  ;;  %v1969_v2 = vpop.f32.mrb[73].mxu0  ;;  %v4241_v30 = vpop.f32.mrb[79].mxu1 }
 0x1d2   : > { %v1970_v31 = vadd.f32 %v5798_v20, %v1969_v2  ;;  %v4430_v23 = vpop.f32.mrb[74].mxu0  ;;  %v5908_v13 = vadd.f32 %v4239_v44, %v4103_v5  ;;  %v4242_v51 = vadd.f32 %v4241_v30, %v4240_v59 }
 0x1d3   : > { %v5911_v6 = vadd.f32 %v5840_v10, %v1978_v26  ;;  %v1981_v0 = vadd.f32 %v4430_v23, %v5815_v49  ;;  %v1972_v7 = vpop.f32.mrb[75].mxu0 }
 0x1d4   : > { %v2275_v17 = vadd.f32 %v5830_v3, %v1970_v31  ;;  %v1973_v32 = vadd.f32 %v5803_v61, %v1972_v7  ;;  %v5916_v50 = vadd.f32 %v4242_v51, %v4106_v12 }
 0x1d5   : > { %v2286_v58 = vadd.f32 %v5842_v28, %v1981_v0 }
 0x1d6   : > { %v2278_v20 = vadd.f32 %v5835_v4, %v1973_v32 }
 0x1d8   : > { %v4433_v38 = vpop.f32.mrb[76].mxu0 }
 0x1d9   : > { %v1994_v5 = vadd.f32 %v4433_v38, %v5833_v56  ;;  %v1985_v37 = vpop.f32.mrb[77].mxu0 }
 0x1da   : > { %v1986_v10 = vadd.f32 %v5821_v42, %v1985_v37  ;;  %v4434_v14 = vpop.f32.mrb[78].mxu0 }
 0x1db   : > { %v5923_v49 = vadd.f32 %v5848_v33, %v1994_v5  ;;  %v1997_v3 = vadd.f32 %v4434_v14, %v5838_v47  ;;  %v1988_v16 = vpop.f32.mrb[79].mxu0 }
 0x1dc   : > { %v2291_v61 = vadd.f32 %v5844_v52, %v1986_v10  ;;  %v1989_v12 = vadd.f32 %v5826_v9, %v1988_v16 }
 0x1dd   : > { %v5929_v28 = vadd.f32 %v5850_v48, %v1997_v3 }
 0x1de   : > { %v2294_v4 = vadd.f32 %v5846_v22, %v1989_v12 }
 0x1e0   : > { %v4283_v56 = vpop.f32.mrb[80].mxu0 }
 0x1e1   : > { %v4284_v41 = vpop.f32.mrb[81].mxu0 }
 0x1e2   : > { %v4285_v39 = vadd.f32 %v4284_v41, %v4283_v56  ;;  %v4286_v42 = vpop.f32.mrb[82].mxu0 }
 0x1e3   : > { %v4287_v62 = vpop.f32.mrb[83].mxu0 }
 0x1e4   : > { %v4288_v21 = vadd.f32 %v4287_v62, %v4286_v42  ;;  %v4569_v33 = vadd.f32 %v4285_v39, %v5881_v29 }
 0x1e6   : > { %v4577_v8 = vadd.f32 %v4288_v21, %v2246_v60 }
 0x1e8   : > { %v4289_v47 = vpop.f32.mrb[84].mxu0 }
 0x1e9   : > { %v4290_v53 = vpop.f32.mrb[85].mxu0 }
 0x1ea   : > { %v4291_v25 = vadd.f32 %v4290_v53, %v4289_v47  ;;  %v4292_v52 = vpop.f32.mrb[86].mxu0 }
 0x1eb   : > { %v4293_v19 = vpop.f32.mrb[87].mxu0 }
 0x1ec   : > { %v4294_v9 = vadd.f32 %v4293_v19, %v4292_v52  ;;  %v4565_v48 = vadd.f32 %v4291_v25, %v5877_v45 }
 0x1ee   : > { %v4573_v44 = vadd.f32 %v4294_v9, %v5887_v15 }
 0x1f0   : > { %v4295_v22 = vpop.f32.mrb[88].mxu0 }
 0x1f1   : > { %v4296_v59 = vpop.f32.mrb[89].mxu0 }
 0x1f2   : > { %v4297_v26 = vadd.f32 %v4296_v59, %v4295_v22  ;;  %v4298_v2 = vpop.f32.mrb[90].mxu0 }
 0x1f3   : > { %v4299_v30 = vpop.f32.mrb[91].mxu0 }
 0x1f4   : > { %v4300_v31 = vadd.f32 %v4299_v30, %v4298_v2  ;;  %v5935_v23 = vadd.f32 %v4297_v26, %v2259_v24 }
 0x1f6   : > { %v5937_v29 = vadd.f32 %v4300_v31, %v2262_v46 }
 0x1f8   : > { %v4301_v60 = vpop.f32.mrb[92].mxu0 }
 0x1f9   : > { %v4302_v51 = vpop.f32.mrb[93].mxu0 }
 0x1fa   : > { %v4303_v0 = vadd.f32 %v4302_v51, %v4301_v60  ;;  %v4304_v7 = vpop.f32.mrb[94].mxu0 }
 0x1fb   : > { %v4305_v32 = vpop.f32.mrb[95].mxu0 }
 0x1fc   : > { %v4306_v38 = vadd.f32 %v4305_v32, %v4304_v7  ;;  %v4581_v45 = vadd.f32 %v4303_v0, %v5895_v34 }
 0x1fe   : > { %v4589_v15 = vadd.f32 %v4306_v38, %v5903_v11 }
 0x200   : > { %v4307_v5 = vpop.f32.mrb[96].mxu0 }
 0x201   : > { %v4308_v37 = vpop.f32.mrb[97].mxu0 }
 0x202   : > { %v4309_v10 = vadd.f32 %v4308_v37, %v4307_v5  ;;  %v4310_v14 = vpop.f32.mrb[98].mxu0 }
 0x203   : > { %v4311_v3 = vpop.f32.mrb[99].mxu0 }
 0x204   : > { %v4312_v16 = vadd.f32 %v4311_v3, %v4310_v14  ;;  %v5941_v24 = vadd.f32 %v4309_v10, %v2275_v17 }
 0x206   : > { %v5943_v46 = vadd.f32 %v4312_v16, %v2278_v20 }
 0x208   : > { %v4313_v12 = vpop.f32.mrb[100].mxu0 }
 0x209   : > { %v4314_v56 = vpop.f32.mrb[101].mxu0 }
 0x20a   : > { %v4315_v41 = vadd.f32 %v4314_v56, %v4313_v12  ;;  %v4316_v39 = vpop.f32.mrb[102].mxu0 }
 0x20b   : > { %v4317_v42 = vpop.f32.mrb[103].mxu0 }
 0x20c   : > { %v4318_v62 = vadd.f32 %v4317_v42, %v4316_v39  ;;  %v5946_v34 = vadd.f32 %v4315_v41, %v5911_v6 }
 0x20e   : > { %v5948_v11 = vadd.f32 %v4318_v62, %v2286_v58 }
 0x210   : > { %v4319_v21 = vpop.f32.mrb[104].mxu0 }
 0x211   : > { %v4320_v47 = vpop.f32.mrb[105].mxu0 }
 0x212   : > { %v4321_v53 = vadd.f32 %v4320_v47, %v4319_v21  ;;  %v4322_v25 = vpop.f32.mrb[106].mxu0 }
 0x213   : > { %v4323_v17 = vpop.f32.mrb[107].mxu0 }
 0x214   : > { %v4324_v52 = vadd.f32 %v4323_v17, %v4322_v25  ;;  %v5950_v20 = vadd.f32 %v4321_v53, %v2291_v61 }
 0x216   : > { %v4517_v19 = vpop.f32.mrb[80].mxu1  ;;  %v5952_v9 = vadd.f32 %v4324_v52, %v2294_v4 }
 0x217   : > { %v4566_v22 = vadd.f32 %v4565_v48, %v4517_v19  ;;  %v2944_v59 = vpop.f32.mrb[81].mxu1 }
 0x218   : > { %v4325_v26 = vpop.f32.mrb[108].mxu0  ;;  %v4570_v2 = vadd.f32 %v4569_v33, %v2944_v59  ;;  %v4518_v6 = vpop.f32.mrb[82].mxu1 }
 0x219   : > { %v4326_v30 = vpop.f32.mrb[109].mxu0  ;;  %v4574_v58 = vadd.f32 %v4573_v44, %v4518_v6  ;;  %v2947_v31 = vpop.f32.mrb[83].mxu1  ;;  %v3303_v5 = vmul.f32 %v4566_v22, %v4566_v22 }
 0x21a   : > { %v4327_v60 = vadd.f32 %v4326_v30, %v4325_v26  ;;  %v4328_v51 = vpop.f32.mrb[110].mxu0  ;;  %v4578_v61 = vadd.f32 %v4577_v8, %v2947_v31  ;;  %v3301_v48 = vmul.f32 %v4570_v2, %v4570_v2 }
 0x21b   : > { %v4329_v4 = vpop.f32.mrb[111].mxu0  ;;  %v3893_v0 = vpack.c.bf16 %v4574_v58, %v4566_v22  ;;  %v3304_v12 = vmul.f32 %v4574_v58, %v4574_v58 }
 0x21c   : > { %v4330_v7 = vadd.f32 %v4329_v4, %v4328_v51  ;;  %v3888_v33 = vpack.c.bf16 %v4578_v61, %v4570_v2  ;;  %v3263_v32 = vadd.f32 %v4578_v61, %v4570_v2  ;;  %v3302_v38 = vmul.f32 %v4578_v61, %v4578_v61 }
 0x21d   : > { %3980 = vst [vmem:[%s5959_s22 + $0x8] sm:$0xff] %v3893_v0   ;;  %v5963_v44 = vadd.f32 %v4327_v60, %v5923_v49 }
 0x21e   : > { %3889 = vst [vmem:[%s5959_s22] sm:$0xff] %v3888_v33   ;;  %v3264_v37 = vadd.f32 %v4566_v22, %v3263_v32  ;;  %v3333_v10 = vadd.f32 %v3302_v38, %v3301_v48  ;;  %v4521_v14 = vpop.f32.mrb[84].mxu1  ;;  %v5967_v3 = vadd.f32 %v4330_v7, %v5929_v28 }
 0x21f   : > { %v4582_v8 = vadd.f32 %v4581_v45, %v4521_v14  ;;  %v2960_v16 = vpop.f32.mrb[85].mxu1 }
 0x220   : > { %v3334_v56 = vadd.f32 %v3333_v10, %v3303_v5  ;;  %v4331_v41 = vpop.f32.mrb[112].mxu0  ;;  %v4586_v39 = vadd.f32 %v5935_v23, %v2960_v16  ;;  %v3265_v42 = vadd.f32 %v4574_v58, %v3264_v37  ;;  %v4522_v62 = vpop.f32.mrb[86].mxu1 }
 0x221   : > { %v4332_v49 = vpop.f32.mrb[113].mxu0  ;;  %v4590_v21 = vadd.f32 %v4589_v15, %v4522_v62  ;;  %v2963_v47 = vpop.f32.mrb[87].mxu1  ;;  %v3307_v31 = vmul.f32 %v4582_v8, %v4582_v8 }
 0x222   : > { %v4333_v53 = vadd.f32 %v4332_v49, %v4331_v41  ;;  %v4334_v25 = vpop.f32.mrb[114].mxu0  ;;  %v3266_v17 = vadd.f32 %v4586_v39, %v3265_v42  ;;  %v3305_v52 = vmul.f32 %v4586_v39, %v4586_v39  ;;  %v3335_v28 = vadd.f32 %v3334_v56, %v3304_v12 }
 0x223   : > { %v4335_v19 = vpop.f32.mrb[115].mxu0  ;;  %v3903_v45 = vpack.c.bf16 %v4590_v21, %v4582_v8  ;;  %v4594_v22 = vadd.f32 %v5937_v29, %v2963_v47  ;;  %v3308_v0 = vmul.f32 %v4590_v21, %v4590_v21 }
 0x224   : > { %v4336_v59 = vadd.f32 %v4335_v19, %v4334_v25  ;;  %v3336_v26 = vadd.f32 %v3335_v28, %v3305_v52  ;;  %v5972_v23 = vadd.f32 %v5852_v35, %v4333_v53 }
 0x225   : > { %3982 = vst [vmem:[%s5959_s22 + $0x18] sm:$0xff] %v3903_v45   ;;  %v3898_v2 = vpack.c.bf16 %v4594_v22, %v4586_v39  ;;  %v3267_v6 = vadd.f32 %v4594_v22, %v3266_v17  ;;  %v3306_v15 = vmul.f32 %v4594_v22, %v4594_v22 }
 0x226   : > { %v4525_v30 = vpop.f32.mrb[88].mxu1  ;;  %v5976_v58 = vadd.f32 %v5854_v40, %v4336_v59 }
 0x227   : > { %3981 = vst [vmem:[%s5959_s22 + $0x10] sm:$0xff] %v3898_v2   ;;  %v3268_v60 = vadd.f32 %v4582_v8, %v3267_v6  ;;  %v3337_v51 = vadd.f32 %v3336_v26, %v3306_v15  ;;  %v4598_v61 = vadd.f32 %v5946_v34, %v4525_v30  ;;  %v2976_v29 = vpop.f32.mrb[89].mxu1 }
 0x228   : > { %v4337_v4 = vpop.f32.mrb[116].mxu0  ;;  %v4602_v48 = vadd.f32 %v5941_v24, %v2976_v29  ;;  %v4526_v35 = vpop.f32.mrb[90].mxu1  ;;  %v6041_v29 = vld [vmem:[#allocation3_spill] sm:$0xff] }
 0x229   : > { %v3338_v7 = vadd.f32 %v3337_v51, %v3307_v31  ;;  %v4338_v33 = vpop.f32.mrb[117].mxu0  ;;  %v3269_v32 = vadd.f32 %v4590_v21, %v3268_v60  ;;  %v4606_v38 = vadd.f32 %v5948_v11, %v4526_v35  ;;  %v2979_v40 = vpop.f32.mrb[91].mxu1  ;;  %v3311_v21 = vmul.f32 %v4598_v61, %v4598_v61 }
 0x22a   : > { %v4339_v5 = vadd.f32 %v4338_v33, %v4337_v4  ;;  %v4340_v37 = vpop.f32.mrb[118].mxu0  ;;  %v3309_v10 = vmul.f32 %v4602_v48, %v4602_v48  ;;  %v4610_v14 = vadd.f32 %v5943_v46, %v2979_v40 }
 0x22b   : > { %v4341_v34 = vpop.f32.mrb[119].mxu0  ;;  %v3270_v8 = vadd.f32 %v4602_v48, %v3269_v32  ;;  %v3339_v16 = vadd.f32 %v3338_v7, %v3308_v0  ;;  %v3913_v12 = vpack.c.bf16 %v4606_v38, %v4598_v61  ;;  %v3312_v19 = vmul.f32 %v4606_v38, %v4606_v38  ;;  %v6042_v0 = vld [vmem:[#allocation4_spill] sm:$0xff] }
 0x22c   : > { %v4342_v24 = vadd.f32 %v4341_v34, %v4340_v37  ;;  %v3908_v56 = vpack.c.bf16 %v4610_v14, %v4602_v48  ;;  %v3310_v41 = vmul.f32 %v4610_v14, %v4610_v14  ;;  %v4628_v39 = vadd.f32 %v5856_v54, %v4339_v5 }
 0x22d   : > { %v3340_v42 = vadd.f32 %v3339_v16, %v3309_v10  ;;  %3984 = vst [vmem:[%s5959_s22 + $0x28] sm:$0xff] %v3913_v12   ;;  %v3271_v62 = vadd.f32 %v4610_v14, %v3270_v8 }
 0x22e   : > { %3983 = vst [vmem:[%s5959_s22 + $0x20] sm:$0xff] %v3908_v56   ;;  %v4529_v11 = vpop.f32.mrb[92].mxu1  ;;  %v4634_v49 = vadd.f32 %v5858_v27, %v4342_v24 }
 0x22f   : > { %v3272_v47 = vadd.f32 %v4598_v61, %v3271_v62  ;;  %v3341_v53 = vadd.f32 %v3340_v42, %v3310_v41  ;;  %v4614_v46 = vadd.f32 %v5963_v44, %v4529_v11  ;;  %v2992_v25 = vpop.f32.mrb[93].mxu1 }
 0x230   : > { %v4343_v17 = vpop.f32.mrb[120].mxu0  ;;  %v4618_v52 = vadd.f32 %v5950_v20, %v2992_v25  ;;  %v4530_v28 = vpop.f32.mrb[94].mxu1 }
 0x231   : > { %v3342_v45 = vadd.f32 %v3341_v53, %v3311_v21  ;;  %v4344_v54 = vpop.f32.mrb[121].mxu0  ;;  %v3273_v22 = vadd.f32 %v4606_v38, %v3272_v47  ;;  %v4622_v59 = vadd.f32 %v5967_v3, %v4530_v28  ;;  %v2995_v26 = vpop.f32.mrb[95].mxu1  ;;  %v3315_v33 = vmul.f32 %v4614_v46, %v4614_v46  ;;  %v6043_v28 = vld [vmem:[#allocation5_spill] sm:$0xff] }
 0x232   : > { %v4345_v27 = vadd.f32 %v4344_v54, %v4343_v17  ;;  %v4346_v2 = vpop.f32.mrb[122].mxu0  ;;  %v3313_v6 = vmul.f32 %v4618_v52, %v4618_v52  ;;  %v4626_v15 = vadd.f32 %v5952_v9, %v2995_v26 }
 0x233   : > { %v4347_v44 = vpop.f32.mrb[123].mxu0  ;;  %v3274_v30 = vadd.f32 %v4618_v52, %v3273_v22  ;;  %v3343_v31 = vadd.f32 %v3342_v45, %v3312_v19  ;;  %v3923_v60 = vpack.c.bf16 %v4622_v59, %v4614_v46  ;;  %v3316_v14 = vmul.f32 %v4622_v59, %v4622_v59 }
 0x234   : > { %v4348_v20 = vadd.f32 %v4347_v44, %v4346_v2  ;;  %v3918_v51 = vpack.c.bf16 %v4626_v15, %v4618_v52  ;;  %v3314_v61 = vmul.f32 %v4626_v15, %v4626_v15  ;;  %v4643_v4 = vadd.f32 %v6041_v29, %v4345_v27 }
 0x235   : > { %v3344_v48 = vadd.f32 %v3343_v31, %v3313_v6  ;;  %3986 = vst [vmem:[%s5959_s22 + $0x38] sm:$0xff] %v3923_v60   ;;  %v3275_v35 = vadd.f32 %v4626_v15, %v3274_v30 }
 0x236   : > { %3985 = vst [vmem:[%s5959_s22 + $0x30] sm:$0xff] %v3918_v51   ;;  %v4533_v3 = vpop.f32.mrb[0].mxu1  ;;  %v4649_v7 = vadd.f32 %v6042_v0, %v4348_v20 }
 0x237   : > { %v3276_v32 = vadd.f32 %v4614_v46, %v3275_v35  ;;  %v3345_v38 = vadd.f32 %v3344_v48, %v3314_v61  ;;  %v4629_v9 = vadd.f32 %v4628_v39, %v4533_v3  ;;  %v3008_v40 = vpop.f32.mrb[1].mxu1 }
 0x238   : > { %v4349_v5 = vpop.f32.mrb[124].mxu0  ;;  %v4632_v37 = vadd.f32 %v5972_v23, %v3008_v40  ;;  %v4534_v10 = vpop.f32.mrb[2].mxu1 }
 0x239   : > { %v3346_v34 = vadd.f32 %v3345_v38, %v3315_v33  ;;  %v4350_v8 = vpop.f32.mrb[125].mxu0  ;;  %v3277_v16 = vadd.f32 %v4622_v59, %v3276_v32  ;;  %v4635_v12 = vadd.f32 %v4634_v49, %v4534_v10  ;;  %v3011_v24 = vpop.f32.mrb[3].mxu1  ;;  %v3319_v45 = vmul.f32 %v4629_v9, %v4629_v9 }
 0x23a   : > { %v4351_v56 = vadd.f32 %v4350_v8, %v4349_v5  ;;  %v4352_v41 = vpop.f32.mrb[126].mxu0  ;;  %v3317_v42 = vmul.f32 %v4632_v37, %v4632_v37  ;;  %v4638_v62 = vadd.f32 %v5976_v58, %v3011_v24 }
 0x23b   : > { %v4353_v11 = vpop.f32.mrb[127].mxu0  ;;  %v3278_v39 = vadd.f32 %v4632_v37, %v3277_v16  ;;  %v3347_v21 = vadd.f32 %v3346_v34, %v3316_v14  ;;  %v3933_v47 = vpack.c.bf16 %v4635_v12, %v4629_v9  ;;  %v3320_v6 = vmul.f32 %v4635_v12, %v4635_v12 }
 0x23c   : > { %v4354_v53 = vadd.f32 %v4353_v11, %v4352_v41  ;;  %v3928_v23 = vpack.c.bf16 %v4638_v62, %v4632_v37  ;;  %v3318_v46 = vmul.f32 %v4638_v62, %v4638_v62  ;;  %v4640_v25 = vadd.f32 %v5864_v1, %v4351_v56 }
 0x23d   : > { %v3348_v17 = vadd.f32 %v3347_v21, %v3317_v42  ;;  %3988 = vst [vmem:[%s5959_s22 + $0x48] sm:$0xff] %v3933_v47   ;;  %v3279_v52 = vadd.f32 %v4638_v62, %v3278_v39 }
 0x23e   : > { %3987 = vst [vmem:[%s5959_s22 + $0x40] sm:$0xff] %v3928_v23   ;;  %v4537_v49 = vpop.f32.mrb[4].mxu1  ;;  %v4646_v19 = vadd.f32 %v6043_v28, %v4354_v53 }
 0x23f   : > { %v3280_v54 = vadd.f32 %v4629_v9, %v3279_v52  ;;  %v3349_v22 = vadd.f32 %v3348_v17, %v3318_v46  ;;  %v4641_v58 = vadd.f32 %v4640_v25, %v4537_v49  ;;  %v3024_v59 = vpop.f32.mrb[5].mxu1 }
 0x240   : > { %v4355_v26 = vpop.f32.mrb[128].mxu0  ;;  %v4644_v27 = vadd.f32 %v4643_v4, %v3024_v59  ;;  %v4538_v2 = vpop.f32.mrb[6].mxu1 }
 0x241   : > { %v3350_v15 = vadd.f32 %v3349_v22, %v3319_v45  ;;  %v4356_v44 = vpop.f32.mrb[129].mxu0  ;;  %v3281_v30 = vadd.f32 %v4635_v12, %v3280_v54  ;;  %v4647_v1 = vadd.f32 %v4646_v19, %v4538_v2  ;;  %v3027_v31 = vpop.f32.mrb[7].mxu1  ;;  %v3323_v37 = vmul.f32 %v4641_v58, %v4641_v58 }
 0x242   : > { %v4357_v60 = vadd.f32 %v4356_v44, %v4355_v26  ;;  %v4358_v20 = vpop.f32.mrb[130].mxu0  ;;  %v3321_v51 = vmul.f32 %v4644_v27, %v4644_v27  ;;  %v4650_v61 = vadd.f32 %v4649_v7, %v3027_v31 }
 0x243   : > { %v4359_v29 = vpop.f32.mrb[131].mxu0  ;;  %v3282_v48 = vadd.f32 %v4644_v27, %v3281_v30  ;;  %v3351_v35 = vadd.f32 %v3350_v15, %v3320_v6  ;;  %v3943_v3 = vpack.c.bf16 %v4647_v1, %v4641_v58  ;;  %v3324_v12 = vmul.f32 %v4647_v1, %v4647_v1 }
 0x244   : > { %v4360_v0 = vadd.f32 %v4359_v29, %v4358_v20  ;;  %v3938_v33 = vpack.c.bf16 %v4650_v61, %v4644_v27  ;;  %v3322_v4 = vmul.f32 %v4650_v61, %v4650_v61  ;;  %v4655_v32 = vadd.f32 %v5868_v18, %v4357_v60 }
 0x245   : > { %v3352_v38 = vadd.f32 %v3351_v35, %v3321_v51  ;;  %3990 = vst [vmem:[%s5959_s22 + $0x58] sm:$0xff] %v3943_v3   ;;  %v3283_v9 = vadd.f32 %v4650_v61, %v3282_v48 }
 0x246   : > { %3989 = vst [vmem:[%s5959_s22 + $0x50] sm:$0xff] %v3938_v33   ;;  %v4541_v40 = vpop.f32.mrb[8].mxu1  ;;  %v4661_v5 = vadd.f32 %v5870_v63, %v4360_v0 }
 0x247   : > { %v3284_v10 = vadd.f32 %v4641_v58, %v3283_v9  ;;  %v3353_v14 = vadd.f32 %v3352_v38, %v3322_v4  ;;  %v3040_v7 = vpop.f32.mrb[9].mxu1 }
 0x248   : > { %v4361_v34 = vpop.f32.mrb[132].mxu0  ;;  %v4656_v8 = vadd.f32 %v4655_v32, %v3040_v7  ;;  %v4542_v16 = vpop.f32.mrb[10].mxu1 }
 0x249   : > { %v3354_v24 = vadd.f32 %v3353_v14, %v3323_v37  ;;  %v4362_v56 = vpop.f32.mrb[133].mxu0  ;;  %v3285_v41 = vadd.f32 %v4647_v1, %v3284_v10  ;;  %v3043_v42 = vpop.f32.mrb[11].mxu1 }
 0x24a   : > { %v4363_v18 = vadd.f32 %v4362_v56, %v4361_v34  ;;  %v4364_v62 = vpop.f32.mrb[134].mxu0  ;;  %v3325_v11 = vmul.f32 %v4656_v8, %v4656_v8  ;;  %v4662_v39 = vadd.f32 %v4661_v5, %v3043_v42 }
 0x24b   : > { %v4365_v21 = vpop.f32.mrb[135].mxu0  ;;  %v3286_v47 = vadd.f32 %v4656_v8, %v3285_v41  ;;  %v3355_v63 = vadd.f32 %v3354_v24, %v3324_v12 }
 0x24c   : > { %v4366_v53 = vadd.f32 %v4365_v21, %v4364_v62  ;;  %v4652_v23 = vadd.f32 %v5874_v57, %v4363_v18  ;;  %v3948_v46 = vpack.c.bf16 %v4662_v39, %v4656_v8  ;;  %v3326_v25 = vmul.f32 %v4662_v39, %v4662_v39 }
 0x24d   : > { %v3356_v17 = vadd.f32 %v3355_v63, %v3325_v11  ;;  %v3287_v52 = vadd.f32 %v4662_v39, %v3286_v47 }
 0x24e   : > { %v4653_v49 = vadd.f32 %v4652_v23, %v4541_v40  ;;  %v4658_v28 = vadd.f32 %v5884_v36, %v4366_v53  ;;  %3991 = vst [vmem:[%s5959_s22 + $0x60] sm:$0xff] %v3948_v46   ;;  %v4545_v19 = vpop.f32.mrb[12].mxu1 }
 0x24f   : > { %v3357_v45 = vadd.f32 %v3356_v17, %v3326_v25  ;;  %v3056_v54 = vpop.f32.mrb[13].mxu1 }
 0x250   : > { %v3327_v22 = vmul.f32 %v4653_v49, %v4653_v49  ;;  %v4659_v58 = vadd.f32 %v4658_v28, %v4542_v16  ;;  %v3288_v59 = vadd.f32 %v4653_v49, %v3287_v52  ;;  %v4367_v26 = vpop.f32.mrb[136].mxu0  ;;  %v4546_v27 = vpop.f32.mrb[14].mxu1 }
 0x251   : > { %v4368_v2 = vpop.f32.mrb[137].mxu0  ;;  %v3059_v6 = vpop.f32.mrb[15].mxu1 }
 0x252   : > { %v3953_v57 = vpack.c.bf16 %v4659_v58, %v4653_v49  ;;  %v3328_v15 = vmul.f32 %v4659_v58, %v4659_v58  ;;  %v3358_v44 = vadd.f32 %v3357_v45, %v3327_v22  ;;  %v4369_v30 = vadd.f32 %v4368_v2, %v4367_v26  ;;  %v4370_v1 = vpop.f32.mrb[138].mxu0 }
 0x253   : > { %v4371_v31 = vpop.f32.mrb[139].mxu0  ;;  %v3289_v60 = vadd.f32 %v4659_v58, %v3288_v59 }
 0x254   : > { %3992 = vst [vmem:[%s5959_s22 + $0x68] sm:$0xff] %v3953_v57   ;;  %v4372_v36 = vadd.f32 %v4371_v31, %v4370_v1  ;;  %v4667_v20 = vadd.f32 %v5892_v43, %v4369_v30  ;;  %v3359_v51 = vadd.f32 %v3358_v44, %v3328_v15 }
 0x256   : > { %v4668_v61 = vadd.f32 %v4667_v20, %v3056_v54  ;;  %v4673_v29 = vadd.f32 %v5900_v55, %v4372_v36 }
 0x258   : > { %v3290_v48 = vadd.f32 %v4668_v61, %v3289_v60  ;;  %v3329_v35 = vmul.f32 %v4668_v61, %v4668_v61  ;;  %v4674_v3 = vadd.f32 %v4673_v29, %v3059_v6  ;;  %v4373_v0 = vpop.f32.mrb[140].mxu0 }
 0x259   : > { %v4374_v33 = vpop.f32.mrb[141].mxu0 }
 0x25a   : > { %v3360_v4 = vadd.f32 %v3359_v51, %v3329_v35  ;;  %v3958_v32 = vpack.c.bf16 %v4674_v3, %v4668_v61  ;;  %v3291_v38 = vadd.f32 %v4674_v3, %v3290_v48  ;;  %v3330_v9 = vmul.f32 %v4674_v3, %v4674_v3  ;;  %v4376_v40 = vpop.f32.mrb[142].mxu0 }
 0x25b   : > { %v4375_v5 = vadd.f32 %v4374_v33, %v4373_v0  ;;  %v4377_v37 = vpop.f32.mrb[143].mxu0 }
 0x25c   : > { %3993 = vst [vmem:[%s5959_s22 + $0x70] sm:$0xff] %v3958_v32   ;;  %v3361_v43 = vadd.f32 %v3360_v4, %v3330_v9  ;;  %v4378_v10 = vadd.f32 %v4377_v37, %v4376_v40 }
 0x25d   : > { %v4664_v14 = vadd.f32 %v5908_v13, %v4375_v5 }
 0x25e   : > { %v4670_v55 = vadd.f32 %v5916_v50, %v4378_v10 }
 0x25f   : > { %v4665_v7 = vadd.f32 %v4664_v14, %v4545_v19 }
 0x260   : > { %v4671_v34 = vadd.f32 %v4670_v55, %v4546_v27 }
 0x261   : > { %v3292_v8 = vadd.f32 %v4665_v7, %v3291_v38  ;;  %v3331_v16 = vmul.f32 %v4665_v7, %v4665_v7 }
 0x262   : > { %v3963_v12 = vpack.c.bf16 %v4671_v34, %v4665_v7  ;;  %v3332_v24 = vmul.f32 %v4671_v34, %v4671_v34 }
 0x263   : > { %v3362_v56 = vadd.f32 %v3361_v43, %v3331_v16  ;;  %v3293_v41 = vadd.f32 %v4671_v34, %v3292_v8 }
 0x264   : > { %3994 = vst [vmem:[%s5959_s22 + $0x78] sm:$0xff] %v3963_v12  }
 0x265   : > { %v3294_v42 = vrot.slane %v3293_v41, 4  ;;  %v3363_v18 = vadd.f32 %v3362_v56, %v3332_v24 }
 0x267   : > { %v3295_v62 = vadd.f32 %v3294_v42, %v3293_v41  ;;  %v3364_v11 = vrot.slane %v3363_v18, 4 }
 0x269   : > { %v3296_v39 = vrot.slane %v3295_v62, 2  ;;  %v3365_v21 = vadd.f32 %v3364_v11, %v3363_v18 }
 0x26b   : > { %v3297_v13 = vadd.f32 %v3296_v39, %v3295_v62  ;;  %v3366_v47 = vrot.slane %v3365_v21, 2 }
 0x26d   : > { %v3298_v50 = vrot.slane %v3297_v13, 1  ;;  %v3367_v63 = vadd.f32 %v3366_v47, %v3365_v21 }
 0x26f   : > { %v3299_v53 = vadd.f32 %v3298_v50, %v3297_v13  ;;  %v3368_v23 = vrot.slane %v3367_v63, 1 }
 0x271   : > { %3300 = vst [vmem:[%s238_s24] sm:$0x1] %v3299_v53  ;;  %v3369_v46 = vadd.f32 %v3368_v23, %v3367_v63 }
 0x273   : > { %3370 = vst [vmem:[%s241_s26] sm:$0x1] %v3369_v46 }
 0x274 PF: > { %s16_s18 = sadd.s32 1, %s4865_s18  }
 0x275   : > { %p13_p4 = scmp.ge.s32.totalorder %s16_s18, 4  }
 0x277   :  { %15 = sbr.rel (!%p13_p4) target bundleno = 1 (0x1), region = 89 }

</bundles_post_ra>
